<compile_context>
chip_gen: v7x
topology: tpu7x:2x2x1
jax: 0.10.0
libtpu: 0.0.40
codegen_flags: <defaults>
</compile_context>

<pallas_src>
import functools
import math

import jax
import jax.numpy as jnp
from jax import lax
from jax.experimental import pallas as pl
from jax.experimental.pallas import tpu as pltpu  # noqa: F401  (TPU backend)

# ---------------------------------------------------------------------------
# Model hyper-parameters (small, deterministic synthetic model)
# ---------------------------------------------------------------------------
VOCAB = 32
D_MODEL = 32
N_HEADS = 2
D_HEAD = D_MODEL // N_HEADS
D_FF = 64
N_ENC_LAYERS = 2
N_DEC_LAYERS = 2
MAX_LEN = 16
PAD_IDX = 1
NEG_INF = -1e9          # python float (never captured as a jnp constant)
LN_EPS = 1e-5


# ---------------------------------------------------------------------------
# In-kernel helper functions (operate on jnp values, fully fused)
# ---------------------------------------------------------------------------
def _layer_norm(h, g, b):
    mean = jnp.mean(h, axis=-1, keepdims=True)
    var = jnp.mean(jnp.square(h - mean), axis=-1, keepdims=True)
    return (h - mean) * lax.rsqrt(var + LN_EPS) * g + b


def _attention(q, k, v, mask_add, b_size, sq, sk):
    """q: (B*Sq, D), k/v: (B*Sk, D), mask_add: (B, Sq, Sk) additive {0,-1e9}."""
    scale = 1.0 / math.sqrt(D_HEAD)
    rows = []
    for b in range(b_size):                       # tiny static loops (B=2, H=2)
        qb = q[b * sq:(b + 1) * sq, :]
        kb = k[b * sk:(b + 1) * sk, :]
        vb = v[b * sk:(b + 1) * sk, :]
        mb = mask_add[b]                          # (Sq, Sk)
        heads = []
        for h in range(N_HEADS):
            lo, hi = h * D_HEAD, (h + 1) * D_HEAD
            qh, kh, vh = qb[:, lo:hi], kb[:, lo:hi], vb[:, lo:hi]
            # qh @ kh^T without materializing a transpose
            s = lax.dot_general(qh, kh, (((1,), (1,)), ((), ())),
                                preferred_element_type=jnp.float32)
            s = s * scale + mb                    # masked_fill(mask==0, -1e9)
            s = s - jnp.max(s, axis=-1, keepdims=True)
            p = jnp.exp(s)
            p = p / jnp.sum(p, axis=-1, keepdims=True)
            heads.append(jnp.dot(p, vh, preferred_element_type=jnp.float32))
        rows.append(jnp.concatenate(heads, axis=-1))      # (Sq, D)
    return jnp.concatenate(rows, axis=0)                  # (B*Sq, D)


def _self_mha(x, mask_add, wqkv, bqkv, wo, bo, b_size, s):
    qkv = jnp.dot(x, wqkv, preferred_element_type=jnp.float32) + bqkv
    q = qkv[:, :D_MODEL]
    k = qkv[:, D_MODEL:2 * D_MODEL]
    v = qkv[:, 2 * D_MODEL:]
    ctx = _attention(q, k, v, mask_add, b_size, s, s)
    return jnp.dot(ctx, wo, preferred_element_type=jnp.float32) + bo


def _cross_mha(x_q, x_kv, mask_add, wqkv, bqkv, wo, bo, b_size, sq, sk):
    q = jnp.dot(x_q, wqkv[:, :D_MODEL],
                preferred_element_type=jnp.float32) + bqkv[:, :D_MODEL]
    kv = jnp.dot(x_kv, wqkv[:, D_MODEL:],
                 preferred_element_type=jnp.float32) + bqkv[:, D_MODEL:]
    k = kv[:, :D_MODEL]
    v = kv[:, D_MODEL:]
    ctx = _attention(q, k, v, mask_add, b_size, sq, sk)
    return jnp.dot(ctx, wo, preferred_element_type=jnp.float32) + bo


def _ffn(x, w1, b1, w2, b2):
    h = jnp.maximum(jnp.dot(x, w1, preferred_element_type=jnp.float32) + b1, 0.0)
    return jnp.dot(h, w2, preferred_element_type=jnp.float32) + b2


# ---------------------------------------------------------------------------
# The single fused Pallas kernel: encoder + decoder + generator/log_softmax
# ---------------------------------------------------------------------------
def _transformer_kernel(
    # activations / masks
    src_emb_ref, tgt_emb_ref, src_mask_ref, tgt_mask_ref, st_mask_ref,
    # encoder params, stacked over layers (leading axis = layer)
    e_wqkv, e_bqkv, e_wo, e_bo, e_g1, e_be1, e_w1, e_b1, e_w2, e_b2, e_g2, e_be2,
    # decoder params, stacked over layers
    d_wqkv_s, d_bqkv_s, d_wo_s, d_bo_s, d_g1, d_be1,
    d_wqkv_c, d_bqkv_c, d_wo_c, d_bo_c, d_g2, d_be2,
    d_w1, d_b1, d_w2, d_b2, d_g3, d_be3,
    # generator params
    gen_w, gen_b,
    # outputs
    logp_ref, dec_out_ref,
    *, b_size, s_src, s_tgt):

    src_mask = src_mask_ref[...]
    tgt_mask = tgt_mask_ref[...]
    st_mask = st_mask_ref[...]

    # ---------------- encoder ----------------
    x = src_emb_ref[...]                                   # (B*Ss, D)
    for l in range(N_ENC_LAYERS):
        a = _self_mha(x, src_mask, e_wqkv[l], e_bqkv[l], e_wo[l], e_bo[l],
                      b_size, s_src)
        x = _layer_norm(a + x, e_g1[l], e_be1[l])
        f = _ffn(x, e_w1[l], e_b1[l], e_w2[l], e_b2[l])
        x = _layer_norm(f + x, e_g2[l], e_be2[l])
    enc_out = x

    # ---------------- decoder (reference applies src_embed to tgt) ----------
    y = tgt_emb_ref[...]                                   # (B*St, D)
    for l in range(N_DEC_LAYERS):
        a = _self_mha(y, tgt_mask, d_wqkv_s[l], d_bqkv_s[l], d_wo_s[l],
                      d_bo_s[l], b_size, s_tgt)
        y = _layer_norm(a + y, d_g1[l], d_be1[l])
        c = _cross_mha(y, enc_out, st_mask, d_wqkv_c[l], d_bqkv_c[l],
                       d_wo_c[l], d_bo_c[l], b_size, s_tgt, s_src)
        y = _layer_norm(c + y, d_g2[l], d_be2[l])
        f = _ffn(y, d_w1[l], d_b1[l], d_w2[l], d_b2[l])
        y = _layer_norm(f + y, d_g3[l], d_be3[l])

    dec_out_ref[...] = y.astype(dec_out_ref.dtype)

    # ---------------- generator + log_softmax (fused) -----------------------
    logits = jnp.dot(y, gen_w[...], preferred_element_type=jnp.float32) + gen_b[...]
    m = jnp.max(logits, axis=-1, keepdims=True)
    z = logits - m
    lse = jnp.log(jnp.sum(jnp.exp(z), axis=-1, keepdims=True))
    logp_ref[...] = (z - lse).astype(logp_ref.dtype)


# ---------------------------------------------------------------------------
# Plain-JAX glue: masks, embedding, parameter packing, wrapper
# ---------------------------------------------------------------------------
def make_pad_mask(Q_tok, K_tok, pad_idx=PAD_IDX):
    # (B, Sq, Sk) bool; heads share the mask so no head dim is materialized
    key_mask = (K_tok != pad_idx)[:, None, :]
    query_mask = (Q_tok != pad_idx)[:, :, None]
    return key_mask & query_mask


def make_subsequent_mask(sq, sk):
    return jnp.tril(jnp.ones((sq, sk), dtype=bool))


def _additive_mask(mask_bool):
    return jnp.where(mask_bool, 0.0, NEG_INF).astype(jnp.float32)


def embed(params, tokens):
    d_model = params["embed"]["table"].shape[1]
    e = jnp.take(params["embed"]["table"], tokens, axis=0) * math.sqrt(d_model)
    return e + params["embed"]["pe"][: tokens.shape[1]][None]


def _bias2d(b):
    return b.reshape(1, -1)


def pack_params(params):
    """Stack per-layer parameters along a leading layer axis, concat Wq/Wk/Wv."""
    def stack(layers, f):
        return jnp.stack([f(lp) for lp in layers])

    def qkv_w(p):
        return jnp.concatenate([p["wq"]["w"], p["wk"]["w"], p["wv"]["w"]], axis=1)

    def qkv_b(p):
        return jnp.concatenate([p["wq"]["b"], p["wk"]["b"], p["wv"]["b"]]).reshape(1, -1)

    enc = params["encoder"]
    dec = params["decoder"]

    enc_args = [
        stack(enc, lambda lp: qkv_w(lp["self_attn"])),
        stack(enc, lambda lp: qkv_b(lp["self_attn"])),
        stack(enc, lambda lp: lp["self_attn"]["wo"]["w"]),
        stack(enc, lambda lp: _bias2d(lp["self_attn"]["wo"]["b"])),
        stack(enc, lambda lp: _bias2d(lp["ln1"]["g"])),
        stack(enc, lambda lp: _bias2d(lp["ln1"]["b"])),
        stack(enc, lambda lp: lp["ffn"]["w1"]["w"]),
        stack(enc, lambda lp: _bias2d(lp["ffn"]["w1"]["b"])),
        stack(enc, lambda lp: lp["ffn"]["w2"]["w"]),
        stack(enc, lambda lp: _bias2d(lp["ffn"]["w2"]["b"])),
        stack(enc, lambda lp: _bias2d(lp["ln2"]["g"])),
        stack(enc, lambda lp: _bias2d(lp["ln2"]["b"])),
    ]
    dec_args = [
        stack(dec, lambda lp: qkv_w(lp["self_attn"])),
        stack(dec, lambda lp: qkv_b(lp["self_attn"])),
        stack(dec, lambda lp: lp["self_attn"]["wo"]["w"]),
        stack(dec, lambda lp: _bias2d(lp["self_attn"]["wo"]["b"])),
        stack(dec, lambda lp: _bias2d(lp["ln1"]["g"])),
        stack(dec, lambda lp: _bias2d(lp["ln1"]["b"])),
        stack(dec, lambda lp: qkv_w(lp["cross_attn"])),
        stack(dec, lambda lp: qkv_b(lp["cross_attn"])),
        stack(dec, lambda lp: lp["cross_attn"]["wo"]["w"]),
        stack(dec, lambda lp: _bias2d(lp["cross_attn"]["wo"]["b"])),
        stack(dec, lambda lp: _bias2d(lp["ln2"]["g"])),
        stack(dec, lambda lp: _bias2d(lp["ln2"]["b"])),
        stack(dec, lambda lp: lp["ffn"]["w1"]["w"]),
        stack(dec, lambda lp: _bias2d(lp["ffn"]["w1"]["b"])),
        stack(dec, lambda lp: lp["ffn"]["w2"]["w"]),
        stack(dec, lambda lp: _bias2d(lp["ffn"]["w2"]["b"])),
        stack(dec, lambda lp: _bias2d(lp["ln3"]["g"])),
        stack(dec, lambda lp: _bias2d(lp["ln3"]["b"])),
    ]
    gen_args = [params["generator"]["w"], _bias2d(params["generator"]["b"])]
    return enc_args + dec_args + gen_args


def transformer_forward(params, src, tgt, src_mask_unused=None):
    """Mirrors Transformer.forward(src, tgt, src_mask): the src_mask argument
    is ignored and recomputed internally, exactly like the reference."""
    B, Ss = src.shape
    St = tgt.shape[1]

    # additive masks (0 where attended, -1e9 where masked), shared across heads
    src_mask = _additive_mask(make_pad_mask(src, src))                       # (B,Ss,Ss)
    tgt_mask = _additive_mask(make_pad_mask(tgt, tgt)
                              & make_subsequent_mask(St, St)[None])          # (B,St,St)
    st_mask = _additive_mask(make_pad_mask(tgt, src))                        # (B,St,Ss)

    src_emb = embed(params, src).reshape(B * Ss, D_MODEL)
    # reference decode() applies src_embed to tgt as well (shared embedding)
    tgt_emb = embed(params, tgt).reshape(B * St, D_MODEL)

    args = [src_emb, tgt_emb, src_mask, tgt_mask, st_mask] + pack_params(params)

    kernel = functools.partial(_transformer_kernel, b_size=B, s_src=Ss, s_tgt=St)
    # Single fused pallas_call: no grid -> all (tiny) operands resident in VMEM,
    # all layers executed back-to-back with zero intermediate HBM traffic.
    logp, dec_out = pl.pallas_call(
        kernel,
        out_shape=(
            jax.ShapeDtypeStruct((B * St, VOCAB), jnp.float32),
            jax.ShapeDtypeStruct((B * St, D_MODEL), jnp.float32),
        ),
    )(*args)
    return logp.reshape(B, St, VOCAB), dec_out.reshape(B, St, D_MODEL)


# ---------------------------------------------------------------------------
# Deterministic parameter init
# ---------------------------------------------------------------------------
def sinusoidal_pe(max_len, d_model):
    pos = jnp.arange(max_len, dtype=jnp.float32)[:, None]
    i = jnp.arange(0, d_model, 2, dtype=jnp.float32)
    angle = pos / jnp.power(10000.0, i / d_model)
    pe = jnp.zeros((max_len, d_model), jnp.float32)
    pe = pe.at[:, 0::2].set(jnp.sin(angle))
    pe = pe.at[:, 1::2].set(jnp.cos(angle))
    return pe


def init_params(key):
    keys = iter(jax.random.split(key, 256))

    def dense(din, dout):
        return {"w": jax.random.normal(next(keys), (din, dout), jnp.float32) / math.sqrt(din),
                "b": jnp.zeros((dout,), jnp.float32)}

    def ln():
        return {"g": jnp.ones((D_MODEL,), jnp.float32),
                "b": jnp.zeros((D_MODEL,), jnp.float32)}

    def attn_block():
        return {"wq": dense(D_MODEL, D_MODEL), "wk": dense(D_MODEL, D_MODEL),
                "wv": dense(D_MODEL, D_MODEL), "wo": dense(D_MODEL, D_MODEL)}

    params = {
        "embed": {
            "table": jax.random.normal(next(keys), (VOCAB, D_MODEL), jnp.float32) * 0.02,
            "pe": sinusoidal_pe(MAX_LEN, D_MODEL),
        },
        "encoder": [
            {"self_attn": attn_block(), "ln1": ln(),
             "ffn": {"w1": dense(D_MODEL, D_FF), "w2": dense(D_FF, D_MODEL)},
             "ln2": ln()}
            for _ in range(N_ENC_LAYERS)
        ],
        "decoder": [
            {"self_attn": attn_block(), "ln1": ln(),
             "cross_attn": attn_block(), "ln2": ln(),
             "ffn": {"w1": dense(D_MODEL, D_FF), "w2": dense(D_FF, D_MODEL)},
             "ln3": ln()}
            for _ in range(N_DEC_LAYERS)
        ],
        "generator": dense(D_MODEL, VOCAB),
    }
    return params


# ---------------------------------------------------------------------------
if __name__ == "__main__":
    key = jax.random.PRNGKey(0)
    k_param, k_src, k_tgt = jax.random.split(key, 3)

    B, S_SRC, S_TGT = 2, 8, 8
    src = jax.random.randint(k_src, (B, S_SRC), 0, VOCAB, dtype=jnp.int32)
    tgt = jax.random.randint(k_tgt, (B, S_TGT), 0, VOCAB, dtype=jnp.int32)
    # introduce some pad tokens (pad_idx = 1) so the masks are non-trivial
    src = src.at[:, -2:].set(PAD_IDX)
    tgt = tgt.at[:, -1:].set(PAD_IDX)

    params = init_params(k_param)

    fwd = jax.jit(transformer_forward)
    out, decoder_out = fwd(params, src, tgt)
    jax.block_until_ready((out, decoder_out))

    assert out.shape == (B, S_TGT, VOCAB)
    assert decoder_out.shape == (B, S_TGT, D_MODEL)
    # log_softmax rows must (exp-)sum to ~1
    assert jnp.allclose(jnp.sum(jnp.exp(out), axis=-1), 1.0, atol=1e-4)
    assert bool(jnp.all(jnp.isfinite(out))) and bool(jnp.all(jnp.isfinite(decoder_out)))

    print("KERNEL_OK")
</pallas_src>

<mosaic_0001>
module attributes {stable_mosaic.version = 11 : i64} {
  func.func @_transformer_kernel(%arg0: memref<16x32xf32, #tpu.memory_space<vmem>>, %arg1: memref<16x32xf32, #tpu.memory_space<vmem>>, %arg2: memref<2x8x8xf32, #tpu.memory_space<vmem>>, %arg3: memref<2x8x8xf32, #tpu.memory_space<vmem>>, %arg4: memref<2x8x8xf32, #tpu.memory_space<vmem>>, %arg5: memref<2x32x96xf32, #tpu.memory_space<vmem>>, %arg6: memref<2x1x96xf32, #tpu.memory_space<vmem>>, %arg7: memref<2x32x32xf32, #tpu.memory_space<vmem>>, %arg8: memref<2x1x32xf32, #tpu.memory_space<vmem>>, %arg9: memref<2x1x32xf32, #tpu.memory_space<vmem>>, %arg10: memref<2x1x32xf32, #tpu.memory_space<vmem>>, %arg11: memref<2x32x64xf32, #tpu.memory_space<vmem>>, %arg12: memref<2x1x64xf32, #tpu.memory_space<vmem>>, %arg13: memref<2x64x32xf32, #tpu.memory_space<vmem>>, %arg14: memref<2x1x32xf32, #tpu.memory_space<vmem>>, %arg15: memref<2x1x32xf32, #tpu.memory_space<vmem>>, %arg16: memref<2x1x32xf32, #tpu.memory_space<vmem>>, %arg17: memref<2x32x96xf32, #tpu.memory_space<vmem>>, %arg18: memref<2x1x96xf32, #tpu.memory_space<vmem>>, %arg19: memref<2x32x32xf32, #tpu.memory_space<vmem>>, %arg20: memref<2x1x32xf32, #tpu.memory_space<vmem>>, %arg21: memref<2x1x32xf32, #tpu.memory_space<vmem>>, %arg22: memref<2x1x32xf32, #tpu.memory_space<vmem>>, %arg23: memref<2x32x96xf32, #tpu.memory_space<vmem>>, %arg24: memref<2x1x96xf32, #tpu.memory_space<vmem>>, %arg25: memref<2x32x32xf32, #tpu.memory_space<vmem>>, %arg26: memref<2x1x32xf32, #tpu.memory_space<vmem>>, %arg27: memref<2x1x32xf32, #tpu.memory_space<vmem>>, %arg28: memref<2x1x32xf32, #tpu.memory_space<vmem>>, %arg29: memref<2x32x64xf32, #tpu.memory_space<vmem>>, %arg30: memref<2x1x64xf32, #tpu.memory_space<vmem>>, %arg31: memref<2x64x32xf32, #tpu.memory_space<vmem>>, %arg32: memref<2x1x32xf32, #tpu.memory_space<vmem>>, %arg33: memref<2x1x32xf32, #tpu.memory_space<vmem>>, %arg34: memref<2x1x32xf32, #tpu.memory_space<vmem>>, %arg35: memref<32x32xf32, #tpu.memory_space<vmem>>, %arg36: memref<1x32xf32, #tpu.memory_space<vmem>>, %arg37: memref<16x32xf32, #tpu.memory_space<vmem>>, %arg38: memref<16x32xf32, #tpu.memory_space<vmem>>) attributes {dimension_semantics = [], scalar_prefetch = 0 : i64, scratch_operands = 0 : i64, tpu.core_type = #tpu.core_type<tc>} {
    %c0 = arith.constant 0 : index
    %c0_0 = arith.constant 0 : index
    %c0_1 = arith.constant 0 : index
    %0 = vector.load %arg2[%c0, %c0_0, %c0_1] : memref<2x8x8xf32, #tpu.memory_space<vmem>>, vector<2x8x8xf32>
    %c0_2 = arith.constant 0 : index
    %c0_3 = arith.constant 0 : index
    %c0_4 = arith.constant 0 : index
    %1 = vector.load %arg3[%c0_2, %c0_3, %c0_4] : memref<2x8x8xf32, #tpu.memory_space<vmem>>, vector<2x8x8xf32>
    %c0_5 = arith.constant 0 : index
    %c0_6 = arith.constant 0 : index
    %c0_7 = arith.constant 0 : index
    %2 = vector.load %arg4[%c0_5, %c0_6, %c0_7] : memref<2x8x8xf32, #tpu.memory_space<vmem>>, vector<2x8x8xf32>
    %c0_8 = arith.constant 0 : index
    %c0_9 = arith.constant 0 : index
    %3 = vector.load %arg0[%c0_8, %c0_9] : memref<16x32xf32, #tpu.memory_space<vmem>>, vector<16x32xf32>
    %c0_10 = arith.constant 0 : index
    %c0_11 = arith.constant 0 : index
    %c0_12 = arith.constant 0 : index
    %4 = vector.load %arg5[%c0_10, %c0_11, %c0_12] : memref<2x32x96xf32, #tpu.memory_space<vmem>>, vector<1x32x96xf32>
    %5 = vector.shape_cast %4 : vector<1x32x96xf32> to vector<32x96xf32>
    %c0_13 = arith.constant 0 : index
    %c0_14 = arith.constant 0 : index
    %c0_15 = arith.constant 0 : index
    %6 = vector.load %arg6[%c0_13, %c0_14, %c0_15] : memref<2x1x96xf32, #tpu.memory_space<vmem>>, vector<1x1x96xf32>
    %7 = vector.shape_cast %6 : vector<1x1x96xf32> to vector<1x96xf32>
    %c0_16 = arith.constant 0 : index
    %c0_17 = arith.constant 0 : index
    %c0_18 = arith.constant 0 : index
    %8 = vector.load %arg7[%c0_16, %c0_17, %c0_18] : memref<2x32x32xf32, #tpu.memory_space<vmem>>, vector<1x32x32xf32>
    %9 = vector.shape_cast %8 : vector<1x32x32xf32> to vector<32x32xf32>
    %c0_19 = arith.constant 0 : index
    %c0_20 = arith.constant 0 : index
    %c0_21 = arith.constant 0 : index
    %10 = vector.load %arg8[%c0_19, %c0_20, %c0_21] : memref<2x1x32xf32, #tpu.memory_space<vmem>>, vector<1x1x32xf32>
    %11 = vector.shape_cast %10 : vector<1x1x32xf32> to vector<1x32xf32>
    %cst = arith.constant dense<0.000000e+00> : vector<16x96xf32>
    %12 = tpu.matmul %3, %5, %cst {dimension_numbers = #tpu.dot_dimension_numbers<[1], [0], [0], [1], [0, 0, 1, 1], [], []>} : vector<16x32xf32>, vector<32x96xf32>, vector<16x96xf32> -> vector<16x96xf32>
    %13 = vector.broadcast %7 : vector<1x96xf32> to vector<16x96xf32>
    %14 = arith.addf %12, %13 : vector<16x96xf32>
    %15 = vector.extract_strided_slice %14 {offsets = [0, 0], sizes = [16, 32], strides = [1, 1]} : vector<16x96xf32> to vector<16x32xf32>
    %16 = vector.extract_strided_slice %14 {offsets = [0, 32], sizes = [16, 32], strides = [1, 1]} : vector<16x96xf32> to vector<16x32xf32>
    %17 = vector.extract_strided_slice %14 {offsets = [0, 64], sizes = [16, 32], strides = [1, 1]} : vector<16x96xf32> to vector<16x32xf32>
    %18 = vector.extract_strided_slice %15 {offsets = [0, 0], sizes = [8, 32], strides = [1, 1]} : vector<16x32xf32> to vector<8x32xf32>
    %19 = vector.extract_strided_slice %16 {offsets = [0, 0], sizes = [8, 32], strides = [1, 1]} : vector<16x32xf32> to vector<8x32xf32>
    %20 = vector.extract_strided_slice %17 {offsets = [0, 0], sizes = [8, 32], strides = [1, 1]} : vector<16x32xf32> to vector<8x32xf32>
    %21 = vector.extract_strided_slice %0 {offsets = [0, 0, 0], sizes = [1, 8, 8], strides = [1, 1, 1]} : vector<2x8x8xf32> to vector<1x8x8xf32>
    %22 = vector.shape_cast %21 : vector<1x8x8xf32> to vector<8x8xf32>
    %23 = vector.extract_strided_slice %18 {offsets = [0, 0], sizes = [8, 16], strides = [1, 1]} : vector<8x32xf32> to vector<8x16xf32>
    %24 = vector.extract_strided_slice %19 {offsets = [0, 0], sizes = [8, 16], strides = [1, 1]} : vector<8x32xf32> to vector<8x16xf32>
    %25 = vector.extract_strided_slice %20 {offsets = [0, 0], sizes = [8, 16], strides = [1, 1]} : vector<8x32xf32> to vector<8x16xf32>
    %cst_22 = arith.constant dense<0.000000e+00> : vector<8x8xf32>
    %26 = tpu.matmul %23, %24, %cst_22 {dimension_numbers = #tpu.dot_dimension_numbers<[1], [1], [0], [0], [0, 0, 1, 0], [], []>} : vector<8x16xf32>, vector<8x16xf32>, vector<8x8xf32> -> vector<8x8xf32>
    %cst_23 = arith.constant 2.500000e-01 : f32
    %27 = vector.broadcast %cst_23 : f32 to vector<8x8xf32>
    %28 = arith.mulf %26, %27 : vector<8x8xf32>
    %29 = arith.addf %28, %22 : vector<8x8xf32>
    %cst_24 = arith.constant dense<0xFF800000> : vector<8xf32>
    %30 = vector.multi_reduction <maximumf>, %29, %cst_24 [1] : vector<8x8xf32> to vector<8xf32>
    %31 = vector.shape_cast %30 : vector<8xf32> to vector<8x1xf32>
    %32 = vector.broadcast %31 : vector<8x1xf32> to vector<8x8xf32>
    %33 = arith.subf %29, %32 : vector<8x8xf32>
    %34 = math.exp %33 : vector<8x8xf32>
    %cst_25 = arith.constant dense<0.000000e+00> : vector<8xf32>
    %35 = vector.multi_reduction <add>, %34, %cst_25 [1] : vector<8x8xf32> to vector<8xf32>
    %36 = vector.shape_cast %35 : vector<8xf32> to vector<8x1xf32>
    %37 = vector.broadcast %36 : vector<8x1xf32> to vector<8x8xf32>
    %38 = arith.divf %34, %37 : vector<8x8xf32>
    %cst_26 = arith.constant dense<0.000000e+00> : vector<8x16xf32>
    %39 = tpu.matmul %38, %25, %cst_26 {dimension_numbers = #tpu.dot_dimension_numbers<[1], [0], [0], [1], [0, 0, 1, 1], [], []>} : vector<8x8xf32>, vector<8x16xf32>, vector<8x16xf32> -> vector<8x16xf32>
    %40 = vector.extract_strided_slice %18 {offsets = [0, 16], sizes = [8, 16], strides = [1, 1]} : vector<8x32xf32> to vector<8x16xf32>
    %41 = vector.extract_strided_slice %19 {offsets = [0, 16], sizes = [8, 16], strides = [1, 1]} : vector<8x32xf32> to vector<8x16xf32>
    %42 = vector.extract_strided_slice %20 {offsets = [0, 16], sizes = [8, 16], strides = [1, 1]} : vector<8x32xf32> to vector<8x16xf32>
    %cst_27 = arith.constant dense<0.000000e+00> : vector<8x8xf32>
    %43 = tpu.matmul %40, %41, %cst_27 {dimension_numbers = #tpu.dot_dimension_numbers<[1], [1], [0], [0], [0, 0, 1, 0], [], []>} : vector<8x16xf32>, vector<8x16xf32>, vector<8x8xf32> -> vector<8x8xf32>
    %cst_28 = arith.constant 2.500000e-01 : f32
    %44 = vector.broadcast %cst_28 : f32 to vector<8x8xf32>
    %45 = arith.mulf %43, %44 : vector<8x8xf32>
    %46 = arith.addf %45, %22 : vector<8x8xf32>
    %cst_29 = arith.constant dense<0xFF800000> : vector<8xf32>
    %47 = vector.multi_reduction <maximumf>, %46, %cst_29 [1] : vector<8x8xf32> to vector<8xf32>
    %48 = vector.shape_cast %47 : vector<8xf32> to vector<8x1xf32>
    %49 = vector.broadcast %48 : vector<8x1xf32> to vector<8x8xf32>
    %50 = arith.subf %46, %49 : vector<8x8xf32>
    %51 = math.exp %50 : vector<8x8xf32>
    %cst_30 = arith.constant dense<0.000000e+00> : vector<8xf32>
    %52 = vector.multi_reduction <add>, %51, %cst_30 [1] : vector<8x8xf32> to vector<8xf32>
    %53 = vector.shape_cast %52 : vector<8xf32> to vector<8x1xf32>
    %54 = vector.broadcast %53 : vector<8x1xf32> to vector<8x8xf32>
    %55 = arith.divf %51, %54 : vector<8x8xf32>
    %cst_31 = arith.constant dense<0.000000e+00> : vector<8x16xf32>
    %56 = tpu.matmul %55, %42, %cst_31 {dimension_numbers = #tpu.dot_dimension_numbers<[1], [0], [0], [1], [0, 0, 1, 1], [], []>} : vector<8x8xf32>, vector<8x16xf32>, vector<8x16xf32> -> vector<8x16xf32>
    %57 = tpu.concatenate %39, %56 in 1 : vector<8x16xf32>, vector<8x16xf32> -> vector<8x32xf32>
    %58 = vector.extract_strided_slice %15 {offsets = [8, 0], sizes = [8, 32], strides = [1, 1]} : vector<16x32xf32> to vector<8x32xf32>
    %59 = vector.extract_strided_slice %16 {offsets = [8, 0], sizes = [8, 32], strides = [1, 1]} : vector<16x32xf32> to vector<8x32xf32>
    %60 = vector.extract_strided_slice %17 {offsets = [8, 0], sizes = [8, 32], strides = [1, 1]} : vector<16x32xf32> to vector<8x32xf32>
    %61 = vector.extract_strided_slice %0 {offsets = [1, 0, 0], sizes = [1, 8, 8], strides = [1, 1, 1]} : vector<2x8x8xf32> to vector<1x8x8xf32>
    %62 = vector.shape_cast %61 : vector<1x8x8xf32> to vector<8x8xf32>
    %63 = vector.extract_strided_slice %58 {offsets = [0, 0], sizes = [8, 16], strides = [1, 1]} : vector<8x32xf32> to vector<8x16xf32>
    %64 = vector.extract_strided_slice %59 {offsets = [0, 0], sizes = [8, 16], strides = [1, 1]} : vector<8x32xf32> to vector<8x16xf32>
    %65 = vector.extract_strided_slice %60 {offsets = [0, 0], sizes = [8, 16], strides = [1, 1]} : vector<8x32xf32> to vector<8x16xf32>
    %cst_32 = arith.constant dense<0.000000e+00> : vector<8x8xf32>
    %66 = tpu.matmul %63, %64, %cst_32 {dimension_numbers = #tpu.dot_dimension_numbers<[1], [1], [0], [0], [0, 0, 1, 0], [], []>} : vector<8x16xf32>, vector<8x16xf32>, vector<8x8xf32> -> vector<8x8xf32>
    %cst_33 = arith.constant 2.500000e-01 : f32
    %67 = vector.broadcast %cst_33 : f32 to vector<8x8xf32>
    %68 = arith.mulf %66, %67 : vector<8x8xf32>
    %69 = arith.addf %68, %62 : vector<8x8xf32>
    %cst_34 = arith.constant dense<0xFF800000> : vector<8xf32>
    %70 = vector.multi_reduction <maximumf>, %69, %cst_34 [1] : vector<8x8xf32> to vector<8xf32>
    %71 = vector.shape_cast %70 : vector<8xf32> to vector<8x1xf32>
    %72 = vector.broadcast %71 : vector<8x1xf32> to vector<8x8xf32>
    %73 = arith.subf %69, %72 : vector<8x8xf32>
    %74 = math.exp %73 : vector<8x8xf32>
    %cst_35 = arith.constant dense<0.000000e+00> : vector<8xf32>
    %75 = vector.multi_reduction <add>, %74, %cst_35 [1] : vector<8x8xf32> to vector<8xf32>
    %76 = vector.shape_cast %75 : vector<8xf32> to vector<8x1xf32>
    %77 = vector.broadcast %76 : vector<8x1xf32> to vector<8x8xf32>
    %78 = arith.divf %74, %77 : vector<8x8xf32>
    %cst_36 = arith.constant dense<0.000000e+00> : vector<8x16xf32>
    %79 = tpu.matmul %78, %65, %cst_36 {dimension_numbers = #tpu.dot_dimension_numbers<[1], [0], [0], [1], [0, 0, 1, 1], [], []>} : vector<8x8xf32>, vector<8x16xf32>, vector<8x16xf32> -> vector<8x16xf32>
    %80 = vector.extract_strided_slice %58 {offsets = [0, 16], sizes = [8, 16], strides = [1, 1]} : vector<8x32xf32> to vector<8x16xf32>
    %81 = vector.extract_strided_slice %59 {offsets = [0, 16], sizes = [8, 16], strides = [1, 1]} : vector<8x32xf32> to vector<8x16xf32>
    %82 = vector.extract_strided_slice %60 {offsets = [0, 16], sizes = [8, 16], strides = [1, 1]} : vector<8x32xf32> to vector<8x16xf32>
    %cst_37 = arith.constant dense<0.000000e+00> : vector<8x8xf32>
    %83 = tpu.matmul %80, %81, %cst_37 {dimension_numbers = #tpu.dot_dimension_numbers<[1], [1], [0], [0], [0, 0, 1, 0], [], []>} : vector<8x16xf32>, vector<8x16xf32>, vector<8x8xf32> -> vector<8x8xf32>
    %cst_38 = arith.constant 2.500000e-01 : f32
    %84 = vector.broadcast %cst_38 : f32 to vector<8x8xf32>
    %85 = arith.mulf %83, %84 : vector<8x8xf32>
    %86 = arith.addf %85, %62 : vector<8x8xf32>
    %cst_39 = arith.constant dense<0xFF800000> : vector<8xf32>
    %87 = vector.multi_reduction <maximumf>, %86, %cst_39 [1] : vector<8x8xf32> to vector<8xf32>
    %88 = vector.shape_cast %87 : vector<8xf32> to vector<8x1xf32>
    %89 = vector.broadcast %88 : vector<8x1xf32> to vector<8x8xf32>
    %90 = arith.subf %86, %89 : vector<8x8xf32>
    %91 = math.exp %90 : vector<8x8xf32>
    %cst_40 = arith.constant dense<0.000000e+00> : vector<8xf32>
    %92 = vector.multi_reduction <add>, %91, %cst_40 [1] : vector<8x8xf32> to vector<8xf32>
    %93 = vector.shape_cast %92 : vector<8xf32> to vector<8x1xf32>
    %94 = vector.broadcast %93 : vector<8x1xf32> to vector<8x8xf32>
    %95 = arith.divf %91, %94 : vector<8x8xf32>
    %cst_41 = arith.constant dense<0.000000e+00> : vector<8x16xf32>
    %96 = tpu.matmul %95, %82, %cst_41 {dimension_numbers = #tpu.dot_dimension_numbers<[1], [0], [0], [1], [0, 0, 1, 1], [], []>} : vector<8x8xf32>, vector<8x16xf32>, vector<8x16xf32> -> vector<8x16xf32>
    %97 = tpu.concatenate %79, %96 in 1 : vector<8x16xf32>, vector<8x16xf32> -> vector<8x32xf32>
    %98 = tpu.concatenate %57, %97 in 0 : vector<8x32xf32>, vector<8x32xf32> -> vector<16x32xf32>
    %cst_42 = arith.constant dense<0.000000e+00> : vector<16x32xf32>
    %99 = tpu.matmul %98, %9, %cst_42 {dimension_numbers = #tpu.dot_dimension_numbers<[1], [0], [0], [1], [0, 0, 1, 1], [], []>} : vector<16x32xf32>, vector<32x32xf32>, vector<16x32xf32> -> vector<16x32xf32>
    %100 = vector.broadcast %11 : vector<1x32xf32> to vector<16x32xf32>
    %101 = arith.addf %99, %100 : vector<16x32xf32>
    %102 = arith.addf %101, %3 : vector<16x32xf32>
    %c0_43 = arith.constant 0 : index
    %c0_44 = arith.constant 0 : index
    %c0_45 = arith.constant 0 : index
    %103 = vector.load %arg9[%c0_43, %c0_44, %c0_45] : memref<2x1x32xf32, #tpu.memory_space<vmem>>, vector<1x1x32xf32>
    %104 = vector.shape_cast %103 : vector<1x1x32xf32> to vector<1x32xf32>
    %c0_46 = arith.constant 0 : index
    %c0_47 = arith.constant 0 : index
    %c0_48 = arith.constant 0 : index
    %105 = vector.load %arg10[%c0_46, %c0_47, %c0_48] : memref<2x1x32xf32, #tpu.memory_space<vmem>>, vector<1x1x32xf32>
    %106 = vector.shape_cast %105 : vector<1x1x32xf32> to vector<1x32xf32>
    %cst_49 = arith.constant dense<0.000000e+00> : vector<16xf32>
    %107 = vector.multi_reduction <add>, %102, %cst_49 [1] : vector<16x32xf32> to vector<16xf32>
    %108 = vector.shape_cast %107 : vector<16xf32> to vector<16x1xf32>
    %cst_50 = arith.constant 3.200000e+01 : f32
    %109 = vector.broadcast %cst_50 : f32 to vector<16x1xf32>
    %110 = arith.divf %108, %109 : vector<16x1xf32>
    %111 = vector.broadcast %110 : vector<16x1xf32> to vector<16x32xf32>
    %112 = arith.subf %102, %111 : vector<16x32xf32>
    %113 = arith.mulf %112, %112 : vector<16x32xf32>
    %cst_51 = arith.constant dense<0.000000e+00> : vector<16xf32>
    %114 = vector.multi_reduction <add>, %113, %cst_51 [1] : vector<16x32xf32> to vector<16xf32>
    %115 = vector.shape_cast %114 : vector<16xf32> to vector<16x1xf32>
    %cst_52 = arith.constant 3.200000e+01 : f32
    %116 = vector.broadcast %cst_52 : f32 to vector<16x1xf32>
    %117 = arith.divf %115, %116 : vector<16x1xf32>
    %118 = vector.broadcast %110 : vector<16x1xf32> to vector<16x32xf32>
    %119 = arith.subf %102, %118 : vector<16x32xf32>
    %cst_53 = arith.constant 9.99999974E-6 : f32
    %120 = vector.broadcast %cst_53 : f32 to vector<16x1xf32>
    %121 = arith.addf %117, %120 : vector<16x1xf32>
    %122 = math.rsqrt %121 : vector<16x1xf32>
    %123 = vector.broadcast %122 : vector<16x1xf32> to vector<16x32xf32>
    %124 = arith.mulf %119, %123 : vector<16x32xf32>
    %125 = vector.broadcast %104 : vector<1x32xf32> to vector<16x32xf32>
    %126 = arith.mulf %124, %125 : vector<16x32xf32>
    %127 = vector.broadcast %106 : vector<1x32xf32> to vector<16x32xf32>
    %128 = arith.addf %126, %127 : vector<16x32xf32>
    %c0_54 = arith.constant 0 : index
    %c0_55 = arith.constant 0 : index
    %c0_56 = arith.constant 0 : index
    %129 = vector.load %arg11[%c0_54, %c0_55, %c0_56] : memref<2x32x64xf32, #tpu.memory_space<vmem>>, vector<1x32x64xf32>
    %130 = vector.shape_cast %129 : vector<1x32x64xf32> to vector<32x64xf32>
    %c0_57 = arith.constant 0 : index
    %c0_58 = arith.constant 0 : index
    %c0_59 = arith.constant 0 : index
    %131 = vector.load %arg12[%c0_57, %c0_58, %c0_59] : memref<2x1x64xf32, #tpu.memory_space<vmem>>, vector<1x1x64xf32>
    %132 = vector.shape_cast %131 : vector<1x1x64xf32> to vector<1x64xf32>
    %c0_60 = arith.constant 0 : index
    %c0_61 = arith.constant 0 : index
    %c0_62 = arith.constant 0 : index
    %133 = vector.load %arg13[%c0_60, %c0_61, %c0_62] : memref<2x64x32xf32, #tpu.memory_space<vmem>>, vector<1x64x32xf32>
    %134 = vector.shape_cast %133 : vector<1x64x32xf32> to vector<64x32xf32>
    %c0_63 = arith.constant 0 : index
    %c0_64 = arith.constant 0 : index
    %c0_65 = arith.constant 0 : index
    %135 = vector.load %arg14[%c0_63, %c0_64, %c0_65] : memref<2x1x32xf32, #tpu.memory_space<vmem>>, vector<1x1x32xf32>
    %136 = vector.shape_cast %135 : vector<1x1x32xf32> to vector<1x32xf32>
    %cst_66 = arith.constant dense<0.000000e+00> : vector<16x64xf32>
    %137 = tpu.matmul %128, %130, %cst_66 {dimension_numbers = #tpu.dot_dimension_numbers<[1], [0], [0], [1], [0, 0, 1, 1], [], []>} : vector<16x32xf32>, vector<32x64xf32>, vector<16x64xf32> -> vector<16x64xf32>
    %138 = vector.broadcast %132 : vector<1x64xf32> to vector<16x64xf32>
    %139 = arith.addf %137, %138 : vector<16x64xf32>
    %cst_67 = arith.constant 0.000000e+00 : f32
    %140 = vector.broadcast %cst_67 : f32 to vector<16x64xf32>
    %141 = arith.maximumf %139, %140 : vector<16x64xf32>
    %cst_68 = arith.constant dense<0.000000e+00> : vector<16x32xf32>
    %142 = tpu.matmul %141, %134, %cst_68 {dimension_numbers = #tpu.dot_dimension_numbers<[1], [0], [0], [1], [0, 0, 1, 1], [], []>} : vector<16x64xf32>, vector<64x32xf32>, vector<16x32xf32> -> vector<16x32xf32>
    %143 = vector.broadcast %136 : vector<1x32xf32> to vector<16x32xf32>
    %144 = arith.addf %142, %143 : vector<16x32xf32>
    %145 = arith.addf %144, %128 : vector<16x32xf32>
    %c0_69 = arith.constant 0 : index
    %c0_70 = arith.constant 0 : index
    %c0_71 = arith.constant 0 : index
    %146 = vector.load %arg15[%c0_69, %c0_70, %c0_71] : memref<2x1x32xf32, #tpu.memory_space<vmem>>, vector<1x1x32xf32>
    %147 = vector.shape_cast %146 : vector<1x1x32xf32> to vector<1x32xf32>
    %c0_72 = arith.constant 0 : index
    %c0_73 = arith.constant 0 : index
    %c0_74 = arith.constant 0 : index
    %148 = vector.load %arg16[%c0_72, %c0_73, %c0_74] : memref<2x1x32xf32, #tpu.memory_space<vmem>>, vector<1x1x32xf32>
    %149 = vector.shape_cast %148 : vector<1x1x32xf32> to vector<1x32xf32>
    %cst_75 = arith.constant dense<0.000000e+00> : vector<16xf32>
    %150 = vector.multi_reduction <add>, %145, %cst_75 [1] : vector<16x32xf32> to vector<16xf32>
    %151 = vector.shape_cast %150 : vector<16xf32> to vector<16x1xf32>
    %cst_76 = arith.constant 3.200000e+01 : f32
    %152 = vector.broadcast %cst_76 : f32 to vector<16x1xf32>
    %153 = arith.divf %151, %152 : vector<16x1xf32>
    %154 = vector.broadcast %153 : vector<16x1xf32> to vector<16x32xf32>
    %155 = arith.subf %145, %154 : vector<16x32xf32>
    %156 = arith.mulf %155, %155 : vector<16x32xf32>
    %cst_77 = arith.constant dense<0.000000e+00> : vector<16xf32>
    %157 = vector.multi_reduction <add>, %156, %cst_77 [1] : vector<16x32xf32> to vector<16xf32>
    %158 = vector.shape_cast %157 : vector<16xf32> to vector<16x1xf32>
    %cst_78 = arith.constant 3.200000e+01 : f32
    %159 = vector.broadcast %cst_78 : f32 to vector<16x1xf32>
    %160 = arith.divf %158, %159 : vector<16x1xf32>
    %161 = vector.broadcast %153 : vector<16x1xf32> to vector<16x32xf32>
    %162 = arith.subf %145, %161 : vector<16x32xf32>
    %cst_79 = arith.constant 9.99999974E-6 : f32
    %163 = vector.broadcast %cst_79 : f32 to vector<16x1xf32>
    %164 = arith.addf %160, %163 : vector<16x1xf32>
    %165 = math.rsqrt %164 : vector<16x1xf32>
    %166 = vector.broadcast %165 : vector<16x1xf32> to vector<16x32xf32>
    %167 = arith.mulf %162, %166 : vector<16x32xf32>
    %168 = vector.broadcast %147 : vector<1x32xf32> to vector<16x32xf32>
    %169 = arith.mulf %167, %168 : vector<16x32xf32>
    %170 = vector.broadcast %149 : vector<1x32xf32> to vector<16x32xf32>
    %171 = arith.addf %169, %170 : vector<16x32xf32>
    %c1 = arith.constant 1 : index
    %c0_80 = arith.constant 0 : index
    %c0_81 = arith.constant 0 : index
    %172 = vector.load %arg5[%c1, %c0_80, %c0_81] : memref<2x32x96xf32, #tpu.memory_space<vmem>>, vector<1x32x96xf32>
    %173 = vector.shape_cast %172 : vector<1x32x96xf32> to vector<32x96xf32>
    %c1_82 = arith.constant 1 : index
    %c0_83 = arith.constant 0 : index
    %c0_84 = arith.constant 0 : index
    %174 = vector.load %arg6[%c1_82, %c0_83, %c0_84] : memref<2x1x96xf32, #tpu.memory_space<vmem>>, vector<1x1x96xf32>
    %175 = vector.shape_cast %174 : vector<1x1x96xf32> to vector<1x96xf32>
    %c1_85 = arith.constant 1 : index
    %c0_86 = arith.constant 0 : index
    %c0_87 = arith.constant 0 : index
    %176 = vector.load %arg7[%c1_85, %c0_86, %c0_87] : memref<2x32x32xf32, #tpu.memory_space<vmem>>, vector<1x32x32xf32>
    %177 = vector.shape_cast %176 : vector<1x32x32xf32> to vector<32x32xf32>
    %c1_88 = arith.constant 1 : index
    %c0_89 = arith.constant 0 : index
    %c0_90 = arith.constant 0 : index
    %178 = vector.load %arg8[%c1_88, %c0_89, %c0_90] : memref<2x1x32xf32, #tpu.memory_space<vmem>>, vector<1x1x32xf32>
    %179 = vector.shape_cast %178 : vector<1x1x32xf32> to vector<1x32xf32>
    %cst_91 = arith.constant dense<0.000000e+00> : vector<16x96xf32>
    %180 = tpu.matmul %171, %173, %cst_91 {dimension_numbers = #tpu.dot_dimension_numbers<[1], [0], [0], [1], [0, 0, 1, 1], [], []>} : vector<16x32xf32>, vector<32x96xf32>, vector<16x96xf32> -> vector<16x96xf32>
    %181 = vector.broadcast %175 : vector<1x96xf32> to vector<16x96xf32>
    %182 = arith.addf %180, %181 : vector<16x96xf32>
    %183 = vector.extract_strided_slice %182 {offsets = [0, 0], sizes = [16, 32], strides = [1, 1]} : vector<16x96xf32> to vector<16x32xf32>
    %184 = vector.extract_strided_slice %182 {offsets = [0, 32], sizes = [16, 32], strides = [1, 1]} : vector<16x96xf32> to vector<16x32xf32>
    %185 = vector.extract_strided_slice %182 {offsets = [0, 64], sizes = [16, 32], strides = [1, 1]} : vector<16x96xf32> to vector<16x32xf32>
    %186 = vector.extract_strided_slice %183 {offsets = [0, 0], sizes = [8, 32], strides = [1, 1]} : vector<16x32xf32> to vector<8x32xf32>
    %187 = vector.extract_strided_slice %184 {offsets = [0, 0], sizes = [8, 32], strides = [1, 1]} : vector<16x32xf32> to vector<8x32xf32>
    %188 = vector.extract_strided_slice %185 {offsets = [0, 0], sizes = [8, 32], strides = [1, 1]} : vector<16x32xf32> to vector<8x32xf32>
    %189 = vector.extract_strided_slice %0 {offsets = [0, 0, 0], sizes = [1, 8, 8], strides = [1, 1, 1]} : vector<2x8x8xf32> to vector<1x8x8xf32>
    %190 = vector.shape_cast %189 : vector<1x8x8xf32> to vector<8x8xf32>
    %191 = vector.extract_strided_slice %186 {offsets = [0, 0], sizes = [8, 16], strides = [1, 1]} : vector<8x32xf32> to vector<8x16xf32>
    %192 = vector.extract_strided_slice %187 {offsets = [0, 0], sizes = [8, 16], strides = [1, 1]} : vector<8x32xf32> to vector<8x16xf32>
    %193 = vector.extract_strided_slice %188 {offsets = [0, 0], sizes = [8, 16], strides = [1, 1]} : vector<8x32xf32> to vector<8x16xf32>
    %cst_92 = arith.constant dense<0.000000e+00> : vector<8x8xf32>
    %194 = tpu.matmul %191, %192, %cst_92 {dimension_numbers = #tpu.dot_dimension_numbers<[1], [1], [0], [0], [0, 0, 1, 0], [], []>} : vector<8x16xf32>, vector<8x16xf32>, vector<8x8xf32> -> vector<8x8xf32>
    %cst_93 = arith.constant 2.500000e-01 : f32
    %195 = vector.broadcast %cst_93 : f32 to vector<8x8xf32>
    %196 = arith.mulf %194, %195 : vector<8x8xf32>
    %197 = arith.addf %196, %190 : vector<8x8xf32>
    %cst_94 = arith.constant dense<0xFF800000> : vector<8xf32>
    %198 = vector.multi_reduction <maximumf>, %197, %cst_94 [1] : vector<8x8xf32> to vector<8xf32>
    %199 = vector.shape_cast %198 : vector<8xf32> to vector<8x1xf32>
    %200 = vector.broadcast %199 : vector<8x1xf32> to vector<8x8xf32>
    %201 = arith.subf %197, %200 : vector<8x8xf32>
    %202 = math.exp %201 : vector<8x8xf32>
    %cst_95 = arith.constant dense<0.000000e+00> : vector<8xf32>
    %203 = vector.multi_reduction <add>, %202, %cst_95 [1] : vector<8x8xf32> to vector<8xf32>
    %204 = vector.shape_cast %203 : vector<8xf32> to vector<8x1xf32>
    %205 = vector.broadcast %204 : vector<8x1xf32> to vector<8x8xf32>
    %206 = arith.divf %202, %205 : vector<8x8xf32>
    %cst_96 = arith.constant dense<0.000000e+00> : vector<8x16xf32>
    %207 = tpu.matmul %206, %193, %cst_96 {dimension_numbers = #tpu.dot_dimension_numbers<[1], [0], [0], [1], [0, 0, 1, 1], [], []>} : vector<8x8xf32>, vector<8x16xf32>, vector<8x16xf32> -> vector<8x16xf32>
    %208 = vector.extract_strided_slice %186 {offsets = [0, 16], sizes = [8, 16], strides = [1, 1]} : vector<8x32xf32> to vector<8x16xf32>
    %209 = vector.extract_strided_slice %187 {offsets = [0, 16], sizes = [8, 16], strides = [1, 1]} : vector<8x32xf32> to vector<8x16xf32>
    %210 = vector.extract_strided_slice %188 {offsets = [0, 16], sizes = [8, 16], strides = [1, 1]} : vector<8x32xf32> to vector<8x16xf32>
    %cst_97 = arith.constant dense<0.000000e+00> : vector<8x8xf32>
    %211 = tpu.matmul %208, %209, %cst_97 {dimension_numbers = #tpu.dot_dimension_numbers<[1], [1], [0], [0], [0, 0, 1, 0], [], []>} : vector<8x16xf32>, vector<8x16xf32>, vector<8x8xf32> -> vector<8x8xf32>
    %cst_98 = arith.constant 2.500000e-01 : f32
    %212 = vector.broadcast %cst_98 : f32 to vector<8x8xf32>
    %213 = arith.mulf %211, %212 : vector<8x8xf32>
    %214 = arith.addf %213, %190 : vector<8x8xf32>
    %cst_99 = arith.constant dense<0xFF800000> : vector<8xf32>
    %215 = vector.multi_reduction <maximumf>, %214, %cst_99 [1] : vector<8x8xf32> to vector<8xf32>
    %216 = vector.shape_cast %215 : vector<8xf32> to vector<8x1xf32>
    %217 = vector.broadcast %216 : vector<8x1xf32> to vector<8x8xf32>
    %218 = arith.subf %214, %217 : vector<8x8xf32>
    %219 = math.exp %218 : vector<8x8xf32>
    %cst_100 = arith.constant dense<0.000000e+00> : vector<8xf32>
    %220 = vector.multi_reduction <add>, %219, %cst_100 [1] : vector<8x8xf32> to vector<8xf32>
    %221 = vector.shape_cast %220 : vector<8xf32> to vector<8x1xf32>
    %222 = vector.broadcast %221 : vector<8x1xf32> to vector<8x8xf32>
    %223 = arith.divf %219, %222 : vector<8x8xf32>
    %cst_101 = arith.constant dense<0.000000e+00> : vector<8x16xf32>
    %224 = tpu.matmul %223, %210, %cst_101 {dimension_numbers = #tpu.dot_dimension_numbers<[1], [0], [0], [1], [0, 0, 1, 1], [], []>} : vector<8x8xf32>, vector<8x16xf32>, vector<8x16xf32> -> vector<8x16xf32>
    %225 = tpu.concatenate %207, %224 in 1 : vector<8x16xf32>, vector<8x16xf32> -> vector<8x32xf32>
    %226 = vector.extract_strided_slice %183 {offsets = [8, 0], sizes = [8, 32], strides = [1, 1]} : vector<16x32xf32> to vector<8x32xf32>
    %227 = vector.extract_strided_slice %184 {offsets = [8, 0], sizes = [8, 32], strides = [1, 1]} : vector<16x32xf32> to vector<8x32xf32>
    %228 = vector.extract_strided_slice %185 {offsets = [8, 0], sizes = [8, 32], strides = [1, 1]} : vector<16x32xf32> to vector<8x32xf32>
    %229 = vector.extract_strided_slice %0 {offsets = [1, 0, 0], sizes = [1, 8, 8], strides = [1, 1, 1]} : vector<2x8x8xf32> to vector<1x8x8xf32>
    %230 = vector.shape_cast %229 : vector<1x8x8xf32> to vector<8x8xf32>
    %231 = vector.extract_strided_slice %226 {offsets = [0, 0], sizes = [8, 16], strides = [1, 1]} : vector<8x32xf32> to vector<8x16xf32>
    %232 = vector.extract_strided_slice %227 {offsets = [0, 0], sizes = [8, 16], strides = [1, 1]} : vector<8x32xf32> to vector<8x16xf32>
    %233 = vector.extract_strided_slice %228 {offsets = [0, 0], sizes = [8, 16], strides = [1, 1]} : vector<8x32xf32> to vector<8x16xf32>
    %cst_102 = arith.constant dense<0.000000e+00> : vector<8x8xf32>
    %234 = tpu.matmul %231, %232, %cst_102 {dimension_numbers = #tpu.dot_dimension_numbers<[1], [1], [0], [0], [0, 0, 1, 0], [], []>} : vector<8x16xf32>, vector<8x16xf32>, vector<8x8xf32> -> vector<8x8xf32>
    %cst_103 = arith.constant 2.500000e-01 : f32
    %235 = vector.broadcast %cst_103 : f32 to vector<8x8xf32>
    %236 = arith.mulf %234, %235 : vector<8x8xf32>
    %237 = arith.addf %236, %230 : vector<8x8xf32>
    %cst_104 = arith.constant dense<0xFF800000> : vector<8xf32>
    %238 = vector.multi_reduction <maximumf>, %237, %cst_104 [1] : vector<8x8xf32> to vector<8xf32>
    %239 = vector.shape_cast %238 : vector<8xf32> to vector<8x1xf32>
    %240 = vector.broadcast %239 : vector<8x1xf32> to vector<8x8xf32>
    %241 = arith.subf %237, %240 : vector<8x8xf32>
    %242 = math.exp %241 : vector<8x8xf32>
    %cst_105 = arith.constant dense<0.000000e+00> : vector<8xf32>
    %243 = vector.multi_reduction <add>, %242, %cst_105 [1] : vector<8x8xf32> to vector<8xf32>
    %244 = vector.shape_cast %243 : vector<8xf32> to vector<8x1xf32>
    %245 = vector.broadcast %244 : vector<8x1xf32> to vector<8x8xf32>
    %246 = arith.divf %242, %245 : vector<8x8xf32>
    %cst_106 = arith.constant dense<0.000000e+00> : vector<8x16xf32>
    %247 = tpu.matmul %246, %233, %cst_106 {dimension_numbers = #tpu.dot_dimension_numbers<[1], [0], [0], [1], [0, 0, 1, 1], [], []>} : vector<8x8xf32>, vector<8x16xf32>, vector<8x16xf32> -> vector<8x16xf32>
    %248 = vector.extract_strided_slice %226 {offsets = [0, 16], sizes = [8, 16], strides = [1, 1]} : vector<8x32xf32> to vector<8x16xf32>
    %249 = vector.extract_strided_slice %227 {offsets = [0, 16], sizes = [8, 16], strides = [1, 1]} : vector<8x32xf32> to vector<8x16xf32>
    %250 = vector.extract_strided_slice %228 {offsets = [0, 16], sizes = [8, 16], strides = [1, 1]} : vector<8x32xf32> to vector<8x16xf32>
    %cst_107 = arith.constant dense<0.000000e+00> : vector<8x8xf32>
    %251 = tpu.matmul %248, %249, %cst_107 {dimension_numbers = #tpu.dot_dimension_numbers<[1], [1], [0], [0], [0, 0, 1, 0], [], []>} : vector<8x16xf32>, vector<8x16xf32>, vector<8x8xf32> -> vector<8x8xf32>
    %cst_108 = arith.constant 2.500000e-01 : f32
    %252 = vector.broadcast %cst_108 : f32 to vector<8x8xf32>
    %253 = arith.mulf %251, %252 : vector<8x8xf32>
    %254 = arith.addf %253, %230 : vector<8x8xf32>
    %cst_109 = arith.constant dense<0xFF800000> : vector<8xf32>
    %255 = vector.multi_reduction <maximumf>, %254, %cst_109 [1] : vector<8x8xf32> to vector<8xf32>
    %256 = vector.shape_cast %255 : vector<8xf32> to vector<8x1xf32>
    %257 = vector.broadcast %256 : vector<8x1xf32> to vector<8x8xf32>
    %258 = arith.subf %254, %257 : vector<8x8xf32>
    %259 = math.exp %258 : vector<8x8xf32>
    %cst_110 = arith.constant dense<0.000000e+00> : vector<8xf32>
    %260 = vector.multi_reduction <add>, %259, %cst_110 [1] : vector<8x8xf32> to vector<8xf32>
    %261 = vector.shape_cast %260 : vector<8xf32> to vector<8x1xf32>
    %262 = vector.broadcast %261 : vector<8x1xf32> to vector<8x8xf32>
    %263 = arith.divf %259, %262 : vector<8x8xf32>
    %cst_111 = arith.constant dense<0.000000e+00> : vector<8x16xf32>
    %264 = tpu.matmul %263, %250, %cst_111 {dimension_numbers = #tpu.dot_dimension_numbers<[1], [0], [0], [1], [0, 0, 1, 1], [], []>} : vector<8x8xf32>, vector<8x16xf32>, vector<8x16xf32> -> vector<8x16xf32>
    %265 = tpu.concatenate %247, %264 in 1 : vector<8x16xf32>, vector<8x16xf32> -> vector<8x32xf32>
    %266 = tpu.concatenate %225, %265 in 0 : vector<8x32xf32>, vector<8x32xf32> -> vector<16x32xf32>
    %cst_112 = arith.constant dense<0.000000e+00> : vector<16x32xf32>
    %267 = tpu.matmul %266, %177, %cst_112 {dimension_numbers = #tpu.dot_dimension_numbers<[1], [0], [0], [1], [0, 0, 1, 1], [], []>} : vector<16x32xf32>, vector<32x32xf32>, vector<16x32xf32> -> vector<16x32xf32>
    %268 = vector.broadcast %179 : vector<1x32xf32> to vector<16x32xf32>
    %269 = arith.addf %267, %268 : vector<16x32xf32>
    %270 = arith.addf %269, %171 : vector<16x32xf32>
    %c1_113 = arith.constant 1 : index
    %c0_114 = arith.constant 0 : index
    %c0_115 = arith.constant 0 : index
    %271 = vector.load %arg9[%c1_113, %c0_114, %c0_115] : memref<2x1x32xf32, #tpu.memory_space<vmem>>, vector<1x1x32xf32>
    %272 = vector.shape_cast %271 : vector<1x1x32xf32> to vector<1x32xf32>
    %c1_116 = arith.constant 1 : index
    %c0_117 = arith.constant 0 : index
    %c0_118 = arith.constant 0 : index
    %273 = vector.load %arg10[%c1_116, %c0_117, %c0_118] : memref<2x1x32xf32, #tpu.memory_space<vmem>>, vector<1x1x32xf32>
    %274 = vector.shape_cast %273 : vector<1x1x32xf32> to vector<1x32xf32>
    %cst_119 = arith.constant dense<0.000000e+00> : vector<16xf32>
    %275 = vector.multi_reduction <add>, %270, %cst_119 [1] : vector<16x32xf32> to vector<16xf32>
    %276 = vector.shape_cast %275 : vector<16xf32> to vector<16x1xf32>
    %cst_120 = arith.constant 3.200000e+01 : f32
    %277 = vector.broadcast %cst_120 : f32 to vector<16x1xf32>
    %278 = arith.divf %276, %277 : vector<16x1xf32>
    %279 = vector.broadcast %278 : vector<16x1xf32> to vector<16x32xf32>
    %280 = arith.subf %270, %279 : vector<16x32xf32>
    %281 = arith.mulf %280, %280 : vector<16x32xf32>
    %cst_121 = arith.constant dense<0.000000e+00> : vector<16xf32>
    %282 = vector.multi_reduction <add>, %281, %cst_121 [1] : vector<16x32xf32> to vector<16xf32>
    %283 = vector.shape_cast %282 : vector<16xf32> to vector<16x1xf32>
    %cst_122 = arith.constant 3.200000e+01 : f32
    %284 = vector.broadcast %cst_122 : f32 to vector<16x1xf32>
    %285 = arith.divf %283, %284 : vector<16x1xf32>
    %286 = vector.broadcast %278 : vector<16x1xf32> to vector<16x32xf32>
    %287 = arith.subf %270, %286 : vector<16x32xf32>
    %cst_123 = arith.constant 9.99999974E-6 : f32
    %288 = vector.broadcast %cst_123 : f32 to vector<16x1xf32>
    %289 = arith.addf %285, %288 : vector<16x1xf32>
    %290 = math.rsqrt %289 : vector<16x1xf32>
    %291 = vector.broadcast %290 : vector<16x1xf32> to vector<16x32xf32>
    %292 = arith.mulf %287, %291 : vector<16x32xf32>
    %293 = vector.broadcast %272 : vector<1x32xf32> to vector<16x32xf32>
    %294 = arith.mulf %292, %293 : vector<16x32xf32>
    %295 = vector.broadcast %274 : vector<1x32xf32> to vector<16x32xf32>
    %296 = arith.addf %294, %295 : vector<16x32xf32>
    %c1_124 = arith.constant 1 : index
    %c0_125 = arith.constant 0 : index
    %c0_126 = arith.constant 0 : index
    %297 = vector.load %arg11[%c1_124, %c0_125, %c0_126] : memref<2x32x64xf32, #tpu.memory_space<vmem>>, vector<1x32x64xf32>
    %298 = vector.shape_cast %297 : vector<1x32x64xf32> to vector<32x64xf32>
    %c1_127 = arith.constant 1 : index
    %c0_128 = arith.constant 0 : index
    %c0_129 = arith.constant 0 : index
    %299 = vector.load %arg12[%c1_127, %c0_128, %c0_129] : memref<2x1x64xf32, #tpu.memory_space<vmem>>, vector<1x1x64xf32>
    %300 = vector.shape_cast %299 : vector<1x1x64xf32> to vector<1x64xf32>
    %c1_130 = arith.constant 1 : index
    %c0_131 = arith.constant 0 : index
    %c0_132 = arith.constant 0 : index
    %301 = vector.load %arg13[%c1_130, %c0_131, %c0_132] : memref<2x64x32xf32, #tpu.memory_space<vmem>>, vector<1x64x32xf32>
    %302 = vector.shape_cast %301 : vector<1x64x32xf32> to vector<64x32xf32>
    %c1_133 = arith.constant 1 : index
    %c0_134 = arith.constant 0 : index
    %c0_135 = arith.constant 0 : index
    %303 = vector.load %arg14[%c1_133, %c0_134, %c0_135] : memref<2x1x32xf32, #tpu.memory_space<vmem>>, vector<1x1x32xf32>
    %304 = vector.shape_cast %303 : vector<1x1x32xf32> to vector<1x32xf32>
    %cst_136 = arith.constant dense<0.000000e+00> : vector<16x64xf32>
    %305 = tpu.matmul %296, %298, %cst_136 {dimension_numbers = #tpu.dot_dimension_numbers<[1], [0], [0], [1], [0, 0, 1, 1], [], []>} : vector<16x32xf32>, vector<32x64xf32>, vector<16x64xf32> -> vector<16x64xf32>
    %306 = vector.broadcast %300 : vector<1x64xf32> to vector<16x64xf32>
    %307 = arith.addf %305, %306 : vector<16x64xf32>
    %cst_137 = arith.constant 0.000000e+00 : f32
    %308 = vector.broadcast %cst_137 : f32 to vector<16x64xf32>
    %309 = arith.maximumf %307, %308 : vector<16x64xf32>
    %cst_138 = arith.constant dense<0.000000e+00> : vector<16x32xf32>
    %310 = tpu.matmul %309, %302, %cst_138 {dimension_numbers = #tpu.dot_dimension_numbers<[1], [0], [0], [1], [0, 0, 1, 1], [], []>} : vector<16x64xf32>, vector<64x32xf32>, vector<16x32xf32> -> vector<16x32xf32>
    %311 = vector.broadcast %304 : vector<1x32xf32> to vector<16x32xf32>
    %312 = arith.addf %310, %311 : vector<16x32xf32>
    %313 = arith.addf %312, %296 : vector<16x32xf32>
    %c1_139 = arith.constant 1 : index
    %c0_140 = arith.constant 0 : index
    %c0_141 = arith.constant 0 : index
    %314 = vector.load %arg15[%c1_139, %c0_140, %c0_141] : memref<2x1x32xf32, #tpu.memory_space<vmem>>, vector<1x1x32xf32>
    %315 = vector.shape_cast %314 : vector<1x1x32xf32> to vector<1x32xf32>
    %c1_142 = arith.constant 1 : index
    %c0_143 = arith.constant 0 : index
    %c0_144 = arith.constant 0 : index
    %316 = vector.load %arg16[%c1_142, %c0_143, %c0_144] : memref<2x1x32xf32, #tpu.memory_space<vmem>>, vector<1x1x32xf32>
    %317 = vector.shape_cast %316 : vector<1x1x32xf32> to vector<1x32xf32>
    %cst_145 = arith.constant dense<0.000000e+00> : vector<16xf32>
    %318 = vector.multi_reduction <add>, %313, %cst_145 [1] : vector<16x32xf32> to vector<16xf32>
    %319 = vector.shape_cast %318 : vector<16xf32> to vector<16x1xf32>
    %cst_146 = arith.constant 3.200000e+01 : f32
    %320 = vector.broadcast %cst_146 : f32 to vector<16x1xf32>
    %321 = arith.divf %319, %320 : vector<16x1xf32>
    %322 = vector.broadcast %321 : vector<16x1xf32> to vector<16x32xf32>
    %323 = arith.subf %313, %322 : vector<16x32xf32>
    %324 = arith.mulf %323, %323 : vector<16x32xf32>
    %cst_147 = arith.constant dense<0.000000e+00> : vector<16xf32>
    %325 = vector.multi_reduction <add>, %324, %cst_147 [1] : vector<16x32xf32> to vector<16xf32>
    %326 = vector.shape_cast %325 : vector<16xf32> to vector<16x1xf32>
    %cst_148 = arith.constant 3.200000e+01 : f32
    %327 = vector.broadcast %cst_148 : f32 to vector<16x1xf32>
    %328 = arith.divf %326, %327 : vector<16x1xf32>
    %329 = vector.broadcast %321 : vector<16x1xf32> to vector<16x32xf32>
    %330 = arith.subf %313, %329 : vector<16x32xf32>
    %cst_149 = arith.constant 9.99999974E-6 : f32
    %331 = vector.broadcast %cst_149 : f32 to vector<16x1xf32>
    %332 = arith.addf %328, %331 : vector<16x1xf32>
    %333 = math.rsqrt %332 : vector<16x1xf32>
    %334 = vector.broadcast %333 : vector<16x1xf32> to vector<16x32xf32>
    %335 = arith.mulf %330, %334 : vector<16x32xf32>
    %336 = vector.broadcast %315 : vector<1x32xf32> to vector<16x32xf32>
    %337 = arith.mulf %335, %336 : vector<16x32xf32>
    %338 = vector.broadcast %317 : vector<1x32xf32> to vector<16x32xf32>
    %339 = arith.addf %337, %338 : vector<16x32xf32>
    %c0_150 = arith.constant 0 : index
    %c0_151 = arith.constant 0 : index
    %340 = vector.load %arg1[%c0_150, %c0_151] : memref<16x32xf32, #tpu.memory_space<vmem>>, vector<16x32xf32>
    %c0_152 = arith.constant 0 : index
    %c0_153 = arith.constant 0 : index
    %c0_154 = arith.constant 0 : index
    %341 = vector.load %arg17[%c0_152, %c0_153, %c0_154] : memref<2x32x96xf32, #tpu.memory_space<vmem>>, vector<1x32x96xf32>
    %342 = vector.shape_cast %341 : vector<1x32x96xf32> to vector<32x96xf32>
    %c0_155 = arith.constant 0 : index
    %c0_156 = arith.constant 0 : index
    %c0_157 = arith.constant 0 : index
    %343 = vector.load %arg18[%c0_155, %c0_156, %c0_157] : memref<2x1x96xf32, #tpu.memory_space<vmem>>, vector<1x1x96xf32>
    %344 = vector.shape_cast %343 : vector<1x1x96xf32> to vector<1x96xf32>
    %c0_158 = arith.constant 0 : index
    %c0_159 = arith.constant 0 : index
    %c0_160 = arith.constant 0 : index
    %345 = vector.load %arg19[%c0_158, %c0_159, %c0_160] : memref<2x32x32xf32, #tpu.memory_space<vmem>>, vector<1x32x32xf32>
    %346 = vector.shape_cast %345 : vector<1x32x32xf32> to vector<32x32xf32>
    %c0_161 = arith.constant 0 : index
    %c0_162 = arith.constant 0 : index
    %c0_163 = arith.constant 0 : index
    %347 = vector.load %arg20[%c0_161, %c0_162, %c0_163] : memref<2x1x32xf32, #tpu.memory_space<vmem>>, vector<1x1x32xf32>
    %348 = vector.shape_cast %347 : vector<1x1x32xf32> to vector<1x32xf32>
    %cst_164 = arith.constant dense<0.000000e+00> : vector<16x96xf32>
    %349 = tpu.matmul %340, %342, %cst_164 {dimension_numbers = #tpu.dot_dimension_numbers<[1], [0], [0], [1], [0, 0, 1, 1], [], []>} : vector<16x32xf32>, vector<32x96xf32>, vector<16x96xf32> -> vector<16x96xf32>
    %350 = vector.broadcast %344 : vector<1x96xf32> to vector<16x96xf32>
    %351 = arith.addf %349, %350 : vector<16x96xf32>
    %352 = vector.extract_strided_slice %351 {offsets = [0, 0], sizes = [16, 32], strides = [1, 1]} : vector<16x96xf32> to vector<16x32xf32>
    %353 = vector.extract_strided_slice %351 {offsets = [0, 32], sizes = [16, 32], strides = [1, 1]} : vector<16x96xf32> to vector<16x32xf32>
    %354 = vector.extract_strided_slice %351 {offsets = [0, 64], sizes = [16, 32], strides = [1, 1]} : vector<16x96xf32> to vector<16x32xf32>
    %355 = vector.extract_strided_slice %352 {offsets = [0, 0], sizes = [8, 32], strides = [1, 1]} : vector<16x32xf32> to vector<8x32xf32>
    %356 = vector.extract_strided_slice %353 {offsets = [0, 0], sizes = [8, 32], strides = [1, 1]} : vector<16x32xf32> to vector<8x32xf32>
    %357 = vector.extract_strided_slice %354 {offsets = [0, 0], sizes = [8, 32], strides = [1, 1]} : vector<16x32xf32> to vector<8x32xf32>
    %358 = vector.extract_strided_slice %1 {offsets = [0, 0, 0], sizes = [1, 8, 8], strides = [1, 1, 1]} : vector<2x8x8xf32> to vector<1x8x8xf32>
    %359 = vector.shape_cast %358 : vector<1x8x8xf32> to vector<8x8xf32>
    %360 = vector.extract_strided_slice %355 {offsets = [0, 0], sizes = [8, 16], strides = [1, 1]} : vector<8x32xf32> to vector<8x16xf32>
    %361 = vector.extract_strided_slice %356 {offsets = [0, 0], sizes = [8, 16], strides = [1, 1]} : vector<8x32xf32> to vector<8x16xf32>
    %362 = vector.extract_strided_slice %357 {offsets = [0, 0], sizes = [8, 16], strides = [1, 1]} : vector<8x32xf32> to vector<8x16xf32>
    %cst_165 = arith.constant dense<0.000000e+00> : vector<8x8xf32>
    %363 = tpu.matmul %360, %361, %cst_165 {dimension_numbers = #tpu.dot_dimension_numbers<[1], [1], [0], [0], [0, 0, 1, 0], [], []>} : vector<8x16xf32>, vector<8x16xf32>, vector<8x8xf32> -> vector<8x8xf32>
    %cst_166 = arith.constant 2.500000e-01 : f32
    %364 = vector.broadcast %cst_166 : f32 to vector<8x8xf32>
    %365 = arith.mulf %363, %364 : vector<8x8xf32>
    %366 = arith.addf %365, %359 : vector<8x8xf32>
    %cst_167 = arith.constant dense<0xFF800000> : vector<8xf32>
    %367 = vector.multi_reduction <maximumf>, %366, %cst_167 [1] : vector<8x8xf32> to vector<8xf32>
    %368 = vector.shape_cast %367 : vector<8xf32> to vector<8x1xf32>
    %369 = vector.broadcast %368 : vector<8x1xf32> to vector<8x8xf32>
    %370 = arith.subf %366, %369 : vector<8x8xf32>
    %371 = math.exp %370 : vector<8x8xf32>
    %cst_168 = arith.constant dense<0.000000e+00> : vector<8xf32>
    %372 = vector.multi_reduction <add>, %371, %cst_168 [1] : vector<8x8xf32> to vector<8xf32>
    %373 = vector.shape_cast %372 : vector<8xf32> to vector<8x1xf32>
    %374 = vector.broadcast %373 : vector<8x1xf32> to vector<8x8xf32>
    %375 = arith.divf %371, %374 : vector<8x8xf32>
    %cst_169 = arith.constant dense<0.000000e+00> : vector<8x16xf32>
    %376 = tpu.matmul %375, %362, %cst_169 {dimension_numbers = #tpu.dot_dimension_numbers<[1], [0], [0], [1], [0, 0, 1, 1], [], []>} : vector<8x8xf32>, vector<8x16xf32>, vector<8x16xf32> -> vector<8x16xf32>
    %377 = vector.extract_strided_slice %355 {offsets = [0, 16], sizes = [8, 16], strides = [1, 1]} : vector<8x32xf32> to vector<8x16xf32>
    %378 = vector.extract_strided_slice %356 {offsets = [0, 16], sizes = [8, 16], strides = [1, 1]} : vector<8x32xf32> to vector<8x16xf32>
    %379 = vector.extract_strided_slice %357 {offsets = [0, 16], sizes = [8, 16], strides = [1, 1]} : vector<8x32xf32> to vector<8x16xf32>
    %cst_170 = arith.constant dense<0.000000e+00> : vector<8x8xf32>
    %380 = tpu.matmul %377, %378, %cst_170 {dimension_numbers = #tpu.dot_dimension_numbers<[1], [1], [0], [0], [0, 0, 1, 0], [], []>} : vector<8x16xf32>, vector<8x16xf32>, vector<8x8xf32> -> vector<8x8xf32>
    %cst_171 = arith.constant 2.500000e-01 : f32
    %381 = vector.broadcast %cst_171 : f32 to vector<8x8xf32>
    %382 = arith.mulf %380, %381 : vector<8x8xf32>
    %383 = arith.addf %382, %359 : vector<8x8xf32>
    %cst_172 = arith.constant dense<0xFF800000> : vector<8xf32>
    %384 = vector.multi_reduction <maximumf>, %383, %cst_172 [1] : vector<8x8xf32> to vector<8xf32>
    %385 = vector.shape_cast %384 : vector<8xf32> to vector<8x1xf32>
    %386 = vector.broadcast %385 : vector<8x1xf32> to vector<8x8xf32>
    %387 = arith.subf %383, %386 : vector<8x8xf32>
    %388 = math.exp %387 : vector<8x8xf32>
    %cst_173 = arith.constant dense<0.000000e+00> : vector<8xf32>
    %389 = vector.multi_reduction <add>, %388, %cst_173 [1] : vector<8x8xf32> to vector<8xf32>
    %390 = vector.shape_cast %389 : vector<8xf32> to vector<8x1xf32>
    %391 = vector.broadcast %390 : vector<8x1xf32> to vector<8x8xf32>
    %392 = arith.divf %388, %391 : vector<8x8xf32>
    %cst_174 = arith.constant dense<0.000000e+00> : vector<8x16xf32>
    %393 = tpu.matmul %392, %379, %cst_174 {dimension_numbers = #tpu.dot_dimension_numbers<[1], [0], [0], [1], [0, 0, 1, 1], [], []>} : vector<8x8xf32>, vector<8x16xf32>, vector<8x16xf32> -> vector<8x16xf32>
    %394 = tpu.concatenate %376, %393 in 1 : vector<8x16xf32>, vector<8x16xf32> -> vector<8x32xf32>
    %395 = vector.extract_strided_slice %352 {offsets = [8, 0], sizes = [8, 32], strides = [1, 1]} : vector<16x32xf32> to vector<8x32xf32>
    %396 = vector.extract_strided_slice %353 {offsets = [8, 0], sizes = [8, 32], strides = [1, 1]} : vector<16x32xf32> to vector<8x32xf32>
    %397 = vector.extract_strided_slice %354 {offsets = [8, 0], sizes = [8, 32], strides = [1, 1]} : vector<16x32xf32> to vector<8x32xf32>
    %398 = vector.extract_strided_slice %1 {offsets = [1, 0, 0], sizes = [1, 8, 8], strides = [1, 1, 1]} : vector<2x8x8xf32> to vector<1x8x8xf32>
    %399 = vector.shape_cast %398 : vector<1x8x8xf32> to vector<8x8xf32>
    %400 = vector.extract_strided_slice %395 {offsets = [0, 0], sizes = [8, 16], strides = [1, 1]} : vector<8x32xf32> to vector<8x16xf32>
    %401 = vector.extract_strided_slice %396 {offsets = [0, 0], sizes = [8, 16], strides = [1, 1]} : vector<8x32xf32> to vector<8x16xf32>
    %402 = vector.extract_strided_slice %397 {offsets = [0, 0], sizes = [8, 16], strides = [1, 1]} : vector<8x32xf32> to vector<8x16xf32>
    %cst_175 = arith.constant dense<0.000000e+00> : vector<8x8xf32>
    %403 = tpu.matmul %400, %401, %cst_175 {dimension_numbers = #tpu.dot_dimension_numbers<[1], [1], [0], [0], [0, 0, 1, 0], [], []>} : vector<8x16xf32>, vector<8x16xf32>, vector<8x8xf32> -> vector<8x8xf32>
    %cst_176 = arith.constant 2.500000e-01 : f32
    %404 = vector.broadcast %cst_176 : f32 to vector<8x8xf32>
    %405 = arith.mulf %403, %404 : vector<8x8xf32>
    %406 = arith.addf %405, %399 : vector<8x8xf32>
    %cst_177 = arith.constant dense<0xFF800000> : vector<8xf32>
    %407 = vector.multi_reduction <maximumf>, %406, %cst_177 [1] : vector<8x8xf32> to vector<8xf32>
    %408 = vector.shape_cast %407 : vector<8xf32> to vector<8x1xf32>
    %409 = vector.broadcast %408 : vector<8x1xf32> to vector<8x8xf32>
    %410 = arith.subf %406, %409 : vector<8x8xf32>
    %411 = math.exp %410 : vector<8x8xf32>
    %cst_178 = arith.constant dense<0.000000e+00> : vector<8xf32>
    %412 = vector.multi_reduction <add>, %411, %cst_178 [1] : vector<8x8xf32> to vector<8xf32>
    %413 = vector.shape_cast %412 : vector<8xf32> to vector<8x1xf32>
    %414 = vector.broadcast %413 : vector<8x1xf32> to vector<8x8xf32>
    %415 = arith.divf %411, %414 : vector<8x8xf32>
    %cst_179 = arith.constant dense<0.000000e+00> : vector<8x16xf32>
    %416 = tpu.matmul %415, %402, %cst_179 {dimension_numbers = #tpu.dot_dimension_numbers<[1], [0], [0], [1], [0, 0, 1, 1], [], []>} : vector<8x8xf32>, vector<8x16xf32>, vector<8x16xf32> -> vector<8x16xf32>
    %417 = vector.extract_strided_slice %395 {offsets = [0, 16], sizes = [8, 16], strides = [1, 1]} : vector<8x32xf32> to vector<8x16xf32>
    %418 = vector.extract_strided_slice %396 {offsets = [0, 16], sizes = [8, 16], strides = [1, 1]} : vector<8x32xf32> to vector<8x16xf32>
    %419 = vector.extract_strided_slice %397 {offsets = [0, 16], sizes = [8, 16], strides = [1, 1]} : vector<8x32xf32> to vector<8x16xf32>
    %cst_180 = arith.constant dense<0.000000e+00> : vector<8x8xf32>
    %420 = tpu.matmul %417, %418, %cst_180 {dimension_numbers = #tpu.dot_dimension_numbers<[1], [1], [0], [0], [0, 0, 1, 0], [], []>} : vector<8x16xf32>, vector<8x16xf32>, vector<8x8xf32> -> vector<8x8xf32>
    %cst_181 = arith.constant 2.500000e-01 : f32
    %421 = vector.broadcast %cst_181 : f32 to vector<8x8xf32>
    %422 = arith.mulf %420, %421 : vector<8x8xf32>
    %423 = arith.addf %422, %399 : vector<8x8xf32>
    %cst_182 = arith.constant dense<0xFF800000> : vector<8xf32>
    %424 = vector.multi_reduction <maximumf>, %423, %cst_182 [1] : vector<8x8xf32> to vector<8xf32>
    %425 = vector.shape_cast %424 : vector<8xf32> to vector<8x1xf32>
    %426 = vector.broadcast %425 : vector<8x1xf32> to vector<8x8xf32>
    %427 = arith.subf %423, %426 : vector<8x8xf32>
    %428 = math.exp %427 : vector<8x8xf32>
    %cst_183 = arith.constant dense<0.000000e+00> : vector<8xf32>
    %429 = vector.multi_reduction <add>, %428, %cst_183 [1] : vector<8x8xf32> to vector<8xf32>
    %430 = vector.shape_cast %429 : vector<8xf32> to vector<8x1xf32>
    %431 = vector.broadcast %430 : vector<8x1xf32> to vector<8x8xf32>
    %432 = arith.divf %428, %431 : vector<8x8xf32>
    %cst_184 = arith.constant dense<0.000000e+00> : vector<8x16xf32>
    %433 = tpu.matmul %432, %419, %cst_184 {dimension_numbers = #tpu.dot_dimension_numbers<[1], [0], [0], [1], [0, 0, 1, 1], [], []>} : vector<8x8xf32>, vector<8x16xf32>, vector<8x16xf32> -> vector<8x16xf32>
    %434 = tpu.concatenate %416, %433 in 1 : vector<8x16xf32>, vector<8x16xf32> -> vector<8x32xf32>
    %435 = tpu.concatenate %394, %434 in 0 : vector<8x32xf32>, vector<8x32xf32> -> vector<16x32xf32>
    %cst_185 = arith.constant dense<0.000000e+00> : vector<16x32xf32>
    %436 = tpu.matmul %435, %346, %cst_185 {dimension_numbers = #tpu.dot_dimension_numbers<[1], [0], [0], [1], [0, 0, 1, 1], [], []>} : vector<16x32xf32>, vector<32x32xf32>, vector<16x32xf32> -> vector<16x32xf32>
    %437 = vector.broadcast %348 : vector<1x32xf32> to vector<16x32xf32>
    %438 = arith.addf %436, %437 : vector<16x32xf32>
    %439 = arith.addf %438, %340 : vector<16x32xf32>
    %c0_186 = arith.constant 0 : index
    %c0_187 = arith.constant 0 : index
    %c0_188 = arith.constant 0 : index
    %440 = vector.load %arg21[%c0_186, %c0_187, %c0_188] : memref<2x1x32xf32, #tpu.memory_space<vmem>>, vector<1x1x32xf32>
    %441 = vector.shape_cast %440 : vector<1x1x32xf32> to vector<1x32xf32>
    %c0_189 = arith.constant 0 : index
    %c0_190 = arith.constant 0 : index
    %c0_191 = arith.constant 0 : index
    %442 = vector.load %arg22[%c0_189, %c0_190, %c0_191] : memref<2x1x32xf32, #tpu.memory_space<vmem>>, vector<1x1x32xf32>
    %443 = vector.shape_cast %442 : vector<1x1x32xf32> to vector<1x32xf32>
    %cst_192 = arith.constant dense<0.000000e+00> : vector<16xf32>
    %444 = vector.multi_reduction <add>, %439, %cst_192 [1] : vector<16x32xf32> to vector<16xf32>
    %445 = vector.shape_cast %444 : vector<16xf32> to vector<16x1xf32>
    %cst_193 = arith.constant 3.200000e+01 : f32
    %446 = vector.broadcast %cst_193 : f32 to vector<16x1xf32>
    %447 = arith.divf %445, %446 : vector<16x1xf32>
    %448 = vector.broadcast %447 : vector<16x1xf32> to vector<16x32xf32>
    %449 = arith.subf %439, %448 : vector<16x32xf32>
    %450 = arith.mulf %449, %449 : vector<16x32xf32>
    %cst_194 = arith.constant dense<0.000000e+00> : vector<16xf32>
    %451 = vector.multi_reduction <add>, %450, %cst_194 [1] : vector<16x32xf32> to vector<16xf32>
    %452 = vector.shape_cast %451 : vector<16xf32> to vector<16x1xf32>
    %cst_195 = arith.constant 3.200000e+01 : f32
    %453 = vector.broadcast %cst_195 : f32 to vector<16x1xf32>
    %454 = arith.divf %452, %453 : vector<16x1xf32>
    %455 = vector.broadcast %447 : vector<16x1xf32> to vector<16x32xf32>
    %456 = arith.subf %439, %455 : vector<16x32xf32>
    %cst_196 = arith.constant 9.99999974E-6 : f32
    %457 = vector.broadcast %cst_196 : f32 to vector<16x1xf32>
    %458 = arith.addf %454, %457 : vector<16x1xf32>
    %459 = math.rsqrt %458 : vector<16x1xf32>
    %460 = vector.broadcast %459 : vector<16x1xf32> to vector<16x32xf32>
    %461 = arith.mulf %456, %460 : vector<16x32xf32>
    %462 = vector.broadcast %441 : vector<1x32xf32> to vector<16x32xf32>
    %463 = arith.mulf %461, %462 : vector<16x32xf32>
    %464 = vector.broadcast %443 : vector<1x32xf32> to vector<16x32xf32>
    %465 = arith.addf %463, %464 : vector<16x32xf32>
    %c0_197 = arith.constant 0 : index
    %c0_198 = arith.constant 0 : index
    %c0_199 = arith.constant 0 : index
    %466 = vector.load %arg23[%c0_197, %c0_198, %c0_199] : memref<2x32x96xf32, #tpu.memory_space<vmem>>, vector<1x32x96xf32>
    %467 = vector.shape_cast %466 : vector<1x32x96xf32> to vector<32x96xf32>
    %c0_200 = arith.constant 0 : index
    %c0_201 = arith.constant 0 : index
    %c0_202 = arith.constant 0 : index
    %468 = vector.load %arg24[%c0_200, %c0_201, %c0_202] : memref<2x1x96xf32, #tpu.memory_space<vmem>>, vector<1x1x96xf32>
    %469 = vector.shape_cast %468 : vector<1x1x96xf32> to vector<1x96xf32>
    %c0_203 = arith.constant 0 : index
    %c0_204 = arith.constant 0 : index
    %c0_205 = arith.constant 0 : index
    %470 = vector.load %arg25[%c0_203, %c0_204, %c0_205] : memref<2x32x32xf32, #tpu.memory_space<vmem>>, vector<1x32x32xf32>
    %471 = vector.shape_cast %470 : vector<1x32x32xf32> to vector<32x32xf32>
    %c0_206 = arith.constant 0 : index
    %c0_207 = arith.constant 0 : index
    %c0_208 = arith.constant 0 : index
    %472 = vector.load %arg26[%c0_206, %c0_207, %c0_208] : memref<2x1x32xf32, #tpu.memory_space<vmem>>, vector<1x1x32xf32>
    %473 = vector.shape_cast %472 : vector<1x1x32xf32> to vector<1x32xf32>
    %474 = vector.extract_strided_slice %467 {offsets = [0, 0], sizes = [32, 32], strides = [1, 1]} : vector<32x96xf32> to vector<32x32xf32>
    %cst_209 = arith.constant dense<0.000000e+00> : vector<16x32xf32>
    %475 = tpu.matmul %465, %474, %cst_209 {dimension_numbers = #tpu.dot_dimension_numbers<[1], [0], [0], [1], [0, 0, 1, 1], [], []>} : vector<16x32xf32>, vector<32x32xf32>, vector<16x32xf32> -> vector<16x32xf32>
    %476 = vector.extract_strided_slice %469 {offsets = [0, 0], sizes = [1, 32], strides = [1, 1]} : vector<1x96xf32> to vector<1x32xf32>
    %477 = vector.broadcast %476 : vector<1x32xf32> to vector<16x32xf32>
    %478 = arith.addf %475, %477 : vector<16x32xf32>
    %479 = vector.extract_strided_slice %467 {offsets = [0, 32], sizes = [32, 64], strides = [1, 1]} : vector<32x96xf32> to vector<32x64xf32>
    %cst_210 = arith.constant dense<0.000000e+00> : vector<16x64xf32>
    %480 = tpu.matmul %339, %479, %cst_210 {dimension_numbers = #tpu.dot_dimension_numbers<[1], [0], [0], [1], [0, 0, 1, 1], [], []>} : vector<16x32xf32>, vector<32x64xf32>, vector<16x64xf32> -> vector<16x64xf32>
    %481 = vector.extract_strided_slice %469 {offsets = [0, 32], sizes = [1, 64], strides = [1, 1]} : vector<1x96xf32> to vector<1x64xf32>
    %482 = vector.broadcast %481 : vector<1x64xf32> to vector<16x64xf32>
    %483 = arith.addf %480, %482 : vector<16x64xf32>
    %484 = vector.extract_strided_slice %483 {offsets = [0, 0], sizes = [16, 32], strides = [1, 1]} : vector<16x64xf32> to vector<16x32xf32>
    %485 = vector.extract_strided_slice %483 {offsets = [0, 32], sizes = [16, 32], strides = [1, 1]} : vector<16x64xf32> to vector<16x32xf32>
    %486 = vector.extract_strided_slice %478 {offsets = [0, 0], sizes = [8, 32], strides = [1, 1]} : vector<16x32xf32> to vector<8x32xf32>
    %487 = vector.extract_strided_slice %484 {offsets = [0, 0], sizes = [8, 32], strides = [1, 1]} : vector<16x32xf32> to vector<8x32xf32>
    %488 = vector.extract_strided_slice %485 {offsets = [0, 0], sizes = [8, 32], strides = [1, 1]} : vector<16x32xf32> to vector<8x32xf32>
    %489 = vector.extract_strided_slice %2 {offsets = [0, 0, 0], sizes = [1, 8, 8], strides = [1, 1, 1]} : vector<2x8x8xf32> to vector<1x8x8xf32>
    %490 = vector.shape_cast %489 : vector<1x8x8xf32> to vector<8x8xf32>
    %491 = vector.extract_strided_slice %486 {offsets = [0, 0], sizes = [8, 16], strides = [1, 1]} : vector<8x32xf32> to vector<8x16xf32>
    %492 = vector.extract_strided_slice %487 {offsets = [0, 0], sizes = [8, 16], strides = [1, 1]} : vector<8x32xf32> to vector<8x16xf32>
    %493 = vector.extract_strided_slice %488 {offsets = [0, 0], sizes = [8, 16], strides = [1, 1]} : vector<8x32xf32> to vector<8x16xf32>
    %cst_211 = arith.constant dense<0.000000e+00> : vector<8x8xf32>
    %494 = tpu.matmul %491, %492, %cst_211 {dimension_numbers = #tpu.dot_dimension_numbers<[1], [1], [0], [0], [0, 0, 1, 0], [], []>} : vector<8x16xf32>, vector<8x16xf32>, vector<8x8xf32> -> vector<8x8xf32>
    %cst_212 = arith.constant 2.500000e-01 : f32
    %495 = vector.broadcast %cst_212 : f32 to vector<8x8xf32>
    %496 = arith.mulf %494, %495 : vector<8x8xf32>
    %497 = arith.addf %496, %490 : vector<8x8xf32>
    %cst_213 = arith.constant dense<0xFF800000> : vector<8xf32>
    %498 = vector.multi_reduction <maximumf>, %497, %cst_213 [1] : vector<8x8xf32> to vector<8xf32>
    %499 = vector.shape_cast %498 : vector<8xf32> to vector<8x1xf32>
    %500 = vector.broadcast %499 : vector<8x1xf32> to vector<8x8xf32>
    %501 = arith.subf %497, %500 : vector<8x8xf32>
    %502 = math.exp %501 : vector<8x8xf32>
    %cst_214 = arith.constant dense<0.000000e+00> : vector<8xf32>
    %503 = vector.multi_reduction <add>, %502, %cst_214 [1] : vector<8x8xf32> to vector<8xf32>
    %504 = vector.shape_cast %503 : vector<8xf32> to vector<8x1xf32>
    %505 = vector.broadcast %504 : vector<8x1xf32> to vector<8x8xf32>
    %506 = arith.divf %502, %505 : vector<8x8xf32>
    %cst_215 = arith.constant dense<0.000000e+00> : vector<8x16xf32>
    %507 = tpu.matmul %506, %493, %cst_215 {dimension_numbers = #tpu.dot_dimension_numbers<[1], [0], [0], [1], [0, 0, 1, 1], [], []>} : vector<8x8xf32>, vector<8x16xf32>, vector<8x16xf32> -> vector<8x16xf32>
    %508 = vector.extract_strided_slice %486 {offsets = [0, 16], sizes = [8, 16], strides = [1, 1]} : vector<8x32xf32> to vector<8x16xf32>
    %509 = vector.extract_strided_slice %487 {offsets = [0, 16], sizes = [8, 16], strides = [1, 1]} : vector<8x32xf32> to vector<8x16xf32>
    %510 = vector.extract_strided_slice %488 {offsets = [0, 16], sizes = [8, 16], strides = [1, 1]} : vector<8x32xf32> to vector<8x16xf32>
    %cst_216 = arith.constant dense<0.000000e+00> : vector<8x8xf32>
    %511 = tpu.matmul %508, %509, %cst_216 {dimension_numbers = #tpu.dot_dimension_numbers<[1], [1], [0], [0], [0, 0, 1, 0], [], []>} : vector<8x16xf32>, vector<8x16xf32>, vector<8x8xf32> -> vector<8x8xf32>
    %cst_217 = arith.constant 2.500000e-01 : f32
    %512 = vector.broadcast %cst_217 : f32 to vector<8x8xf32>
    %513 = arith.mulf %511, %512 : vector<8x8xf32>
    %514 = arith.addf %513, %490 : vector<8x8xf32>
    %cst_218 = arith.constant dense<0xFF800000> : vector<8xf32>
    %515 = vector.multi_reduction <maximumf>, %514, %cst_218 [1] : vector<8x8xf32> to vector<8xf32>
    %516 = vector.shape_cast %515 : vector<8xf32> to vector<8x1xf32>
    %517 = vector.broadcast %516 : vector<8x1xf32> to vector<8x8xf32>
    %518 = arith.subf %514, %517 : vector<8x8xf32>
    %519 = math.exp %518 : vector<8x8xf32>
    %cst_219 = arith.constant dense<0.000000e+00> : vector<8xf32>
    %520 = vector.multi_reduction <add>, %519, %cst_219 [1] : vector<8x8xf32> to vector<8xf32>
    %521 = vector.shape_cast %520 : vector<8xf32> to vector<8x1xf32>
    %522 = vector.broadcast %521 : vector<8x1xf32> to vector<8x8xf32>
    %523 = arith.divf %519, %522 : vector<8x8xf32>
    %cst_220 = arith.constant dense<0.000000e+00> : vector<8x16xf32>
    %524 = tpu.matmul %523, %510, %cst_220 {dimension_numbers = #tpu.dot_dimension_numbers<[1], [0], [0], [1], [0, 0, 1, 1], [], []>} : vector<8x8xf32>, vector<8x16xf32>, vector<8x16xf32> -> vector<8x16xf32>
    %525 = tpu.concatenate %507, %524 in 1 : vector<8x16xf32>, vector<8x16xf32> -> vector<8x32xf32>
    %526 = vector.extract_strided_slice %478 {offsets = [8, 0], sizes = [8, 32], strides = [1, 1]} : vector<16x32xf32> to vector<8x32xf32>
    %527 = vector.extract_strided_slice %484 {offsets = [8, 0], sizes = [8, 32], strides = [1, 1]} : vector<16x32xf32> to vector<8x32xf32>
    %528 = vector.extract_strided_slice %485 {offsets = [8, 0], sizes = [8, 32], strides = [1, 1]} : vector<16x32xf32> to vector<8x32xf32>
    %529 = vector.extract_strided_slice %2 {offsets = [1, 0, 0], sizes = [1, 8, 8], strides = [1, 1, 1]} : vector<2x8x8xf32> to vector<1x8x8xf32>
    %530 = vector.shape_cast %529 : vector<1x8x8xf32> to vector<8x8xf32>
    %531 = vector.extract_strided_slice %526 {offsets = [0, 0], sizes = [8, 16], strides = [1, 1]} : vector<8x32xf32> to vector<8x16xf32>
    %532 = vector.extract_strided_slice %527 {offsets = [0, 0], sizes = [8, 16], strides = [1, 1]} : vector<8x32xf32> to vector<8x16xf32>
    %533 = vector.extract_strided_slice %528 {offsets = [0, 0], sizes = [8, 16], strides = [1, 1]} : vector<8x32xf32> to vector<8x16xf32>
    %cst_221 = arith.constant dense<0.000000e+00> : vector<8x8xf32>
    %534 = tpu.matmul %531, %532, %cst_221 {dimension_numbers = #tpu.dot_dimension_numbers<[1], [1], [0], [0], [0, 0, 1, 0], [], []>} : vector<8x16xf32>, vector<8x16xf32>, vector<8x8xf32> -> vector<8x8xf32>
    %cst_222 = arith.constant 2.500000e-01 : f32
    %535 = vector.broadcast %cst_222 : f32 to vector<8x8xf32>
    %536 = arith.mulf %534, %535 : vector<8x8xf32>
    %537 = arith.addf %536, %530 : vector<8x8xf32>
    %cst_223 = arith.constant dense<0xFF800000> : vector<8xf32>
    %538 = vector.multi_reduction <maximumf>, %537, %cst_223 [1] : vector<8x8xf32> to vector<8xf32>
    %539 = vector.shape_cast %538 : vector<8xf32> to vector<8x1xf32>
    %540 = vector.broadcast %539 : vector<8x1xf32> to vector<8x8xf32>
    %541 = arith.subf %537, %540 : vector<8x8xf32>
    %542 = math.exp %541 : vector<8x8xf32>
    %cst_224 = arith.constant dense<0.000000e+00> : vector<8xf32>
    %543 = vector.multi_reduction <add>, %542, %cst_224 [1] : vector<8x8xf32> to vector<8xf32>
    %544 = vector.shape_cast %543 : vector<8xf32> to vector<8x1xf32>
    %545 = vector.broadcast %544 : vector<8x1xf32> to vector<8x8xf32>
    %546 = arith.divf %542, %545 : vector<8x8xf32>
    %cst_225 = arith.constant dense<0.000000e+00> : vector<8x16xf32>
    %547 = tpu.matmul %546, %533, %cst_225 {dimension_numbers = #tpu.dot_dimension_numbers<[1], [0], [0], [1], [0, 0, 1, 1], [], []>} : vector<8x8xf32>, vector<8x16xf32>, vector<8x16xf32> -> vector<8x16xf32>
    %548 = vector.extract_strided_slice %526 {offsets = [0, 16], sizes = [8, 16], strides = [1, 1]} : vector<8x32xf32> to vector<8x16xf32>
    %549 = vector.extract_strided_slice %527 {offsets = [0, 16], sizes = [8, 16], strides = [1, 1]} : vector<8x32xf32> to vector<8x16xf32>
    %550 = vector.extract_strided_slice %528 {offsets = [0, 16], sizes = [8, 16], strides = [1, 1]} : vector<8x32xf32> to vector<8x16xf32>
    %cst_226 = arith.constant dense<0.000000e+00> : vector<8x8xf32>
    %551 = tpu.matmul %548, %549, %cst_226 {dimension_numbers = #tpu.dot_dimension_numbers<[1], [1], [0], [0], [0, 0, 1, 0], [], []>} : vector<8x16xf32>, vector<8x16xf32>, vector<8x8xf32> -> vector<8x8xf32>
    %cst_227 = arith.constant 2.500000e-01 : f32
    %552 = vector.broadcast %cst_227 : f32 to vector<8x8xf32>
    %553 = arith.mulf %551, %552 : vector<8x8xf32>
    %554 = arith.addf %553, %530 : vector<8x8xf32>
    %cst_228 = arith.constant dense<0xFF800000> : vector<8xf32>
    %555 = vector.multi_reduction <maximumf>, %554, %cst_228 [1] : vector<8x8xf32> to vector<8xf32>
    %556 = vector.shape_cast %555 : vector<8xf32> to vector<8x1xf32>
    %557 = vector.broadcast %556 : vector<8x1xf32> to vector<8x8xf32>
    %558 = arith.subf %554, %557 : vector<8x8xf32>
    %559 = math.exp %558 : vector<8x8xf32>
    %cst_229 = arith.constant dense<0.000000e+00> : vector<8xf32>
    %560 = vector.multi_reduction <add>, %559, %cst_229 [1] : vector<8x8xf32> to vector<8xf32>
    %561 = vector.shape_cast %560 : vector<8xf32> to vector<8x1xf32>
    %562 = vector.broadcast %561 : vector<8x1xf32> to vector<8x8xf32>
    %563 = arith.divf %559, %562 : vector<8x8xf32>
    %cst_230 = arith.constant dense<0.000000e+00> : vector<8x16xf32>
    %564 = tpu.matmul %563, %550, %cst_230 {dimension_numbers = #tpu.dot_dimension_numbers<[1], [0], [0], [1], [0, 0, 1, 1], [], []>} : vector<8x8xf32>, vector<8x16xf32>, vector<8x16xf32> -> vector<8x16xf32>
    %565 = tpu.concatenate %547, %564 in 1 : vector<8x16xf32>, vector<8x16xf32> -> vector<8x32xf32>
    %566 = tpu.concatenate %525, %565 in 0 : vector<8x32xf32>, vector<8x32xf32> -> vector<16x32xf32>
    %cst_231 = arith.constant dense<0.000000e+00> : vector<16x32xf32>
    %567 = tpu.matmul %566, %471, %cst_231 {dimension_numbers = #tpu.dot_dimension_numbers<[1], [0], [0], [1], [0, 0, 1, 1], [], []>} : vector<16x32xf32>, vector<32x32xf32>, vector<16x32xf32> -> vector<16x32xf32>
    %568 = vector.broadcast %473 : vector<1x32xf32> to vector<16x32xf32>
    %569 = arith.addf %567, %568 : vector<16x32xf32>
    %570 = arith.addf %569, %465 : vector<16x32xf32>
    %c0_232 = arith.constant 0 : index
    %c0_233 = arith.constant 0 : index
    %c0_234 = arith.constant 0 : index
    %571 = vector.load %arg27[%c0_232, %c0_233, %c0_234] : memref<2x1x32xf32, #tpu.memory_space<vmem>>, vector<1x1x32xf32>
    %572 = vector.shape_cast %571 : vector<1x1x32xf32> to vector<1x32xf32>
    %c0_235 = arith.constant 0 : index
    %c0_236 = arith.constant 0 : index
    %c0_237 = arith.constant 0 : index
    %573 = vector.load %arg28[%c0_235, %c0_236, %c0_237] : memref<2x1x32xf32, #tpu.memory_space<vmem>>, vector<1x1x32xf32>
    %574 = vector.shape_cast %573 : vector<1x1x32xf32> to vector<1x32xf32>
    %cst_238 = arith.constant dense<0.000000e+00> : vector<16xf32>
    %575 = vector.multi_reduction <add>, %570, %cst_238 [1] : vector<16x32xf32> to vector<16xf32>
    %576 = vector.shape_cast %575 : vector<16xf32> to vector<16x1xf32>
    %cst_239 = arith.constant 3.200000e+01 : f32
    %577 = vector.broadcast %cst_239 : f32 to vector<16x1xf32>
    %578 = arith.divf %576, %577 : vector<16x1xf32>
    %579 = vector.broadcast %578 : vector<16x1xf32> to vector<16x32xf32>
    %580 = arith.subf %570, %579 : vector<16x32xf32>
    %581 = arith.mulf %580, %580 : vector<16x32xf32>
    %cst_240 = arith.constant dense<0.000000e+00> : vector<16xf32>
    %582 = vector.multi_reduction <add>, %581, %cst_240 [1] : vector<16x32xf32> to vector<16xf32>
    %583 = vector.shape_cast %582 : vector<16xf32> to vector<16x1xf32>
    %cst_241 = arith.constant 3.200000e+01 : f32
    %584 = vector.broadcast %cst_241 : f32 to vector<16x1xf32>
    %585 = arith.divf %583, %584 : vector<16x1xf32>
    %586 = vector.broadcast %578 : vector<16x1xf32> to vector<16x32xf32>
    %587 = arith.subf %570, %586 : vector<16x32xf32>
    %cst_242 = arith.constant 9.99999974E-6 : f32
    %588 = vector.broadcast %cst_242 : f32 to vector<16x1xf32>
    %589 = arith.addf %585, %588 : vector<16x1xf32>
    %590 = math.rsqrt %589 : vector<16x1xf32>
    %591 = vector.broadcast %590 : vector<16x1xf32> to vector<16x32xf32>
    %592 = arith.mulf %587, %591 : vector<16x32xf32>
    %593 = vector.broadcast %572 : vector<1x32xf32> to vector<16x32xf32>
    %594 = arith.mulf %592, %593 : vector<16x32xf32>
    %595 = vector.broadcast %574 : vector<1x32xf32> to vector<16x32xf32>
    %596 = arith.addf %594, %595 : vector<16x32xf32>
    %c0_243 = arith.constant 0 : index
    %c0_244 = arith.constant 0 : index
    %c0_245 = arith.constant 0 : index
    %597 = vector.load %arg29[%c0_243, %c0_244, %c0_245] : memref<2x32x64xf32, #tpu.memory_space<vmem>>, vector<1x32x64xf32>
    %598 = vector.shape_cast %597 : vector<1x32x64xf32> to vector<32x64xf32>
    %c0_246 = arith.constant 0 : index
    %c0_247 = arith.constant 0 : index
    %c0_248 = arith.constant 0 : index
    %599 = vector.load %arg30[%c0_246, %c0_247, %c0_248] : memref<2x1x64xf32, #tpu.memory_space<vmem>>, vector<1x1x64xf32>
    %600 = vector.shape_cast %599 : vector<1x1x64xf32> to vector<1x64xf32>
    %c0_249 = arith.constant 0 : index
    %c0_250 = arith.constant 0 : index
    %c0_251 = arith.constant 0 : index
    %601 = vector.load %arg31[%c0_249, %c0_250, %c0_251] : memref<2x64x32xf32, #tpu.memory_space<vmem>>, vector<1x64x32xf32>
    %602 = vector.shape_cast %601 : vector<1x64x32xf32> to vector<64x32xf32>
    %c0_252 = arith.constant 0 : index
    %c0_253 = arith.constant 0 : index
    %c0_254 = arith.constant 0 : index
    %603 = vector.load %arg32[%c0_252, %c0_253, %c0_254] : memref<2x1x32xf32, #tpu.memory_space<vmem>>, vector<1x1x32xf32>
    %604 = vector.shape_cast %603 : vector<1x1x32xf32> to vector<1x32xf32>
    %cst_255 = arith.constant dense<0.000000e+00> : vector<16x64xf32>
    %605 = tpu.matmul %596, %598, %cst_255 {dimension_numbers = #tpu.dot_dimension_numbers<[1], [0], [0], [1], [0, 0, 1, 1], [], []>} : vector<16x32xf32>, vector<32x64xf32>, vector<16x64xf32> -> vector<16x64xf32>
    %606 = vector.broadcast %600 : vector<1x64xf32> to vector<16x64xf32>
    %607 = arith.addf %605, %606 : vector<16x64xf32>
    %cst_256 = arith.constant 0.000000e+00 : f32
    %608 = vector.broadcast %cst_256 : f32 to vector<16x64xf32>
    %609 = arith.maximumf %607, %608 : vector<16x64xf32>
    %cst_257 = arith.constant dense<0.000000e+00> : vector<16x32xf32>
    %610 = tpu.matmul %609, %602, %cst_257 {dimension_numbers = #tpu.dot_dimension_numbers<[1], [0], [0], [1], [0, 0, 1, 1], [], []>} : vector<16x64xf32>, vector<64x32xf32>, vector<16x32xf32> -> vector<16x32xf32>
    %611 = vector.broadcast %604 : vector<1x32xf32> to vector<16x32xf32>
    %612 = arith.addf %610, %611 : vector<16x32xf32>
    %613 = arith.addf %612, %596 : vector<16x32xf32>
    %c0_258 = arith.constant 0 : index
    %c0_259 = arith.constant 0 : index
    %c0_260 = arith.constant 0 : index
    %614 = vector.load %arg33[%c0_258, %c0_259, %c0_260] : memref<2x1x32xf32, #tpu.memory_space<vmem>>, vector<1x1x32xf32>
    %615 = vector.shape_cast %614 : vector<1x1x32xf32> to vector<1x32xf32>
    %c0_261 = arith.constant 0 : index
    %c0_262 = arith.constant 0 : index
    %c0_263 = arith.constant 0 : index
    %616 = vector.load %arg34[%c0_261, %c0_262, %c0_263] : memref<2x1x32xf32, #tpu.memory_space<vmem>>, vector<1x1x32xf32>
    %617 = vector.shape_cast %616 : vector<1x1x32xf32> to vector<1x32xf32>
    %cst_264 = arith.constant dense<0.000000e+00> : vector<16xf32>
    %618 = vector.multi_reduction <add>, %613, %cst_264 [1] : vector<16x32xf32> to vector<16xf32>
    %619 = vector.shape_cast %618 : vector<16xf32> to vector<16x1xf32>
    %cst_265 = arith.constant 3.200000e+01 : f32
    %620 = vector.broadcast %cst_265 : f32 to vector<16x1xf32>
    %621 = arith.divf %619, %620 : vector<16x1xf32>
    %622 = vector.broadcast %621 : vector<16x1xf32> to vector<16x32xf32>
    %623 = arith.subf %613, %622 : vector<16x32xf32>
    %624 = arith.mulf %623, %623 : vector<16x32xf32>
    %cst_266 = arith.constant dense<0.000000e+00> : vector<16xf32>
    %625 = vector.multi_reduction <add>, %624, %cst_266 [1] : vector<16x32xf32> to vector<16xf32>
    %626 = vector.shape_cast %625 : vector<16xf32> to vector<16x1xf32>
    %cst_267 = arith.constant 3.200000e+01 : f32
    %627 = vector.broadcast %cst_267 : f32 to vector<16x1xf32>
    %628 = arith.divf %626, %627 : vector<16x1xf32>
    %629 = vector.broadcast %621 : vector<16x1xf32> to vector<16x32xf32>
    %630 = arith.subf %613, %629 : vector<16x32xf32>
    %cst_268 = arith.constant 9.99999974E-6 : f32
    %631 = vector.broadcast %cst_268 : f32 to vector<16x1xf32>
    %632 = arith.addf %628, %631 : vector<16x1xf32>
    %633 = math.rsqrt %632 : vector<16x1xf32>
    %634 = vector.broadcast %633 : vector<16x1xf32> to vector<16x32xf32>
    %635 = arith.mulf %630, %634 : vector<16x32xf32>
    %636 = vector.broadcast %615 : vector<1x32xf32> to vector<16x32xf32>
    %637 = arith.mulf %635, %636 : vector<16x32xf32>
    %638 = vector.broadcast %617 : vector<1x32xf32> to vector<16x32xf32>
    %639 = arith.addf %637, %638 : vector<16x32xf32>
    %c1_269 = arith.constant 1 : index
    %c0_270 = arith.constant 0 : index
    %c0_271 = arith.constant 0 : index
    %640 = vector.load %arg17[%c1_269, %c0_270, %c0_271] : memref<2x32x96xf32, #tpu.memory_space<vmem>>, vector<1x32x96xf32>
    %641 = vector.shape_cast %640 : vector<1x32x96xf32> to vector<32x96xf32>
    %c1_272 = arith.constant 1 : index
    %c0_273 = arith.constant 0 : index
    %c0_274 = arith.constant 0 : index
    %642 = vector.load %arg18[%c1_272, %c0_273, %c0_274] : memref<2x1x96xf32, #tpu.memory_space<vmem>>, vector<1x1x96xf32>
    %643 = vector.shape_cast %642 : vector<1x1x96xf32> to vector<1x96xf32>
    %c1_275 = arith.constant 1 : index
    %c0_276 = arith.constant 0 : index
    %c0_277 = arith.constant 0 : index
    %644 = vector.load %arg19[%c1_275, %c0_276, %c0_277] : memref<2x32x32xf32, #tpu.memory_space<vmem>>, vector<1x32x32xf32>
    %645 = vector.shape_cast %644 : vector<1x32x32xf32> to vector<32x32xf32>
    %c1_278 = arith.constant 1 : index
    %c0_279 = arith.constant 0 : index
    %c0_280 = arith.constant 0 : index
    %646 = vector.load %arg20[%c1_278, %c0_279, %c0_280] : memref<2x1x32xf32, #tpu.memory_space<vmem>>, vector<1x1x32xf32>
    %647 = vector.shape_cast %646 : vector<1x1x32xf32> to vector<1x32xf32>
    %cst_281 = arith.constant dense<0.000000e+00> : vector<16x96xf32>
    %648 = tpu.matmul %639, %641, %cst_281 {dimension_numbers = #tpu.dot_dimension_numbers<[1], [0], [0], [1], [0, 0, 1, 1], [], []>} : vector<16x32xf32>, vector<32x96xf32>, vector<16x96xf32> -> vector<16x96xf32>
    %649 = vector.broadcast %643 : vector<1x96xf32> to vector<16x96xf32>
    %650 = arith.addf %648, %649 : vector<16x96xf32>
    %651 = vector.extract_strided_slice %650 {offsets = [0, 0], sizes = [16, 32], strides = [1, 1]} : vector<16x96xf32> to vector<16x32xf32>
    %652 = vector.extract_strided_slice %650 {offsets = [0, 32], sizes = [16, 32], strides = [1, 1]} : vector<16x96xf32> to vector<16x32xf32>
    %653 = vector.extract_strided_slice %650 {offsets = [0, 64], sizes = [16, 32], strides = [1, 1]} : vector<16x96xf32> to vector<16x32xf32>
    %654 = vector.extract_strided_slice %651 {offsets = [0, 0], sizes = [8, 32], strides = [1, 1]} : vector<16x32xf32> to vector<8x32xf32>
    %655 = vector.extract_strided_slice %652 {offsets = [0, 0], sizes = [8, 32], strides = [1, 1]} : vector<16x32xf32> to vector<8x32xf32>
    %656 = vector.extract_strided_slice %653 {offsets = [0, 0], sizes = [8, 32], strides = [1, 1]} : vector<16x32xf32> to vector<8x32xf32>
    %657 = vector.extract_strided_slice %1 {offsets = [0, 0, 0], sizes = [1, 8, 8], strides = [1, 1, 1]} : vector<2x8x8xf32> to vector<1x8x8xf32>
    %658 = vector.shape_cast %657 : vector<1x8x8xf32> to vector<8x8xf32>
    %659 = vector.extract_strided_slice %654 {offsets = [0, 0], sizes = [8, 16], strides = [1, 1]} : vector<8x32xf32> to vector<8x16xf32>
    %660 = vector.extract_strided_slice %655 {offsets = [0, 0], sizes = [8, 16], strides = [1, 1]} : vector<8x32xf32> to vector<8x16xf32>
    %661 = vector.extract_strided_slice %656 {offsets = [0, 0], sizes = [8, 16], strides = [1, 1]} : vector<8x32xf32> to vector<8x16xf32>
    %cst_282 = arith.constant dense<0.000000e+00> : vector<8x8xf32>
    %662 = tpu.matmul %659, %660, %cst_282 {dimension_numbers = #tpu.dot_dimension_numbers<[1], [1], [0], [0], [0, 0, 1, 0], [], []>} : vector<8x16xf32>, vector<8x16xf32>, vector<8x8xf32> -> vector<8x8xf32>
    %cst_283 = arith.constant 2.500000e-01 : f32
    %663 = vector.broadcast %cst_283 : f32 to vector<8x8xf32>
    %664 = arith.mulf %662, %663 : vector<8x8xf32>
    %665 = arith.addf %664, %658 : vector<8x8xf32>
    %cst_284 = arith.constant dense<0xFF800000> : vector<8xf32>
    %666 = vector.multi_reduction <maximumf>, %665, %cst_284 [1] : vector<8x8xf32> to vector<8xf32>
    %667 = vector.shape_cast %666 : vector<8xf32> to vector<8x1xf32>
    %668 = vector.broadcast %667 : vector<8x1xf32> to vector<8x8xf32>
    %669 = arith.subf %665, %668 : vector<8x8xf32>
    %670 = math.exp %669 : vector<8x8xf32>
    %cst_285 = arith.constant dense<0.000000e+00> : vector<8xf32>
    %671 = vector.multi_reduction <add>, %670, %cst_285 [1] : vector<8x8xf32> to vector<8xf32>
    %672 = vector.shape_cast %671 : vector<8xf32> to vector<8x1xf32>
    %673 = vector.broadcast %672 : vector<8x1xf32> to vector<8x8xf32>
    %674 = arith.divf %670, %673 : vector<8x8xf32>
    %cst_286 = arith.constant dense<0.000000e+00> : vector<8x16xf32>
    %675 = tpu.matmul %674, %661, %cst_286 {dimension_numbers = #tpu.dot_dimension_numbers<[1], [0], [0], [1], [0, 0, 1, 1], [], []>} : vector<8x8xf32>, vector<8x16xf32>, vector<8x16xf32> -> vector<8x16xf32>
    %676 = vector.extract_strided_slice %654 {offsets = [0, 16], sizes = [8, 16], strides = [1, 1]} : vector<8x32xf32> to vector<8x16xf32>
    %677 = vector.extract_strided_slice %655 {offsets = [0, 16], sizes = [8, 16], strides = [1, 1]} : vector<8x32xf32> to vector<8x16xf32>
    %678 = vector.extract_strided_slice %656 {offsets = [0, 16], sizes = [8, 16], strides = [1, 1]} : vector<8x32xf32> to vector<8x16xf32>
    %cst_287 = arith.constant dense<0.000000e+00> : vector<8x8xf32>
    %679 = tpu.matmul %676, %677, %cst_287 {dimension_numbers = #tpu.dot_dimension_numbers<[1], [1], [0], [0], [0, 0, 1, 0], [], []>} : vector<8x16xf32>, vector<8x16xf32>, vector<8x8xf32> -> vector<8x8xf32>
    %cst_288 = arith.constant 2.500000e-01 : f32
    %680 = vector.broadcast %cst_288 : f32 to vector<8x8xf32>
    %681 = arith.mulf %679, %680 : vector<8x8xf32>
    %682 = arith.addf %681, %658 : vector<8x8xf32>
    %cst_289 = arith.constant dense<0xFF800000> : vector<8xf32>
    %683 = vector.multi_reduction <maximumf>, %682, %cst_289 [1] : vector<8x8xf32> to vector<8xf32>
    %684 = vector.shape_cast %683 : vector<8xf32> to vector<8x1xf32>
    %685 = vector.broadcast %684 : vector<8x1xf32> to vector<8x8xf32>
    %686 = arith.subf %682, %685 : vector<8x8xf32>
    %687 = math.exp %686 : vector<8x8xf32>
    %cst_290 = arith.constant dense<0.000000e+00> : vector<8xf32>
    %688 = vector.multi_reduction <add>, %687, %cst_290 [1] : vector<8x8xf32> to vector<8xf32>
    %689 = vector.shape_cast %688 : vector<8xf32> to vector<8x1xf32>
    %690 = vector.broadcast %689 : vector<8x1xf32> to vector<8x8xf32>
    %691 = arith.divf %687, %690 : vector<8x8xf32>
    %cst_291 = arith.constant dense<0.000000e+00> : vector<8x16xf32>
    %692 = tpu.matmul %691, %678, %cst_291 {dimension_numbers = #tpu.dot_dimension_numbers<[1], [0], [0], [1], [0, 0, 1, 1], [], []>} : vector<8x8xf32>, vector<8x16xf32>, vector<8x16xf32> -> vector<8x16xf32>
    %693 = tpu.concatenate %675, %692 in 1 : vector<8x16xf32>, vector<8x16xf32> -> vector<8x32xf32>
    %694 = vector.extract_strided_slice %651 {offsets = [8, 0], sizes = [8, 32], strides = [1, 1]} : vector<16x32xf32> to vector<8x32xf32>
    %695 = vector.extract_strided_slice %652 {offsets = [8, 0], sizes = [8, 32], strides = [1, 1]} : vector<16x32xf32> to vector<8x32xf32>
    %696 = vector.extract_strided_slice %653 {offsets = [8, 0], sizes = [8, 32], strides = [1, 1]} : vector<16x32xf32> to vector<8x32xf32>
    %697 = vector.extract_strided_slice %1 {offsets = [1, 0, 0], sizes = [1, 8, 8], strides = [1, 1, 1]} : vector<2x8x8xf32> to vector<1x8x8xf32>
    %698 = vector.shape_cast %697 : vector<1x8x8xf32> to vector<8x8xf32>
    %699 = vector.extract_strided_slice %694 {offsets = [0, 0], sizes = [8, 16], strides = [1, 1]} : vector<8x32xf32> to vector<8x16xf32>
    %700 = vector.extract_strided_slice %695 {offsets = [0, 0], sizes = [8, 16], strides = [1, 1]} : vector<8x32xf32> to vector<8x16xf32>
    %701 = vector.extract_strided_slice %696 {offsets = [0, 0], sizes = [8, 16], strides = [1, 1]} : vector<8x32xf32> to vector<8x16xf32>
    %cst_292 = arith.constant dense<0.000000e+00> : vector<8x8xf32>
    %702 = tpu.matmul %699, %700, %cst_292 {dimension_numbers = #tpu.dot_dimension_numbers<[1], [1], [0], [0], [0, 0, 1, 0], [], []>} : vector<8x16xf32>, vector<8x16xf32>, vector<8x8xf32> -> vector<8x8xf32>
    %cst_293 = arith.constant 2.500000e-01 : f32
    %703 = vector.broadcast %cst_293 : f32 to vector<8x8xf32>
    %704 = arith.mulf %702, %703 : vector<8x8xf32>
    %705 = arith.addf %704, %698 : vector<8x8xf32>
    %cst_294 = arith.constant dense<0xFF800000> : vector<8xf32>
    %706 = vector.multi_reduction <maximumf>, %705, %cst_294 [1] : vector<8x8xf32> to vector<8xf32>
    %707 = vector.shape_cast %706 : vector<8xf32> to vector<8x1xf32>
    %708 = vector.broadcast %707 : vector<8x1xf32> to vector<8x8xf32>
    %709 = arith.subf %705, %708 : vector<8x8xf32>
    %710 = math.exp %709 : vector<8x8xf32>
    %cst_295 = arith.constant dense<0.000000e+00> : vector<8xf32>
    %711 = vector.multi_reduction <add>, %710, %cst_295 [1] : vector<8x8xf32> to vector<8xf32>
    %712 = vector.shape_cast %711 : vector<8xf32> to vector<8x1xf32>
    %713 = vector.broadcast %712 : vector<8x1xf32> to vector<8x8xf32>
    %714 = arith.divf %710, %713 : vector<8x8xf32>
    %cst_296 = arith.constant dense<0.000000e+00> : vector<8x16xf32>
    %715 = tpu.matmul %714, %701, %cst_296 {dimension_numbers = #tpu.dot_dimension_numbers<[1], [0], [0], [1], [0, 0, 1, 1], [], []>} : vector<8x8xf32>, vector<8x16xf32>, vector<8x16xf32> -> vector<8x16xf32>
    %716 = vector.extract_strided_slice %694 {offsets = [0, 16], sizes = [8, 16], strides = [1, 1]} : vector<8x32xf32> to vector<8x16xf32>
    %717 = vector.extract_strided_slice %695 {offsets = [0, 16], sizes = [8, 16], strides = [1, 1]} : vector<8x32xf32> to vector<8x16xf32>
    %718 = vector.extract_strided_slice %696 {offsets = [0, 16], sizes = [8, 16], strides = [1, 1]} : vector<8x32xf32> to vector<8x16xf32>
    %cst_297 = arith.constant dense<0.000000e+00> : vector<8x8xf32>
    %719 = tpu.matmul %716, %717, %cst_297 {dimension_numbers = #tpu.dot_dimension_numbers<[1], [1], [0], [0], [0, 0, 1, 0], [], []>} : vector<8x16xf32>, vector<8x16xf32>, vector<8x8xf32> -> vector<8x8xf32>
    %cst_298 = arith.constant 2.500000e-01 : f32
    %720 = vector.broadcast %cst_298 : f32 to vector<8x8xf32>
    %721 = arith.mulf %719, %720 : vector<8x8xf32>
    %722 = arith.addf %721, %698 : vector<8x8xf32>
    %cst_299 = arith.constant dense<0xFF800000> : vector<8xf32>
    %723 = vector.multi_reduction <maximumf>, %722, %cst_299 [1] : vector<8x8xf32> to vector<8xf32>
    %724 = vector.shape_cast %723 : vector<8xf32> to vector<8x1xf32>
    %725 = vector.broadcast %724 : vector<8x1xf32> to vector<8x8xf32>
    %726 = arith.subf %722, %725 : vector<8x8xf32>
    %727 = math.exp %726 : vector<8x8xf32>
    %cst_300 = arith.constant dense<0.000000e+00> : vector<8xf32>
    %728 = vector.multi_reduction <add>, %727, %cst_300 [1] : vector<8x8xf32> to vector<8xf32>
    %729 = vector.shape_cast %728 : vector<8xf32> to vector<8x1xf32>
    %730 = vector.broadcast %729 : vector<8x1xf32> to vector<8x8xf32>
    %731 = arith.divf %727, %730 : vector<8x8xf32>
    %cst_301 = arith.constant dense<0.000000e+00> : vector<8x16xf32>
    %732 = tpu.matmul %731, %718, %cst_301 {dimension_numbers = #tpu.dot_dimension_numbers<[1], [0], [0], [1], [0, 0, 1, 1], [], []>} : vector<8x8xf32>, vector<8x16xf32>, vector<8x16xf32> -> vector<8x16xf32>
    %733 = tpu.concatenate %715, %732 in 1 : vector<8x16xf32>, vector<8x16xf32> -> vector<8x32xf32>
    %734 = tpu.concatenate %693, %733 in 0 : vector<8x32xf32>, vector<8x32xf32> -> vector<16x32xf32>
    %cst_302 = arith.constant dense<0.000000e+00> : vector<16x32xf32>
    %735 = tpu.matmul %734, %645, %cst_302 {dimension_numbers = #tpu.dot_dimension_numbers<[1], [0], [0], [1], [0, 0, 1, 1], [], []>} : vector<16x32xf32>, vector<32x32xf32>, vector<16x32xf32> -> vector<16x32xf32>
    %736 = vector.broadcast %647 : vector<1x32xf32> to vector<16x32xf32>
    %737 = arith.addf %735, %736 : vector<16x32xf32>
    %738 = arith.addf %737, %639 : vector<16x32xf32>
    %c1_303 = arith.constant 1 : index
    %c0_304 = arith.constant 0 : index
    %c0_305 = arith.constant 0 : index
    %739 = vector.load %arg21[%c1_303, %c0_304, %c0_305] : memref<2x1x32xf32, #tpu.memory_space<vmem>>, vector<1x1x32xf32>
    %740 = vector.shape_cast %739 : vector<1x1x32xf32> to vector<1x32xf32>
    %c1_306 = arith.constant 1 : index
    %c0_307 = arith.constant 0 : index
    %c0_308 = arith.constant 0 : index
    %741 = vector.load %arg22[%c1_306, %c0_307, %c0_308] : memref<2x1x32xf32, #tpu.memory_space<vmem>>, vector<1x1x32xf32>
    %742 = vector.shape_cast %741 : vector<1x1x32xf32> to vector<1x32xf32>
    %cst_309 = arith.constant dense<0.000000e+00> : vector<16xf32>
    %743 = vector.multi_reduction <add>, %738, %cst_309 [1] : vector<16x32xf32> to vector<16xf32>
    %744 = vector.shape_cast %743 : vector<16xf32> to vector<16x1xf32>
    %cst_310 = arith.constant 3.200000e+01 : f32
    %745 = vector.broadcast %cst_310 : f32 to vector<16x1xf32>
    %746 = arith.divf %744, %745 : vector<16x1xf32>
    %747 = vector.broadcast %746 : vector<16x1xf32> to vector<16x32xf32>
    %748 = arith.subf %738, %747 : vector<16x32xf32>
    %749 = arith.mulf %748, %748 : vector<16x32xf32>
    %cst_311 = arith.constant dense<0.000000e+00> : vector<16xf32>
    %750 = vector.multi_reduction <add>, %749, %cst_311 [1] : vector<16x32xf32> to vector<16xf32>
    %751 = vector.shape_cast %750 : vector<16xf32> to vector<16x1xf32>
    %cst_312 = arith.constant 3.200000e+01 : f32
    %752 = vector.broadcast %cst_312 : f32 to vector<16x1xf32>
    %753 = arith.divf %751, %752 : vector<16x1xf32>
    %754 = vector.broadcast %746 : vector<16x1xf32> to vector<16x32xf32>
    %755 = arith.subf %738, %754 : vector<16x32xf32>
    %cst_313 = arith.constant 9.99999974E-6 : f32
    %756 = vector.broadcast %cst_313 : f32 to vector<16x1xf32>
    %757 = arith.addf %753, %756 : vector<16x1xf32>
    %758 = math.rsqrt %757 : vector<16x1xf32>
    %759 = vector.broadcast %758 : vector<16x1xf32> to vector<16x32xf32>
    %760 = arith.mulf %755, %759 : vector<16x32xf32>
    %761 = vector.broadcast %740 : vector<1x32xf32> to vector<16x32xf32>
    %762 = arith.mulf %760, %761 : vector<16x32xf32>
    %763 = vector.broadcast %742 : vector<1x32xf32> to vector<16x32xf32>
    %764 = arith.addf %762, %763 : vector<16x32xf32>
    %c1_314 = arith.constant 1 : index
    %c0_315 = arith.constant 0 : index
    %c0_316 = arith.constant 0 : index
    %765 = vector.load %arg23[%c1_314, %c0_315, %c0_316] : memref<2x32x96xf32, #tpu.memory_space<vmem>>, vector<1x32x96xf32>
    %766 = vector.shape_cast %765 : vector<1x32x96xf32> to vector<32x96xf32>
    %c1_317 = arith.constant 1 : index
    %c0_318 = arith.constant 0 : index
    %c0_319 = arith.constant 0 : index
    %767 = vector.load %arg24[%c1_317, %c0_318, %c0_319] : memref<2x1x96xf32, #tpu.memory_space<vmem>>, vector<1x1x96xf32>
    %768 = vector.shape_cast %767 : vector<1x1x96xf32> to vector<1x96xf32>
    %c1_320 = arith.constant 1 : index
    %c0_321 = arith.constant 0 : index
    %c0_322 = arith.constant 0 : index
    %769 = vector.load %arg25[%c1_320, %c0_321, %c0_322] : memref<2x32x32xf32, #tpu.memory_space<vmem>>, vector<1x32x32xf32>
    %770 = vector.shape_cast %769 : vector<1x32x32xf32> to vector<32x32xf32>
    %c1_323 = arith.constant 1 : index
    %c0_324 = arith.constant 0 : index
    %c0_325 = arith.constant 0 : index
    %771 = vector.load %arg26[%c1_323, %c0_324, %c0_325] : memref<2x1x32xf32, #tpu.memory_space<vmem>>, vector<1x1x32xf32>
    %772 = vector.shape_cast %771 : vector<1x1x32xf32> to vector<1x32xf32>
    %773 = vector.extract_strided_slice %766 {offsets = [0, 0], sizes = [32, 32], strides = [1, 1]} : vector<32x96xf32> to vector<32x32xf32>
    %cst_326 = arith.constant dense<0.000000e+00> : vector<16x32xf32>
    %774 = tpu.matmul %764, %773, %cst_326 {dimension_numbers = #tpu.dot_dimension_numbers<[1], [0], [0], [1], [0, 0, 1, 1], [], []>} : vector<16x32xf32>, vector<32x32xf32>, vector<16x32xf32> -> vector<16x32xf32>
    %775 = vector.extract_strided_slice %768 {offsets = [0, 0], sizes = [1, 32], strides = [1, 1]} : vector<1x96xf32> to vector<1x32xf32>
    %776 = vector.broadcast %775 : vector<1x32xf32> to vector<16x32xf32>
    %777 = arith.addf %774, %776 : vector<16x32xf32>
    %778 = vector.extract_strided_slice %766 {offsets = [0, 32], sizes = [32, 64], strides = [1, 1]} : vector<32x96xf32> to vector<32x64xf32>
    %cst_327 = arith.constant dense<0.000000e+00> : vector<16x64xf32>
    %779 = tpu.matmul %339, %778, %cst_327 {dimension_numbers = #tpu.dot_dimension_numbers<[1], [0], [0], [1], [0, 0, 1, 1], [], []>} : vector<16x32xf32>, vector<32x64xf32>, vector<16x64xf32> -> vector<16x64xf32>
    %780 = vector.extract_strided_slice %768 {offsets = [0, 32], sizes = [1, 64], strides = [1, 1]} : vector<1x96xf32> to vector<1x64xf32>
    %781 = vector.broadcast %780 : vector<1x64xf32> to vector<16x64xf32>
    %782 = arith.addf %779, %781 : vector<16x64xf32>
    %783 = vector.extract_strided_slice %782 {offsets = [0, 0], sizes = [16, 32], strides = [1, 1]} : vector<16x64xf32> to vector<16x32xf32>
    %784 = vector.extract_strided_slice %782 {offsets = [0, 32], sizes = [16, 32], strides = [1, 1]} : vector<16x64xf32> to vector<16x32xf32>
    %785 = vector.extract_strided_slice %777 {offsets = [0, 0], sizes = [8, 32], strides = [1, 1]} : vector<16x32xf32> to vector<8x32xf32>
    %786 = vector.extract_strided_slice %783 {offsets = [0, 0], sizes = [8, 32], strides = [1, 1]} : vector<16x32xf32> to vector<8x32xf32>
    %787 = vector.extract_strided_slice %784 {offsets = [0, 0], sizes = [8, 32], strides = [1, 1]} : vector<16x32xf32> to vector<8x32xf32>
    %788 = vector.extract_strided_slice %2 {offsets = [0, 0, 0], sizes = [1, 8, 8], strides = [1, 1, 1]} : vector<2x8x8xf32> to vector<1x8x8xf32>
    %789 = vector.shape_cast %788 : vector<1x8x8xf32> to vector<8x8xf32>
    %790 = vector.extract_strided_slice %785 {offsets = [0, 0], sizes = [8, 16], strides = [1, 1]} : vector<8x32xf32> to vector<8x16xf32>
    %791 = vector.extract_strided_slice %786 {offsets = [0, 0], sizes = [8, 16], strides = [1, 1]} : vector<8x32xf32> to vector<8x16xf32>
    %792 = vector.extract_strided_slice %787 {offsets = [0, 0], sizes = [8, 16], strides = [1, 1]} : vector<8x32xf32> to vector<8x16xf32>
    %cst_328 = arith.constant dense<0.000000e+00> : vector<8x8xf32>
    %793 = tpu.matmul %790, %791, %cst_328 {dimension_numbers = #tpu.dot_dimension_numbers<[1], [1], [0], [0], [0, 0, 1, 0], [], []>} : vector<8x16xf32>, vector<8x16xf32>, vector<8x8xf32> -> vector<8x8xf32>
    %cst_329 = arith.constant 2.500000e-01 : f32
    %794 = vector.broadcast %cst_329 : f32 to vector<8x8xf32>
    %795 = arith.mulf %793, %794 : vector<8x8xf32>
    %796 = arith.addf %795, %789 : vector<8x8xf32>
    %cst_330 = arith.constant dense<0xFF800000> : vector<8xf32>
    %797 = vector.multi_reduction <maximumf>, %796, %cst_330 [1] : vector<8x8xf32> to vector<8xf32>
    %798 = vector.shape_cast %797 : vector<8xf32> to vector<8x1xf32>
    %799 = vector.broadcast %798 : vector<8x1xf32> to vector<8x8xf32>
    %800 = arith.subf %796, %799 : vector<8x8xf32>
    %801 = math.exp %800 : vector<8x8xf32>
    %cst_331 = arith.constant dense<0.000000e+00> : vector<8xf32>
    %802 = vector.multi_reduction <add>, %801, %cst_331 [1] : vector<8x8xf32> to vector<8xf32>
    %803 = vector.shape_cast %802 : vector<8xf32> to vector<8x1xf32>
    %804 = vector.broadcast %803 : vector<8x1xf32> to vector<8x8xf32>
    %805 = arith.divf %801, %804 : vector<8x8xf32>
    %cst_332 = arith.constant dense<0.000000e+00> : vector<8x16xf32>
    %806 = tpu.matmul %805, %792, %cst_332 {dimension_numbers = #tpu.dot_dimension_numbers<[1], [0], [0], [1], [0, 0, 1, 1], [], []>} : vector<8x8xf32>, vector<8x16xf32>, vector<8x16xf32> -> vector<8x16xf32>
    %807 = vector.extract_strided_slice %785 {offsets = [0, 16], sizes = [8, 16], strides = [1, 1]} : vector<8x32xf32> to vector<8x16xf32>
    %808 = vector.extract_strided_slice %786 {offsets = [0, 16], sizes = [8, 16], strides = [1, 1]} : vector<8x32xf32> to vector<8x16xf32>
    %809 = vector.extract_strided_slice %787 {offsets = [0, 16], sizes = [8, 16], strides = [1, 1]} : vector<8x32xf32> to vector<8x16xf32>
    %cst_333 = arith.constant dense<0.000000e+00> : vector<8x8xf32>
    %810 = tpu.matmul %807, %808, %cst_333 {dimension_numbers = #tpu.dot_dimension_numbers<[1], [1], [0], [0], [0, 0, 1, 0], [], []>} : vector<8x16xf32>, vector<8x16xf32>, vector<8x8xf32> -> vector<8x8xf32>
    %cst_334 = arith.constant 2.500000e-01 : f32
    %811 = vector.broadcast %cst_334 : f32 to vector<8x8xf32>
    %812 = arith.mulf %810, %811 : vector<8x8xf32>
    %813 = arith.addf %812, %789 : vector<8x8xf32>
    %cst_335 = arith.constant dense<0xFF800000> : vector<8xf32>
    %814 = vector.multi_reduction <maximumf>, %813, %cst_335 [1] : vector<8x8xf32> to vector<8xf32>
    %815 = vector.shape_cast %814 : vector<8xf32> to vector<8x1xf32>
    %816 = vector.broadcast %815 : vector<8x1xf32> to vector<8x8xf32>
    %817 = arith.subf %813, %816 : vector<8x8xf32>
    %818 = math.exp %817 : vector<8x8xf32>
    %cst_336 = arith.constant dense<0.000000e+00> : vector<8xf32>
    %819 = vector.multi_reduction <add>, %818, %cst_336 [1] : vector<8x8xf32> to vector<8xf32>
    %820 = vector.shape_cast %819 : vector<8xf32> to vector<8x1xf32>
    %821 = vector.broadcast %820 : vector<8x1xf32> to vector<8x8xf32>
    %822 = arith.divf %818, %821 : vector<8x8xf32>
    %cst_337 = arith.constant dense<0.000000e+00> : vector<8x16xf32>
    %823 = tpu.matmul %822, %809, %cst_337 {dimension_numbers = #tpu.dot_dimension_numbers<[1], [0], [0], [1], [0, 0, 1, 1], [], []>} : vector<8x8xf32>, vector<8x16xf32>, vector<8x16xf32> -> vector<8x16xf32>
    %824 = tpu.concatenate %806, %823 in 1 : vector<8x16xf32>, vector<8x16xf32> -> vector<8x32xf32>
    %825 = vector.extract_strided_slice %777 {offsets = [8, 0], sizes = [8, 32], strides = [1, 1]} : vector<16x32xf32> to vector<8x32xf32>
    %826 = vector.extract_strided_slice %783 {offsets = [8, 0], sizes = [8, 32], strides = [1, 1]} : vector<16x32xf32> to vector<8x32xf32>
    %827 = vector.extract_strided_slice %784 {offsets = [8, 0], sizes = [8, 32], strides = [1, 1]} : vector<16x32xf32> to vector<8x32xf32>
    %828 = vector.extract_strided_slice %2 {offsets = [1, 0, 0], sizes = [1, 8, 8], strides = [1, 1, 1]} : vector<2x8x8xf32> to vector<1x8x8xf32>
    %829 = vector.shape_cast %828 : vector<1x8x8xf32> to vector<8x8xf32>
    %830 = vector.extract_strided_slice %825 {offsets = [0, 0], sizes = [8, 16], strides = [1, 1]} : vector<8x32xf32> to vector<8x16xf32>
    %831 = vector.extract_strided_slice %826 {offsets = [0, 0], sizes = [8, 16], strides = [1, 1]} : vector<8x32xf32> to vector<8x16xf32>
    %832 = vector.extract_strided_slice %827 {offsets = [0, 0], sizes = [8, 16], strides = [1, 1]} : vector<8x32xf32> to vector<8x16xf32>
    %cst_338 = arith.constant dense<0.000000e+00> : vector<8x8xf32>
    %833 = tpu.matmul %830, %831, %cst_338 {dimension_numbers = #tpu.dot_dimension_numbers<[1], [1], [0], [0], [0, 0, 1, 0], [], []>} : vector<8x16xf32>, vector<8x16xf32>, vector<8x8xf32> -> vector<8x8xf32>
    %cst_339 = arith.constant 2.500000e-01 : f32
    %834 = vector.broadcast %cst_339 : f32 to vector<8x8xf32>
    %835 = arith.mulf %833, %834 : vector<8x8xf32>
    %836 = arith.addf %835, %829 : vector<8x8xf32>
    %cst_340 = arith.constant dense<0xFF800000> : vector<8xf32>
    %837 = vector.multi_reduction <maximumf>, %836, %cst_340 [1] : vector<8x8xf32> to vector<8xf32>
    %838 = vector.shape_cast %837 : vector<8xf32> to vector<8x1xf32>
    %839 = vector.broadcast %838 : vector<8x1xf32> to vector<8x8xf32>
    %840 = arith.subf %836, %839 : vector<8x8xf32>
    %841 = math.exp %840 : vector<8x8xf32>
    %cst_341 = arith.constant dense<0.000000e+00> : vector<8xf32>
    %842 = vector.multi_reduction <add>, %841, %cst_341 [1] : vector<8x8xf32> to vector<8xf32>
    %843 = vector.shape_cast %842 : vector<8xf32> to vector<8x1xf32>
    %844 = vector.broadcast %843 : vector<8x1xf32> to vector<8x8xf32>
    %845 = arith.divf %841, %844 : vector<8x8xf32>
    %cst_342 = arith.constant dense<0.000000e+00> : vector<8x16xf32>
    %846 = tpu.matmul %845, %832, %cst_342 {dimension_numbers = #tpu.dot_dimension_numbers<[1], [0], [0], [1], [0, 0, 1, 1], [], []>} : vector<8x8xf32>, vector<8x16xf32>, vector<8x16xf32> -> vector<8x16xf32>
    %847 = vector.extract_strided_slice %825 {offsets = [0, 16], sizes = [8, 16], strides = [1, 1]} : vector<8x32xf32> to vector<8x16xf32>
    %848 = vector.extract_strided_slice %826 {offsets = [0, 16], sizes = [8, 16], strides = [1, 1]} : vector<8x32xf32> to vector<8x16xf32>
    %849 = vector.extract_strided_slice %827 {offsets = [0, 16], sizes = [8, 16], strides = [1, 1]} : vector<8x32xf32> to vector<8x16xf32>
    %cst_343 = arith.constant dense<0.000000e+00> : vector<8x8xf32>
    %850 = tpu.matmul %847, %848, %cst_343 {dimension_numbers = #tpu.dot_dimension_numbers<[1], [1], [0], [0], [0, 0, 1, 0], [], []>} : vector<8x16xf32>, vector<8x16xf32>, vector<8x8xf32> -> vector<8x8xf32>
    %cst_344 = arith.constant 2.500000e-01 : f32
    %851 = vector.broadcast %cst_344 : f32 to vector<8x8xf32>
    %852 = arith.mulf %850, %851 : vector<8x8xf32>
    %853 = arith.addf %852, %829 : vector<8x8xf32>
    %cst_345 = arith.constant dense<0xFF800000> : vector<8xf32>
    %854 = vector.multi_reduction <maximumf>, %853, %cst_345 [1] : vector<8x8xf32> to vector<8xf32>
    %855 = vector.shape_cast %854 : vector<8xf32> to vector<8x1xf32>
    %856 = vector.broadcast %855 : vector<8x1xf32> to vector<8x8xf32>
    %857 = arith.subf %853, %856 : vector<8x8xf32>
    %858 = math.exp %857 : vector<8x8xf32>
    %cst_346 = arith.constant dense<0.000000e+00> : vector<8xf32>
    %859 = vector.multi_reduction <add>, %858, %cst_346 [1] : vector<8x8xf32> to vector<8xf32>
    %860 = vector.shape_cast %859 : vector<8xf32> to vector<8x1xf32>
    %861 = vector.broadcast %860 : vector<8x1xf32> to vector<8x8xf32>
    %862 = arith.divf %858, %861 : vector<8x8xf32>
    %cst_347 = arith.constant dense<0.000000e+00> : vector<8x16xf32>
    %863 = tpu.matmul %862, %849, %cst_347 {dimension_numbers = #tpu.dot_dimension_numbers<[1], [0], [0], [1], [0, 0, 1, 1], [], []>} : vector<8x8xf32>, vector<8x16xf32>, vector<8x16xf32> -> vector<8x16xf32>
    %864 = tpu.concatenate %846, %863 in 1 : vector<8x16xf32>, vector<8x16xf32> -> vector<8x32xf32>
    %865 = tpu.concatenate %824, %864 in 0 : vector<8x32xf32>, vector<8x32xf32> -> vector<16x32xf32>
    %cst_348 = arith.constant dense<0.000000e+00> : vector<16x32xf32>
    %866 = tpu.matmul %865, %770, %cst_348 {dimension_numbers = #tpu.dot_dimension_numbers<[1], [0], [0], [1], [0, 0, 1, 1], [], []>} : vector<16x32xf32>, vector<32x32xf32>, vector<16x32xf32> -> vector<16x32xf32>
    %867 = vector.broadcast %772 : vector<1x32xf32> to vector<16x32xf32>
    %868 = arith.addf %866, %867 : vector<16x32xf32>
    %869 = arith.addf %868, %764 : vector<16x32xf32>
    %c1_349 = arith.constant 1 : index
    %c0_350 = arith.constant 0 : index
    %c0_351 = arith.constant 0 : index
    %870 = vector.load %arg27[%c1_349, %c0_350, %c0_351] : memref<2x1x32xf32, #tpu.memory_space<vmem>>, vector<1x1x32xf32>
    %871 = vector.shape_cast %870 : vector<1x1x32xf32> to vector<1x32xf32>
    %c1_352 = arith.constant 1 : index
    %c0_353 = arith.constant 0 : index
    %c0_354 = arith.constant 0 : index
    %872 = vector.load %arg28[%c1_352, %c0_353, %c0_354] : memref<2x1x32xf32, #tpu.memory_space<vmem>>, vector<1x1x32xf32>
    %873 = vector.shape_cast %872 : vector<1x1x32xf32> to vector<1x32xf32>
    %cst_355 = arith.constant dense<0.000000e+00> : vector<16xf32>
    %874 = vector.multi_reduction <add>, %869, %cst_355 [1] : vector<16x32xf32> to vector<16xf32>
    %875 = vector.shape_cast %874 : vector<16xf32> to vector<16x1xf32>
    %cst_356 = arith.constant 3.200000e+01 : f32
    %876 = vector.broadcast %cst_356 : f32 to vector<16x1xf32>
    %877 = arith.divf %875, %876 : vector<16x1xf32>
    %878 = vector.broadcast %877 : vector<16x1xf32> to vector<16x32xf32>
    %879 = arith.subf %869, %878 : vector<16x32xf32>
    %880 = arith.mulf %879, %879 : vector<16x32xf32>
    %cst_357 = arith.constant dense<0.000000e+00> : vector<16xf32>
    %881 = vector.multi_reduction <add>, %880, %cst_357 [1] : vector<16x32xf32> to vector<16xf32>
    %882 = vector.shape_cast %881 : vector<16xf32> to vector<16x1xf32>
    %cst_358 = arith.constant 3.200000e+01 : f32
    %883 = vector.broadcast %cst_358 : f32 to vector<16x1xf32>
    %884 = arith.divf %882, %883 : vector<16x1xf32>
    %885 = vector.broadcast %877 : vector<16x1xf32> to vector<16x32xf32>
    %886 = arith.subf %869, %885 : vector<16x32xf32>
    %cst_359 = arith.constant 9.99999974E-6 : f32
    %887 = vector.broadcast %cst_359 : f32 to vector<16x1xf32>
    %888 = arith.addf %884, %887 : vector<16x1xf32>
    %889 = math.rsqrt %888 : vector<16x1xf32>
    %890 = vector.broadcast %889 : vector<16x1xf32> to vector<16x32xf32>
    %891 = arith.mulf %886, %890 : vector<16x32xf32>
    %892 = vector.broadcast %871 : vector<1x32xf32> to vector<16x32xf32>
    %893 = arith.mulf %891, %892 : vector<16x32xf32>
    %894 = vector.broadcast %873 : vector<1x32xf32> to vector<16x32xf32>
    %895 = arith.addf %893, %894 : vector<16x32xf32>
    %c1_360 = arith.constant 1 : index
    %c0_361 = arith.constant 0 : index
    %c0_362 = arith.constant 0 : index
    %896 = vector.load %arg29[%c1_360, %c0_361, %c0_362] : memref<2x32x64xf32, #tpu.memory_space<vmem>>, vector<1x32x64xf32>
    %897 = vector.shape_cast %896 : vector<1x32x64xf32> to vector<32x64xf32>
    %c1_363 = arith.constant 1 : index
    %c0_364 = arith.constant 0 : index
    %c0_365 = arith.constant 0 : index
    %898 = vector.load %arg30[%c1_363, %c0_364, %c0_365] : memref<2x1x64xf32, #tpu.memory_space<vmem>>, vector<1x1x64xf32>
    %899 = vector.shape_cast %898 : vector<1x1x64xf32> to vector<1x64xf32>
    %c1_366 = arith.constant 1 : index
    %c0_367 = arith.constant 0 : index
    %c0_368 = arith.constant 0 : index
    %900 = vector.load %arg31[%c1_366, %c0_367, %c0_368] : memref<2x64x32xf32, #tpu.memory_space<vmem>>, vector<1x64x32xf32>
    %901 = vector.shape_cast %900 : vector<1x64x32xf32> to vector<64x32xf32>
    %c1_369 = arith.constant 1 : index
    %c0_370 = arith.constant 0 : index
    %c0_371 = arith.constant 0 : index
    %902 = vector.load %arg32[%c1_369, %c0_370, %c0_371] : memref<2x1x32xf32, #tpu.memory_space<vmem>>, vector<1x1x32xf32>
    %903 = vector.shape_cast %902 : vector<1x1x32xf32> to vector<1x32xf32>
    %cst_372 = arith.constant dense<0.000000e+00> : vector<16x64xf32>
    %904 = tpu.matmul %895, %897, %cst_372 {dimension_numbers = #tpu.dot_dimension_numbers<[1], [0], [0], [1], [0, 0, 1, 1], [], []>} : vector<16x32xf32>, vector<32x64xf32>, vector<16x64xf32> -> vector<16x64xf32>
    %905 = vector.broadcast %899 : vector<1x64xf32> to vector<16x64xf32>
    %906 = arith.addf %904, %905 : vector<16x64xf32>
    %cst_373 = arith.constant 0.000000e+00 : f32
    %907 = vector.broadcast %cst_373 : f32 to vector<16x64xf32>
    %908 = arith.maximumf %906, %907 : vector<16x64xf32>
    %cst_374 = arith.constant dense<0.000000e+00> : vector<16x32xf32>
    %909 = tpu.matmul %908, %901, %cst_374 {dimension_numbers = #tpu.dot_dimension_numbers<[1], [0], [0], [1], [0, 0, 1, 1], [], []>} : vector<16x64xf32>, vector<64x32xf32>, vector<16x32xf32> -> vector<16x32xf32>
    %910 = vector.broadcast %903 : vector<1x32xf32> to vector<16x32xf32>
    %911 = arith.addf %909, %910 : vector<16x32xf32>
    %912 = arith.addf %911, %895 : vector<16x32xf32>
    %c1_375 = arith.constant 1 : index
    %c0_376 = arith.constant 0 : index
    %c0_377 = arith.constant 0 : index
    %913 = vector.load %arg33[%c1_375, %c0_376, %c0_377] : memref<2x1x32xf32, #tpu.memory_space<vmem>>, vector<1x1x32xf32>
    %914 = vector.shape_cast %913 : vector<1x1x32xf32> to vector<1x32xf32>
    %c1_378 = arith.constant 1 : index
    %c0_379 = arith.constant 0 : index
    %c0_380 = arith.constant 0 : index
    %915 = vector.load %arg34[%c1_378, %c0_379, %c0_380] : memref<2x1x32xf32, #tpu.memory_space<vmem>>, vector<1x1x32xf32>
    %916 = vector.shape_cast %915 : vector<1x1x32xf32> to vector<1x32xf32>
    %cst_381 = arith.constant dense<0.000000e+00> : vector<16xf32>
    %917 = vector.multi_reduction <add>, %912, %cst_381 [1] : vector<16x32xf32> to vector<16xf32>
    %918 = vector.shape_cast %917 : vector<16xf32> to vector<16x1xf32>
    %cst_382 = arith.constant 3.200000e+01 : f32
    %919 = vector.broadcast %cst_382 : f32 to vector<16x1xf32>
    %920 = arith.divf %918, %919 : vector<16x1xf32>
    %921 = vector.broadcast %920 : vector<16x1xf32> to vector<16x32xf32>
    %922 = arith.subf %912, %921 : vector<16x32xf32>
    %923 = arith.mulf %922, %922 : vector<16x32xf32>
    %cst_383 = arith.constant dense<0.000000e+00> : vector<16xf32>
    %924 = vector.multi_reduction <add>, %923, %cst_383 [1] : vector<16x32xf32> to vector<16xf32>
    %925 = vector.shape_cast %924 : vector<16xf32> to vector<16x1xf32>
    %cst_384 = arith.constant 3.200000e+01 : f32
    %926 = vector.broadcast %cst_384 : f32 to vector<16x1xf32>
    %927 = arith.divf %925, %926 : vector<16x1xf32>
    %928 = vector.broadcast %920 : vector<16x1xf32> to vector<16x32xf32>
    %929 = arith.subf %912, %928 : vector<16x32xf32>
    %cst_385 = arith.constant 9.99999974E-6 : f32
    %930 = vector.broadcast %cst_385 : f32 to vector<16x1xf32>
    %931 = arith.addf %927, %930 : vector<16x1xf32>
    %932 = math.rsqrt %931 : vector<16x1xf32>
    %933 = vector.broadcast %932 : vector<16x1xf32> to vector<16x32xf32>
    %934 = arith.mulf %929, %933 : vector<16x32xf32>
    %935 = vector.broadcast %914 : vector<1x32xf32> to vector<16x32xf32>
    %936 = arith.mulf %934, %935 : vector<16x32xf32>
    %937 = vector.broadcast %916 : vector<1x32xf32> to vector<16x32xf32>
    %938 = arith.addf %936, %937 : vector<16x32xf32>
    %c0_386 = arith.constant 0 : index
    %c0_387 = arith.constant 0 : index
    %939 = vector.load %arg38[%c0_386, %c0_387] : memref<16x32xf32, #tpu.memory_space<vmem>>, vector<16x32xf32>
    tpu.vector_store %arg38[%c0_386, %c0_387], %938 {strides = array<i32>} : memref<16x32xf32, #tpu.memory_space<vmem>>, vector<16x32xf32>,
    %c0_388 = arith.constant 0 : index
    %c0_389 = arith.constant 0 : index
    %940 = vector.load %arg35[%c0_388, %c0_389] : memref<32x32xf32, #tpu.memory_space<vmem>>, vector<32x32xf32>
    %cst_390 = arith.constant dense<0.000000e+00> : vector<16x32xf32>
    %941 = tpu.matmul %938, %940, %cst_390 {dimension_numbers = #tpu.dot_dimension_numbers<[1], [0], [0], [1], [0, 0, 1, 1], [], []>} : vector<16x32xf32>, vector<32x32xf32>, vector<16x32xf32> -> vector<16x32xf32>
    %c0_391 = arith.constant 0 : index
    %c0_392 = arith.constant 0 : index
    %942 = vector.load %arg36[%c0_391, %c0_392] : memref<1x32xf32, #tpu.memory_space<vmem>>, vector<1x32xf32>
    %943 = vector.broadcast %942 : vector<1x32xf32> to vector<16x32xf32>
    %944 = arith.addf %941, %943 : vector<16x32xf32>
    %cst_393 = arith.constant dense<0xFF800000> : vector<16xf32>
    %945 = vector.multi_reduction <maximumf>, %944, %cst_393 [1] : vector<16x32xf32> to vector<16xf32>
    %946 = vector.shape_cast %945 : vector<16xf32> to vector<16x1xf32>
    %947 = vector.broadcast %946 : vector<16x1xf32> to vector<16x32xf32>
    %948 = arith.subf %944, %947 : vector<16x32xf32>
    %949 = math.exp %948 : vector<16x32xf32>
    %cst_394 = arith.constant dense<0.000000e+00> : vector<16xf32>
    %950 = vector.multi_reduction <add>, %949, %cst_394 [1] : vector<16x32xf32> to vector<16xf32>
    %951 = vector.shape_cast %950 : vector<16xf32> to vector<16x1xf32>
    %952 = math.log %951 : vector<16x1xf32>
    %953 = vector.broadcast %952 : vector<16x1xf32> to vector<16x32xf32>
    %954 = arith.subf %948, %953 : vector<16x32xf32>
    %c0_395 = arith.constant 0 : index
    %c0_396 = arith.constant 0 : index
    %955 = vector.load %arg37[%c0_395, %c0_396] : memref<16x32xf32, #tpu.memory_space<vmem>>, vector<16x32xf32>
    tpu.vector_store %arg37[%c0_395, %c0_396], %954 {strides = array<i32>} : memref<16x32xf32, #tpu.memory_space<vmem>>, vector<16x32xf32>,
    return
  }
}

</mosaic_0001>

<bundles_post_ra>
// kernel: transformer_forward.1
= control target key start
LH: loop header
LB: loop body
LE: loop exit
PB: predicated region body
PF: predicated region fallthrough
CT: control target
= control target key end

     0   :  { %s8448_s6 = smov 1   ;;  %s8449_s10 = smov 2   ;;  %s9478_s0 = inlined_call_operand.smem [shape: u32[39], index: -1, kind: input, shape index: {}] }
   0x1   :  { %s8506_s5 = sld [smem:[%s9478_s0]]   ;;  %s8450_s14 = smov 3  }
   0x2   :  { %s8511_s9 = sld [smem:[%s9478_s0 + %s8448_s6]]   ;;  %s8451_s18 = smov 4  }
   0x3   :  { %s8516_s13 = sld [smem:[%s9478_s0 + %s8449_s10]]   ;;  %s8452_s22 = smov 5  }
   0x4   :  { %s8521_s17 = sld [smem:[%s9478_s0 + %s8450_s14]]   ;;  %s8453_s26 = smov 6  }
   0x5   :  { %s8526_s21 = sld [smem:[%s9478_s0 + %s8451_s18]]   ;;  %s8454_s30 = smov 7  }
   0x6   :  { %s8531_s25 = sld [smem:[%s9478_s0 + %s8452_s22]]   ;;  %s8455_s4 = smov 8  }
   0x7   :  { %s8536_s29 = sld [smem:[%s9478_s0 + %s8453_s26]]   ;;  %s8456_s10 = smov 9  }
   0x8   :  { %9500 = sst [smem:[#allocation8_spill]] %s8511_s9  ;;  %s8457_s15 = smov 10  }
   0x9   :  { %s8541_s3 = sld [smem:[%s9478_s0 + %s8454_s30]]   ;;  %s8458_s20 = smov 11  }
   0xa   :  { %9501 = sst [smem:[#allocation9_spill]] %s8521_s17  ;;  %s8459_s26 = smov 12  }
   0xb   :  { %9502 = sst [smem:[#allocation10_spill]] %s8526_s21  ;;  %s8460_s1 = smov 13  }
   0xc   :  { %s8546_s8 = sld [smem:[%s9478_s0 + %s8455_s4]]   ;;  %s8461_s7 = smov 14  }
   0xd   :  { %s8551_s14 = sld [smem:[%s9478_s0 + %s8456_s10]]   ;;  %s8463_s22 = smov 16  }
   0xe   :  { %s8556_s19 = sld [smem:[%s9478_s0 + %s8457_s15]]   ;;  %s8462_s15 = smov 15  }
   0xf   :  { %s8561_s24 = sld [smem:[%s9478_s0 + %s8458_s20]]   ;;  %s8464_s28 = smov 17  }
  0x10   :  { %s8566_s30 = sld [smem:[%s9478_s0 + %s8459_s26]]  }
  0x11   :  { %s8571_s6 = sld [smem:[%s9478_s0 + %s8460_s1]]  }
  0x12   :  { %s8576_s12 = sld [smem:[%s9478_s0 + %s8461_s7]]   ;;  %s8465_s7 = smov 18  }
  0x13   :  { %s8581_s20 = sld [smem:[%s9478_s0 + %s8462_s15]]   ;;  %s8466_s15 = smov 19  }
  0x14   :  { %s8586_s27 = sld [smem:[%s9478_s0 + %s8463_s22]]   ;;  %s8467_s22 = smov 20  }
  0x15   :  { %s8591_s4 = sld [smem:[%s9478_s0 + %s8464_s28]]   ;;  %s8468_s28 = smov 21  }
  0x16   :  { %s8596_s21 = sld [smem:[%s9478_s0 + %s8465_s7]]   ;;  %s8469_s7 = smov 22  }
  0x17   :  { %s8601_s17 = sld [smem:[%s9478_s0 + %s8466_s15]]   ;;  %s8470_s15 = smov 23  }
  0x18   :  { %s8606_s9 = sld [smem:[%s9478_s0 + %s8467_s22]]   ;;  %s8471_s22 = smov 24  }
  0x1b   :  { %9503 = sst [smem:[#allocation11_spill]] %s8591_s4 }
  0x1c   :  { %9504 = sst [smem:[#allocation12_spill]] %s8596_s21 }
  0x1d   :  { %9505 = sst [smem:[#allocation13_spill]] %s8601_s17 }
  0x1e   :  { %9506 = sst [smem:[#allocation14_spill]] %s8606_s9 }
  0x1f   :  { %s8611_s4 = sld [smem:[%s9478_s0 + %s8468_s28]]   ;;  %s8472_s28 = smov 25  }
  0x20   :  { %s8616_s21 = sld [smem:[%s9478_s0 + %s8469_s7]]   ;;  %s8473_s7 = smov 26  }
  0x21   :  { %s8621_s17 = sld [smem:[%s9478_s0 + %s8470_s15]]   ;;  %s8474_s15 = smov 27  }
  0x22   :  { %s8626_s9 = sld [smem:[%s9478_s0 + %s8471_s22]]   ;;  %s8475_s22 = smov 28  }
  0x25   :  { %9507 = sst [smem:[#allocation15_spill]] %s8611_s4 }
  0x26   :  { %9508 = sst [smem:[#allocation16_spill]] %s8616_s21 }
  0x27   :  { %9509 = sst [smem:[#allocation17_spill]] %s8621_s17 }
  0x28   :  { %9510 = sst [smem:[#allocation18_spill]] %s8626_s9 }
  0x29   :  { %s8631_s4 = sld [smem:[%s9478_s0 + %s8472_s28]]   ;;  %s8476_s28 = smov 29  }
  0x2a   :  { %s8636_s21 = sld [smem:[%s9478_s0 + %s8473_s7]]   ;;  %s8477_s7 = smov 30  }
  0x2b   :  { %s8641_s17 = sld [smem:[%s9478_s0 + %s8474_s15]]   ;;  %s8478_s15 = smov 31  }
  0x2c   :  { %s8646_s9 = sld [smem:[%s9478_s0 + %s8475_s22]]   ;;  %s8479_s22 = smov 32  }
  0x2f   :  { %9511 = sst [smem:[#allocation19_spill]] %s8631_s4 }
  0x30   :  { %9512 = sst [smem:[#allocation20_spill]] %s8636_s21 }
  0x31   :  { %9513 = sst [smem:[#allocation21_spill]] %s8641_s17 }
  0x32   :  { %9514 = sst [smem:[#allocation22_spill]] %s8646_s9 }
  0x33   :  { %s8651_s4 = sld [smem:[%s9478_s0 + %s8476_s28]]   ;;  %s8480_s28 = smov 33  }
  0x34   :  { %s8656_s21 = sld [smem:[%s9478_s0 + %s8477_s7]]   ;;  %s8481_s7 = smov 34  }
  0x35   :  { %s8661_s17 = sld [smem:[%s9478_s0 + %s8478_s15]]   ;;  %s8482_s15 = smov 35  }
  0x36   :  { %s8666_s9 = sld [smem:[%s9478_s0 + %s8479_s22]]   ;;  %s8483_s22 = smov 36  }
  0x39   :  { %9515 = sst [smem:[#allocation23_spill]] %s8651_s4 }
  0x3a   :  { %9516 = sst [smem:[#allocation24_spill]] %s8656_s21 }
  0x3b   :  { %9517 = sst [smem:[#allocation25_spill]] %s8661_s17 }
  0x3c   :  { %9518 = sst [smem:[#allocation26_spill]] %s8666_s9 }
  0x3d   :  { %s8671_s4 = sld [smem:[%s9478_s0 + %s8480_s28]]   ;;  %s8484_s28 = smov 37  }
  0x3e   :  { %s8676_s21 = sld [smem:[%s9478_s0 + %s8481_s7]]   ;;  %s8485_s7 = smov 38  }
  0x3f   :  { %s8681_s17 = sld [smem:[%s9478_s0 + %s8482_s15]]  }
  0x40   :  { %s8686_s9 = sld [smem:[%s9478_s0 + %s8483_s22]]  }
  0x43   :  { %9519 = sst [smem:[#allocation27_spill]] %s8671_s4 }
  0x44   :  { %9520 = sst [smem:[#allocation28_spill]] %s8676_s21 }
  0x45   :  { %s8691_s4 = sld [smem:[%s9478_s0 + %s8484_s28]]  }
  0x46   :  { %s8696_s21 = sld [smem:[%s9478_s0 + %s8485_s7]]  }
  0x47   :  { %83 = vsyncpa [#allocation3], 0  ;;  %v167_v0 = vld [vmem:[%s8531_s25] sm:$0xff]  ;;  %v168_v1 = vld [vmem:[%s8531_s25 + $0x8] sm:$0xff]  ;;  %vm183_vm0 = vcmask 261120  }
  0x48   :  { %v169_v2 = vld [vmem:[%s8531_s25 + $0x10] sm:$0xff]  ;;  %v7966_v3 = vpack.c.bf16 %v168_v1, %v167_v0  ;;  %v170_v4 = vld [vmem:[%s8531_s25 + $0x18] sm:$0xff]  ;;  %v8703_v5 = vld [vmem:[%s8506_s5] sm:$0xff] }
  0x49   :  { %v7970_v6 = vpack.c.bf16 %v170_v4, %v169_v2  ;;  %7449 = vmatprep.mubr.msk.f32.mxu0 %vm183_vm0, %v8703_v5 }
  0x4a   :  { %84 = vsyncpa [#allocation5], 0  ;;  %7967 = vmatprep.subr.bf16.mxu0 %v7966_v3  ;;  %v8708_v7 = vld [vmem:[%s8506_s5 + $0x8] sm:$0xff]  ;;  %v8486_v8 = vmov 0.0   ;;  %vm8487_vm1 = vmmov 0   ;;  %s8488_s0 = smov 64  }
  0x4b   :  { %7969 = vmatpush3.bf16.msra.mxu0 %v7966_v3  ;;  %7452 = vmatprep.subr.mxu1 %v8486_v8  ;;  %v6964_v9 = vld [vmem:[%s8536_s29] ss:$0 sm:$0xff]  ;;  %s8489_s5 = smov 96   ;;  %s8490_s15 = smov 80   ;;  %vm268_vm2 = vcmask 130048   ;;  %vm345_vm3 = vcmask 64512  }
  0x4c   :  { %7971 = vmatprep.subr.bf16.mxu0 %v7970_v6  ;;  %7454 = vmatprep.mubr.msk.f32.mxu1 %vm8487_vm1, %v8486_v8  ;;  %s8491_s16 = smov 112   ;;  %v8740_v20 = vld [vmem:[%s8516_s13] sm:$0xff]  ;;  %v8747_v28 = vld [vmem:[%s8516_s13 + $0x8] sm:$0xff]  ;;  %s8492_s18 = smov 48   ;;  %vm1186_vm4 = vcmask 523264  }
  0x4d   :  { %s8493_s13 = smov 16   ;;  %s9533_s22 = sld [smem:[#allocation20_spill]] }
  0x4e   :  { %s9534_s23 = sld [smem:[#allocation23_spill]]  ;;  %s9535_s26 = sld [smem:[#allocation25_spill]] }
  0x4f   :  { %7973 = vmatpush3.bf16.msra.mxu0 %v7970_v6  ;;  %s9536_s28 = sld [smem:[#allocation21_spill]]  ;;  %s9537_s1 = sld [smem:[#allocation22_spill]] }
  0x50   :  { %7472 = vmatprep.subr.mxu0 %v8486_v8  ;;  %s9538_s2 = sld [smem:[#allocation24_spill]]  ;;  %s9539_s7 = sld [smem:[#allocation26_spill]] }
  0x51   :  { %s9540_s10 = sld [smem:[#allocation27_spill]]  ;;  %s9541_s11 = sld [smem:[#allocation28_spill]] }
  0x52   :  { %7450 = vmatmul.mubr.msk.f32.vlgmr.msra.gmra.mrb[0].mxu0 %vm183_vm0, %v8708_v7 }
  0x53   :  { %7474 = vmatprep.mubr.msk.f32.mxu0 %vm8487_vm1, %v8486_v8 }
 0x125   :  { %v7451_v10 = vpop.f32.mrb[0].mxu0 }
 0x126   :  { %v256_v11 = vpop.f32.mrb[1].mxu0  ;;  %v8723_v13 = vadd.f32 %v7451_v10, %v6964_v9 }
 0x127   :  { %v257_v12 = vadd.f32 %v6964_v9, %v256_v11 }
 0x129   :  { %357 = vrot.lane.b32.xlu1 %v257_v12, %s8488_s0  ;;  %266 = vrot.lane.b32.xlu0 %v257_v12, %s8489_s5 }
 0x12d   :  { %435 = vrot.lane.b32.xlu1 %v257_v12, %s8490_s15 }
 0x131   :  { %433 = vrot.lane.b32.xlu1 %v257_v12, %s8491_s16 }
 0x135   :  { %606 = vrot.lane.b32.xlu1 %v8723_v13, %s8489_s5 }
 0x19b   :  { %v358_v14 = vpop.permute.xlu1 %357  ;;  %v267_v15 = vpop.permute.xlu0 %266 }
 0x19c   :  { %7453 = vmatpush3.xpose.msk.msra.mxu1 %vm268_vm2, %v267_v15 }
 0x19d   :  { %7457 = vmatprep.subr.mxu1 %v8486_v8 }
 0x19f   :  { %v436_v16 = vpop.permute.xlu1 %435  ;;  %7455 = vmatmul.mubr.msk.f32.vlgmr.msra.gmra.mrb[0].mxu1 %vm268_vm2, %v257_v12 }
 0x1a0   :  { %7458 = vmatpush3.msra.mxu1 %v358_v14  ;;  %7459 = vmatprep.mubr.msk.f32.mxu1 %vm8487_vm1, %v8486_v8 }
 0x1a1   :  { %7462 = vmatprep.subr.mxu1 %v8486_v8 }
 0x1a3   :  { %v434_v17 = vpop.permute.xlu1 %433 }
 0x1a7   :  { %v607_v18 = vpop.permute.xlu1 %606 }
 0x1a8   :  { %7473 = vmatpush3.xpose.msk.msra.mxu0 %vm268_vm2, %v607_v18 }
 0x1a9   :  { %7482 = vmatprep.subr.mxu0 %v8486_v8 }
 0x1ab   :  { %7475 = vmatmul.mubr.msk.f32.vlgmr.msra.gmra.mrb[2].mxu0 %vm268_vm2, %v8723_v13 }
 0x1ac   :  { %7484 = vmatprep.mubr.msk.f32.mxu0 %vm8487_vm1, %v8486_v8 }
 0x272   :  { %v339_v19 = vpop.f32.mrb[0].mxu1 }
 0x273   :  { %v343_v21 = vmul.f32 0.25, %v339_v19  ;;  %v7456_v22 = vpop.f32.mrb[1].mxu1  ;;  %v172_v19 = vld [vmem:[%s8541_s3] sm:$0xff] }
 0x275   :  { %v344_v23 = vadd.f32 %v343_v21, %v8740_v20  ;;  %v173_v21 = vld [vmem:[%s8541_s3 + $0x8] sm:$0xff] }
 0x276   :  { %v7974_v22 = vpack.c.bf16 %v173_v21, %v172_v19 }
 0x277   :  { %v346_v24 = vsel %vm345_vm3, %v344_v23, -inf }
 0x278   :  { %347 = vmax.xlane.f32.xlu0 %v346_v24  ;;  %v175_v24 = vld [vmem:[%s8541_s3 + $0x18] sm:$0xff] }
 0x27e   :  { %v678_v25 = vpop.f32.mrb[2].mxu0 }
 0x27f   :  { %v7476_v26 = vpop.f32.mrb[3].mxu0  ;;  %v682_v27 = vmul.f32 0.25, %v678_v25 }
 0x281   :  { %v683_v29 = vadd.f32 %v682_v27, %v8747_v28 }
 0x283   :  { %v684_v30 = vsel %vm345_vm3, %v683_v29, -inf }
 0x28e   :  { %771 = vrot.lane.b32.xlu0 %v8723_v13, %s8491_s16 }
 0x2ad   :  { %685 = vmax.xlane.f32.xlu0 %v684_v30 }
 0x2c3   :  { %524 = vrot.lane.b32.xlu0 %v257_v12, %s8492_s18 }
 0x305   :  { %v348_v31 = vpop.xlane.xlu0 %347 }
 0x306   :  { %v349_v32 = vsub.f32 %v344_v23, %v348_v31  ;;  %v174_v23 = vld [vmem:[%s8541_s3 + $0x10] sm:$0xff] }
 0x307   :  { %v7978_v25 = vpack.c.bf16 %v175_v24, %v174_v23 }
 0x308   :  { %v350_v33 = vmul.f32 1.442695, %v349_v32 }
 0x309   :  { %v772_v38 = vpop.permute.xlu0 %771 }
 0x30a   :  { %8252 = vpow2.f32 %v350_v33 }
 0x314   :  { %v8253_v34 = vpop.eup %8252 }
 0x315   :  { %v352_v35 = vsel %vm345_vm3, %v8253_v34, 0.0 }
 0x316   :  { %353 = vadd.xlane.f32.xlu1 %v352_v35 }
 0x327   :  { %773 = vrot.lane.b32.xlu1 %v8723_v13, %s8490_s15 }
 0x33a   :  { %v686_v40 = vpop.xlane.xlu0 %685 }
 0x33b   :  { %v687_v45 = vsub.f32 %v683_v29, %v686_v40 }
 0x33d   :  { %v688_v46 = vmul.f32 1.442695, %v687_v45 }
 0x33e   :  { %v525_v42 = vpop.permute.xlu0 %524 }
 0x3a3   :  { %v354_v36 = vpop.xlane.xlu1 %353 }
 0x3a4   :  { %8254 = vrcp.f32 %v354_v36 }
 0x3a5   :  { %8256 = vpow2.f32 %v688_v46 }
 0x3a7   :  { %v774_v37 = vpop.permute.xlu1 %773 }
 0x3a8   :  { %7483 = vmatpush3.xpose.msk.msra.mxu0 %vm268_vm2, %v774_v37  ;;  %v6979_v37 = vld [vmem:[%s8546_s8] ss:$0 sm:$0xff] }
 0x3a9   :  { %7975 = vmatprep.subr.bf16.mxu0 %v7974_v22 }
 0x3ab   :  { %7485 = vmatmul.mubr.msk.f32.vlgmr.msra.gmra.mrb[4].mxu0 %vm268_vm2, %v772_v38 }
 0x3ac   :  { %7977 = vmatpush3.bf16.msra.mxu0 %v7974_v22 }
 0x3ad   :  { %7979 = vmatprep.subr.bf16.mxu0 %v7978_v25 }
 0x3ae   :  { %v8255_v39 = vpop.eup %8254 }
 0x3af   :  { %v356_v41 = vmul.f32 %v8255_v39, %v8253_v34  ;;  %v8257_v57 = vpop.eup %8256 }
 0x3b0   :  { %v690_v58 = vsel %vm345_vm3, %v8257_v57, 0.0  ;;  %7981 = vmatpush3.bf16.msra.mxu0 %v7978_v25  ;;  %v1088_v25 = vld [vmem:[%s8571_s6 + $0x30] sm:$0xff] }
 0x3b1   :  { %7460 = vmatmul.mubr.msk.f32.vlgmr.msra.gmra.mrb[2].mxu1 %vm345_vm3, %v356_v41 }
 0x3b2   :  { %7463 = vmatpush3.xpose.msk.msra.mxu1 %vm268_vm2, %v436_v16  ;;  %7464 = vmatprep.mubr.msk.f32.mxu1 %vm8487_vm1, %v8486_v8 }
 0x3b3   :  { %7467 = vmatprep.subr.mxu1 %v8486_v8 }
 0x3b5   :  { %7465 = vmatmul.mubr.msk.f32.vlgmr.msra.gmra.mrb[4].mxu1 %vm268_vm2, %v434_v17 }
 0x3b6   :  { %7468 = vmatpush3.msra.mxu1 %v525_v42  ;;  %7469 = vmatprep.mubr.msk.f32.mxu1 %vm8487_vm1, %v8486_v8 }
 0x3b7   :  { %7477 = vmatprep.subr.mxu1 %v8486_v8 }
 0x47e   :  { %v845_v43 = vpop.f32.mrb[4].mxu0 }
 0x47f   :  { %v7486_v44 = vpop.f32.mrb[5].mxu0  ;;  %v849_v50 = vmul.f32 0.25, %v845_v43 }
 0x481   :  { %v850_v55 = vadd.f32 %v849_v50, %v8747_v28 }
 0x483   :  { %v851_v56 = vsel %vm345_vm3, %v850_v55, -inf }
 0x484   :  { %v8766_v47 = vpop.f32.mrb[2].mxu1 }
 0x485   :  { %v7461_v48 = vpop.f32.mrb[3].mxu1 }
 0x488   :  { %v507_v49 = vpop.f32.mrb[4].mxu1 }
 0x489   :  { %v511_v51 = vmul.f32 0.25, %v507_v49  ;;  %v7466_v52 = vpop.f32.mrb[5].mxu1 }
 0x48b   :  { %v512_v53 = vadd.f32 %v511_v51, %v8740_v20 }
 0x48d   :  { %v513_v54 = vsel %vm345_vm3, %v512_v53, -inf }
 0x48e   :  { %514 = vmax.xlane.f32.xlu1 %v513_v54  ;;  %v1077_v54 = vld [vmem:[%s8561_s24] sm:$0xff] }
 0x492   :  { %852 = vmax.xlane.f32.xlu1 %v851_v56  ;;  %v1079_v56 = vld [vmem:[%s8561_s24 + $0x10] sm:$0xff] }
 0x496   :  { %691 = vadd.xlane.f32.xlu1 %v690_v58  ;;  %v1080_v58 = vld [vmem:[%s8561_s24 + $0x18] sm:$0xff] }
 0x51b   :  { %v515_v59 = vpop.xlane.xlu1 %514 }
 0x51c   :  { %v516_v1 = vsub.f32 %v512_v53, %v515_v59  ;;  %v7986_v59 = vpack.c.bf16 %v1080_v58, %v1079_v56 }
 0x51e   :  { %v517_v2 = vmul.f32 1.442695, %v516_v1 }
 0x51f   :  { %v853_v60 = vpop.xlane.xlu1 %852 }
 0x520   :  { %v854_v61 = vsub.f32 %v850_v55, %v853_v60  ;;  %v1078_v55 = vld [vmem:[%s8561_s24 + $0x8] sm:$0xff]  ;;  %v1082_v60 = vld [vmem:[%s8571_s6] sm:$0xff] }
 0x522   :  { %v855_v62 = vmul.f32 1.442695, %v854_v61  ;;  %v1083_v61 = vld [vmem:[%s8571_s6 + $0x8] sm:$0xff] }
 0x523   :  { %v692_v6 = vpop.xlane.xlu1 %691 }
 0x524   :  { %8258 = vpow2.f32 %v855_v62  ;;  %v1084_v62 = vld [vmem:[%s8571_s6 + $0x10] sm:$0xff] }
 0x525   :  { %8260 = vpow2.f32 %v517_v2  ;;  %v1086_v2 = vld [vmem:[%s8571_s6 + $0x20] sm:$0xff] }
 0x52e   :  { %v8259_v63 = vpop.eup %8258 }
 0x52f   :  { %v857_v0 = vsel %vm345_vm3, %v8259_v63, 0.0  ;;  %v8261_v3 = vpop.eup %8260 }
 0x530   :  { %858 = vadd.xlane.f32.xlu1 %v857_v0  ;;  %v519_v4 = vsel %vm345_vm3, %v8261_v3, 0.0  ;;  %v1085_v0 = vld [vmem:[%s8571_s6 + $0x18] sm:$0xff] }
 0x531   :  { %v7994_v1 = vpack.c.bf16 %v1085_v0, %v1084_v62 }
 0x541   :  { %695 = vrot.lane.b32.xlu1 %v8723_v13, %s8488_s0 }
 0x565   :  { %520 = vadd.xlane.f32.xlu1 %v519_v4 }
 0x576   :  { %862 = vrot.lane.b32.xlu1 %v8723_v13, %s8492_s18 }
 0x5bd   :  { %v859_v9 = vpop.xlane.xlu1 %858 }
 0x5c1   :  { %v696_v10 = vpop.permute.xlu1 %695 }
 0x5f2   :  { %v521_v11 = vpop.xlane.xlu1 %520 }
 0x5f3   :  { %8262 = vrcp.f32 %v521_v11 }
 0x5f4   :  { %8264 = vrcp.f32 %v692_v6 }
 0x5f5   :  { %8266 = vrcp.f32 %v859_v9 }
 0x5f6   :  { %v863_v17 = vpop.permute.xlu1 %862 }
 0x5fd   :  { %v8263_v12 = vpop.eup %8262 }
 0x5fe   :  { %v523_v14 = vmul.f32 %v8263_v12, %v8261_v3  ;;  %v8265_v15 = vpop.eup %8264  ;;  %v1087_v3 = vld [vmem:[%s8571_s6 + $0x28] sm:$0xff] }
 0x5ff   :  { %v694_v13 = vmul.f32 %v8265_v15, %v8257_v57  ;;  %v8267_v16 = vpop.eup %8266  ;;  %v7982_v57 = vpack.c.bf16 %v1078_v55, %v1077_v54  ;;  %v7998_v4 = vpack.c.bf16 %v1087_v3, %v1086_v2  ;;  %v6993_v54 = vld [vmem:[%s8531_s25 + $0x28] sm:$0xff]  ;;  %v6994_v55 = vld [vmem:[%s8531_s25 + $0x30] sm:$0xff]  ;;  %v6990_v2 = vld [vmem:[%s8581_s20] ss:$0 sm:$0xff] }
 0x600   :  { %7470 = vmatmul.mubr.msk.f32.vlgmr.msra.gmra.mrb[6].mxu1 %vm345_vm3, %v523_v14  ;;  %v861_v18 = vmul.f32 %v8267_v16, %v8259_v63  ;;  %v7990_v63 = vpack.c.bf16 %v1083_v61, %v1082_v60 }
 0x601   :  { %7478 = vmatpush3.msra.mxu1 %v696_v10  ;;  %7479 = vmatprep.mubr.msk.f32.mxu1 %vm8487_vm1, %v8486_v8 }
 0x602   :  { %7487 = vmatprep.subr.mxu1 %v8486_v8  ;;  %7991 = vmatprep.subr.bf16.mxu0 %v7990_v63 }
 0x604   :  { %7480 = vmatmul.mubr.msk.f32.vlgmr.msra.gmra.mrb[8].mxu1 %vm345_vm3, %v694_v13  ;;  %v6982_v13 = vld [vmem:[%s8551_s14] ss:$0 sm:$0xff] }
 0x605   :  { %7488 = vmatpush3.msra.mxu1 %v863_v17  ;;  %7489 = vmatprep.mubr.msk.f32.mxu1 %vm8487_vm1, %v8486_v8  ;;  %v6983_v17 = vld [vmem:[%s8556_s19] ss:$0 sm:$0xff] }
 0x606   :  { %7983 = vmatprep.subr.bf16.mxu1 %v7982_v57 }
 0x608   :  { %7490 = vmatmul.mubr.msk.f32.vlgmr.msra.gmra.mrb[10].mxu1 %vm345_vm3, %v861_v18 }
 0x609   :  { %7985 = vmatpush3.bf16.msra.mxu1 %v7982_v57  ;;  %v6995_v57 = vld [vmem:[%s8531_s25 + $0x38] sm:$0xff] }
 0x60a   :  { %7987 = vmatprep.subr.bf16.mxu1 %v7986_v59  ;;  %v8010_v58 = vpack.c.bf16 %v6995_v57, %v6994_v55 }
 0x60d   :  { %7989 = vmatpush3.bf16.msra.mxu1 %v7986_v59 }
 0x6d3   :  { %v596_v26 = vpop.f32.mrb[6].mxu1 }
 0x6d4   :  { %601 = vrot.lane.b32.xlu0 %v596_v26, %s8493_s13  ;;  %v7471_v27 = vpop.f32.mrb[7].mxu1  ;;  %v1089_v26 = vld [vmem:[%s8571_s6 + $0x38] sm:$0xff] }
 0x6d5   :  { %v8002_v27 = vpack.c.bf16 %v1089_v26, %v1088_v25 }
 0x6d7   :  { %v767_v29 = vpop.f32.mrb[8].mxu1 }
 0x6d8   :  { %v7481_v30 = vpop.f32.mrb[9].mxu1 }
 0x6db   :  { %v934_v31 = vpop.f32.mrb[10].mxu1 }
 0x6dc   :  { %939 = vrot.lane.b32.xlu1 %v934_v31, %s8493_s13  ;;  %v7491_v32 = vpop.f32.mrb[11].mxu1 }
 0x746   :  { %v602_v33 = vpop.permute.xlu0 %601 }
 0x747   :  { %v604_v34 = vsel %vm268_vm2, %v8766_v47, %v602_v33 }
 0x748   :  { %7500 = vmatprep.mubr.msk.f32.mxu0 %vm183_vm0, %v604_v34 }
 0x74e   :  { %v940_v35 = vpop.permute.xlu1 %939 }
 0x74f   :  { %v942_v36 = vsel %vm268_vm2, %v767_v29, %v940_v35  ;;  %v6984_v29 = vld [vmem:[%s8566_s30] ss:$0 sm:$0xff] }
 0x750   :  { %7501 = vmatmul.mubr.msk.f32.vlgmr.msra.gmra.mrb[6].mxu0 %vm183_vm0, %v942_v36  ;;  %v6987_v36 = vld [vmem:[%s8576_s12] ss:$0 sm:$0xff] }
 0x751   :  { %7993 = vmatpush3.bf16.msra.mxu0 %v7990_v63 }
 0x752   :  { %7995 = vmatprep.subr.bf16.mxu0 %v7994_v1 }
 0x755   :  { %7997 = vmatpush3.bf16.msra.mxu0 %v7994_v1 }
 0x756   :  { %7999 = vmatprep.subr.bf16.mxu0 %v7998_v4 }
 0x759   :  { %8001 = vmatpush3.bf16.msra.mxu0 %v7998_v4 }
 0x75a   :  { %8003 = vmatprep.subr.bf16.mxu0 %v8002_v27 }
 0x75d   :  { %8005 = vmatpush3.bf16.msra.mxu0 %v8002_v27 }
 0x75e   :  { %7554 = vmatprep.subr.mxu0 %v8486_v8 }
 0x823   :  { %v7502_v38 = vpop.f32.mrb[6].mxu0 }
 0x824   :  { %v1027_v39 = vadd.f32 %v7502_v38, %v6979_v37  ;;  %v1021_v40 = vpop.f32.mrb[7].mxu0 }
 0x825   :  { %v1022_v41 = vadd.f32 %v6979_v37, %v1021_v40 }
 0x826   :  { %v1031_v42 = vadd.f32 %v1027_v39, %v8708_v7 }
 0x827   :  { %v1030_v43 = vadd.f32 %v1022_v41, %v8703_v5 }
 0x828   :  { %v1037_v44 = vsel %vm183_vm0, %v1031_v42, 0.0 }
 0x829   :  { %1038 = vadd.xlane.f32.xlu1 %v1037_v44  ;;  %v1034_v45 = vsel %vm183_vm0, %v1030_v43, 0.0 }
 0x82a   :  { %1035 = vadd.xlane.f32.xlu0 %v1034_v45 }
 0x8b6   :  { %v1039_v46 = vpop.xlane.xlu1 %1038 }
 0x8b7   :  { %v1042_v47 = vmul.f32 0.03125, %v1039_v46  ;;  %v1036_v48 = vpop.xlane.xlu0 %1035 }
 0x8b8   :  { %v1041_v49 = vmul.f32 0.03125, %v1036_v48 }
 0x8b9   :  { %v1044_v50 = vsub.f32 %v1031_v42, %v1042_v47 }
 0x8ba   :  { %v1043_v51 = vsub.f32 %v1030_v43, %v1041_v49 }
 0x8bb   :  { %v1046_v7 = vmul.f32 %v1044_v50, %v1044_v50 }
 0x8bc   :  { %v1045_v52 = vmul.f32 %v1043_v51, %v1043_v51 }
 0x8bd   :  { %v1050_v53 = vsel %vm183_vm0, %v1046_v7, 0.0 }
 0x8be   :  { %v1047_v5 = vsel %vm183_vm0, %v1045_v52, 0.0 }
 0x8bf   :  { %1048 = vadd.xlane.f32.xlu0 %v1047_v5 }
 0x8c3   :  { %1051 = vadd.xlane.f32.xlu0 %v1050_v53  ;;  %v6992_v53 = vld [vmem:[%s8531_s25 + $0x20] sm:$0xff]  ;;  %s9521_s25 = sld [smem:[#allocation11_spill]] }
 0x8c4   :  { %v8006_v56 = vpack.c.bf16 %v6993_v54, %v6992_v53 }
 0x8c6   :  { %8007 = vmatprep.subr.bf16.mxu1 %v8006_v56 }
 0x94c   :  { %v1049_v6 = vpop.xlane.xlu0 %1048 }
 0x94d   :  { %v1053_v9 = vmul.f32 0.03125, %v1049_v6 }
 0x94f   :  { %v1055_v10 = vadd.f32 1e-05, %v1053_v9  ;;  %v6991_v9 = vld [vmem:[%s8586_s27] ss:$0 sm:$0xff] }
 0x950   :  { %v1052_v11 = vpop.xlane.xlu0 %1051 }
 0x951   :  { %8268 = vrsqrt.f32 %v1055_v10  ;;  %v1054_v12 = vmul.f32 0.03125, %v1052_v11 }
 0x953   :  { %v1056_v14 = vadd.f32 1e-05, %v1054_v12 }
 0x955   :  { %8270 = vrsqrt.f32 %v1056_v14 }
 0x95b   :  { %v8269_v15 = vpop.eup %8268 }
 0x95c   :  { %v1059_v16 = vmul.f32 %v8269_v15, %v1043_v51  ;;  %v7002_v15 = vld [vmem:[%s8536_s29 + $0x1] ss:$0 sm:$0xff]  ;;  %s9522_s29 = sld [smem:[#allocation8_spill]] }
 0x95e   :  { %v1067_v18 = vmul.f32 %v6982_v13, %v1059_v16 }
 0x95f   :  { %v8271_v19 = vpop.eup %8270 }
 0x960   :  { %v1060_v21 = vmul.f32 %v8271_v19, %v1044_v50  ;;  %v1075_v22 = vadd.f32 %v6983_v17, %v1067_v18 }
 0x962   :  { %v1068_v23 = vmul.f32 %v6982_v13, %v1060_v21  ;;  %7511 = vmatprep.mubr.msk.f32.mxu1 %vm183_vm0, %v1075_v22 }
 0x964   :  { %v1076_v24 = vadd.f32 %v6983_v17, %v1068_v23 }
 0x966   :  { %7512 = vmatmul.mubr.msk.f32.vlgmr.msra.gmra.mrb[12].mxu1 %vm183_vm0, %v1076_v24 }
 0x967   :  { %8009 = vmatpush3.bf16.msra.mxu1 %v8006_v56 }
 0x968   :  { %8011 = vmatprep.subr.bf16.mxu1 %v8010_v58 }
 0x96b   :  { %8013 = vmatpush3.bf16.msra.mxu1 %v8010_v58 }
 0x96c   :  { %7544 = vmatprep.subr.mxu1 %v8486_v8 }
 0xa39   :  { %v7513_v30 = vpop.f32.mrb[12].mxu1 }
 0xa3a   :  { %v1175_v31 = vadd.f32 %v7513_v30, %v6984_v29  ;;  %v1169_v32 = vpop.f32.mrb[13].mxu1 }
 0xa3b   :  { %v1170_v33 = vadd.f32 %v6984_v29, %v1169_v32 }
 0xa3c   :  { %v1179_v35 = vmax.f32 %v1175_v31, 0.0 }
 0xa3d   :  { %v1178_v34 = vmax.f32 %v1170_v33, 0.0 }
 0xa3f   :  { %7530 = vmatprep.mubr.msk.f32.mxu0 %vm1186_vm4, %v1178_v34 }
 0xa40   :  { %7531 = vmatmul.mubr.msk.f32.vlgmr.msra.gmra.mrb[8].mxu0 %vm1186_vm4, %v1179_v35 }
 0xa41   :  { %7556 = vmatprep.mubr.msk.f32.mxu0 %vm8487_vm1, %v8486_v8 }
 0xb13   :  { %v7532_v37 = vpop.f32.mrb[8].mxu0 }
 0xb14   :  { %v1265_v38 = vadd.f32 %v7532_v37, %v6987_v36  ;;  %v1259_v39 = vpop.f32.mrb[9].mxu0 }
 0xb15   :  { %v1260_v40 = vadd.f32 %v6987_v36, %v1259_v39 }
 0xb16   :  { %v1269_v41 = vadd.f32 %v1265_v38, %v1076_v24 }
 0xb17   :  { %v1268_v42 = vadd.f32 %v1260_v40, %v1075_v22 }
 0xb18   :  { %v1275_v43 = vsel %vm183_vm0, %v1269_v41, 0.0 }
 0xb19   :  { %1276 = vadd.xlane.f32.xlu0 %v1275_v43  ;;  %v1272_v44 = vsel %vm183_vm0, %v1268_v42, 0.0 }
 0xb1a   :  { %1273 = vadd.xlane.f32.xlu1 %v1272_v44 }
 0xba6   :  { %v1277_v45 = vpop.xlane.xlu0 %1276 }
 0xba7   :  { %v1279_v46 = vmul.f32 0.03125, %v1277_v45  ;;  %v1274_v47 = vpop.xlane.xlu1 %1273 }
 0xba8   :  { %v1278_v48 = vmul.f32 0.03125, %v1274_v47 }
 0xba9   :  { %v1281_v49 = vsub.f32 %v1269_v41, %v1279_v46 }
 0xbaa   :  { %v1280_v50 = vsub.f32 %v1268_v42, %v1278_v48 }
 0xbab   :  { %v1283_v51 = vmul.f32 %v1281_v49, %v1281_v49 }
 0xbac   :  { %v1282_v52 = vmul.f32 %v1280_v50, %v1280_v50 }
 0xbad   :  { %v1287_v5 = vsel %vm183_vm0, %v1283_v51, 0.0 }
 0xbae   :  { %1288 = vadd.xlane.f32.xlu0 %v1287_v5  ;;  %v1284_v7 = vsel %vm183_vm0, %v1282_v52, 0.0 }
 0xbaf   :  { %1285 = vadd.xlane.f32.xlu1 %v1284_v7 }
 0xc3b   :  { %v1289_v59 = vpop.xlane.xlu0 %1288 }
 0xc3c   :  { %v1291_v60 = vmul.f32 0.03125, %v1289_v59  ;;  %v1286_v61 = vpop.xlane.xlu1 %1285 }
 0xc3d   :  { %v1290_v62 = vmul.f32 0.03125, %v1286_v61 }
 0xc3e   :  { %v1293_v63 = vadd.f32 1e-05, %v1291_v60 }
 0xc3f   :  { %v1292_v0 = vadd.f32 1e-05, %v1290_v62 }
 0xc40   :  { %8272 = vrsqrt.f32 %v1293_v63 }
 0xc41   :  { %8274 = vrsqrt.f32 %v1292_v0 }
 0xc4a   :  { %v8273_v1 = vpop.eup %8272 }
 0xc4b   :  { %v8275_v3 = vpop.eup %8274  ;;  %v1297_v4 = vmul.f32 %v8273_v1, %v1281_v49 }
 0xc4c   :  { %v1296_v6 = vmul.f32 %v8275_v3, %v1280_v50 }
 0xc4d   :  { %v1305_v10 = vmul.f32 %v6990_v2, %v1297_v4 }
 0xc4e   :  { %v1304_v11 = vmul.f32 %v6990_v2, %v1296_v6 }
 0xc4f   :  { %v8841_v14 = vadd.f32 %v6991_v9, %v1305_v10 }
 0xc50   :  { %v8839_v12 = vadd.f32 %v6991_v9, %v1304_v11 }
 0xc52   :  { %7541 = vmatprep.mubr.msk.f32.mxu1 %vm183_vm0, %v8839_v12 }
 0xc53   :  { %7542 = vmatmul.mubr.msk.f32.vlgmr.msra.gmra.mrb[14].mxu1 %vm183_vm0, %v8841_v14 }
 0xc54   :  { %7546 = vmatprep.mubr.msk.f32.mxu1 %vm8487_vm1, %v8486_v8 }
 0xd26   :  { %v7543_v13 = vpop.f32.mrb[14].mxu1 }
 0xd27   :  { %v1406_v16 = vpop.f32.mrb[15].mxu1  ;;  %v8856_v18 = vadd.f32 %v7543_v13, %v7002_v15 }
 0xd28   :  { %v8850_v17 = vadd.f32 %v7002_v15, %v1406_v16 }
 0xd2a   :  { %1583 = vrot.lane.b32.xlu0 %v8850_v17, %s8490_s15  ;;  %1416 = vrot.lane.b32.xlu1 %v8850_v17, %s8489_s5 }
 0xd2e   :  { %1921 = vrot.lane.b32.xlu0 %v8856_v18, %s8490_s15  ;;  %1581 = vrot.lane.b32.xlu1 %v8850_v17, %s8491_s16 }
 0xd32   :  { %1754 = vrot.lane.b32.xlu1 %v8856_v18, %s8489_s5 }
 0xd36   :  { %1919 = vrot.lane.b32.xlu1 %v8856_v18, %s8491_s16 }
 0xd9c   :  { %v1584_v19 = vpop.permute.xlu0 %1583  ;;  %v1417_v21 = vpop.permute.xlu1 %1416 }
 0xd9d   :  { %7545 = vmatpush3.xpose.msk.msra.mxu1 %vm268_vm2, %v1417_v21  ;;  %7555 = vmatpush3.xpose.msk.msra.mxu0 %vm268_vm2, %v1584_v19  ;;  %v6997_v21 = vld [vmem:[%s8541_s3 + $0x20] sm:$0xff] }
 0xd9e   :  { %7564 = vmatprep.subr.mxu0 %v8486_v8  ;;  %7549 = vmatprep.subr.mxu1 %v8486_v8 }
 0xda0   :  { %7547 = vmatmul.mubr.msk.f32.vlgmr.msra.gmra.mrb[16].mxu1 %vm268_vm2, %v8850_v17  ;;  %v1582_v22 = vpop.permute.xlu1 %1581  ;;  %v1922_v24 = vpop.permute.xlu0 %1921 }
 0xda1   :  { %7557 = vmatmul.mubr.msk.f32.vlgmr.msra.gmra.mrb[10].mxu0 %vm268_vm2, %v1582_v22  ;;  %7551 = vmatprep.mubr.msk.f32.mxu1 %vm8487_vm1, %v8486_v8  ;;  %v6998_v22 = vld [vmem:[%s8541_s3 + $0x28] sm:$0xff] }
 0xda2   :  { %7566 = vmatprep.mubr.msk.f32.mxu0 %vm8487_vm1, %v8486_v8 }
 0xda4   :  { %v1755_v23 = vpop.permute.xlu1 %1754 }
 0xda5   :  { %7565 = vmatpush3.xpose.msk.msra.mxu0 %vm268_vm2, %v1755_v23  ;;  %v8014_v23 = vpack.c.bf16 %v6998_v22, %v6997_v21  ;;  %v7023_v22 = vld [vmem:[%s8556_s19 + $0x1] ss:$0 sm:$0xff]  ;;  %s9526_s19 = sld [smem:[#allocation14_spill]] }
 0xda6   :  { %7574 = vmatprep.subr.mxu0 %v8486_v8 }
 0xda8   :  { %7567 = vmatmul.mubr.msk.f32.vlgmr.msra.gmra.mrb[12].mxu0 %vm268_vm2, %v8856_v18  ;;  %v1920_v25 = vpop.permute.xlu1 %1919 }
 0xda9   :  { %7575 = vmatpush3.xpose.msk.msra.mxu0 %vm268_vm2, %v1922_v24  ;;  %7576 = vmatprep.mubr.msk.f32.mxu0 %vm8487_vm1, %v8486_v8  ;;  %v6999_v24 = vld [vmem:[%s8541_s3 + $0x30] sm:$0xff] }
 0xdaa   :  { %8015 = vmatprep.subr.bf16.mxu0 %v8014_v23 }
 0xdac   :  { %7577 = vmatmul.mubr.msk.f32.vlgmr.msra.gmra.mrb[14].mxu0 %vm268_vm2, %v1920_v25  ;;  %v7000_v25 = vld [vmem:[%s8541_s3 + $0x38] sm:$0xff]  ;;  %s9523_s3 = sld [smem:[#allocation12_spill]] }
 0xdad   :  { %8017 = vmatpush3.bf16.msra.mxu0 %v8014_v23 }
 0xe73   :  { %v1488_v26 = vpop.f32.mrb[16].mxu1 }
 0xe74   :  { %v1492_v27 = vmul.f32 0.25, %v1488_v26  ;;  %v7548_v29 = vpop.f32.mrb[17].mxu1  ;;  %v1655_v30 = vpop.f32.mrb[10].mxu0  ;;  %v8018_v26 = vpack.c.bf16 %v7000_v25, %v6999_v24 }
 0xe75   :  { %v1659_v31 = vmul.f32 0.25, %v1655_v30  ;;  %v7558_v32 = vpop.f32.mrb[11].mxu0 }
 0xe76   :  { %v1493_v33 = vadd.f32 %v1492_v27, %v8740_v20  ;;  %8019 = vmatprep.subr.bf16.mxu0 %v8018_v26 }
 0xe77   :  { %v1660_v34 = vadd.f32 %v1659_v31, %v8740_v20  ;;  %8021 = vmatpush3.bf16.msra.mxu0 %v8018_v26 }
 0xe78   :  { %v1494_v35 = vsel %vm345_vm3, %v1493_v33, -inf }
 0xe79   :  { %1495 = vmax.xlane.f32.xlu0 %v1494_v35  ;;  %v1661_v36 = vsel %vm345_vm3, %v1660_v34, -inf }
 0xe7a   :  { %1662 = vmax.xlane.f32.xlu1 %v1661_v36 }
 0xe7b   :  { %v1826_v37 = vpop.f32.mrb[12].mxu0 }
 0xe7c   :  { %v1830_v38 = vmul.f32 0.25, %v1826_v37  ;;  %v7568_v39 = vpop.f32.mrb[13].mxu0 }
 0xe7e   :  { %v1831_v40 = vadd.f32 %v1830_v38, %v8747_v28 }
 0xe7f   :  { %v1993_v41 = vpop.f32.mrb[14].mxu0 }
 0xe80   :  { %v1997_v42 = vmul.f32 0.25, %v1993_v41  ;;  %v7578_v43 = vpop.f32.mrb[15].mxu0  ;;  %v1832_v44 = vsel %vm345_vm3, %v1831_v40, -inf }
 0xe81   :  { %1833 = vmax.xlane.f32.xlu0 %v1832_v44 }
 0xe82   :  { %v1998_v45 = vadd.f32 %v1997_v42, %v8747_v28 }
 0xe84   :  { %v1999_v20 = vsel %vm345_vm3, %v1998_v45, -inf }
 0xe85   :  { %2000 = vmax.xlane.f32.xlu0 %v1999_v20 }
 0xe8b   :  { %1505 = vrot.lane.b32.xlu1 %v8850_v17, %s8488_s0 }
 0xf06   :  { %v1496_v46 = vpop.xlane.xlu0 %1495 }
 0xf07   :  { %v1497_v47 = vsub.f32 %v1493_v33, %v1496_v46  ;;  %v1663_v48 = vpop.xlane.xlu1 %1662 }
 0xf08   :  { %v1664_v49 = vsub.f32 %v1660_v34, %v1663_v48 }
 0xf09   :  { %v1498_v50 = vmul.f32 1.442695, %v1497_v47 }
 0xf0a   :  { %v1665_v51 = vmul.f32 1.442695, %v1664_v49 }
 0xf0b   :  { %8276 = vpow2.f32 %v1498_v50  ;;  %v1506_v52 = vpop.permute.xlu1 %1505 }
 0xf0c   :  { %8278 = vpow2.f32 %v1665_v51  ;;  %7550 = vmatpush3.msra.mxu1 %v1506_v52 }
 0xf0d   :  { %7559 = vmatprep.subr.mxu1 %v8486_v8 }
 0xf0e   :  { %v1834_v5 = vpop.xlane.xlu0 %1833 }
 0xf0f   :  { %v1835_v28 = vsub.f32 %v1831_v40, %v1834_v5  ;;  %v7017_v40 = vld [vmem:[%s8546_s8 + $0x1] ss:$0 sm:$0xff]  ;;  %s9524_s8 = sld [smem:[#allocation9_spill]] }
 0xf11   :  { %v1836_v7 = vmul.f32 1.442695, %v1835_v28 }
 0xf12   :  { %v2001_v53 = vpop.xlane.xlu0 %2000 }
 0xf13   :  { %8280 = vpow2.f32 %v1836_v7  ;;  %v2002_v54 = vsub.f32 %v1998_v45, %v2001_v53  ;;  %v7024_v53 = vld [vmem:[%s8561_s24 + $0x20] sm:$0xff] }
 0xf15   :  { %v8277_v55 = vpop.eup %8276  ;;  %v2003_v56 = vmul.f32 1.442695, %v2002_v54  ;;  %v7025_v54 = vld [vmem:[%s8561_s24 + $0x28] sm:$0xff] }
 0xf16   :  { %v8279_v57 = vpop.eup %8278  ;;  %v1500_v58 = vsel %vm345_vm3, %v8277_v55, 0.0 }
 0xf17   :  { %8282 = vpow2.f32 %v2003_v56  ;;  %1501 = vadd.xlane.f32.xlu1 %v1500_v58  ;;  %v1667_v59 = vsel %vm345_vm3, %v8279_v57, 0.0  ;;  %v8022_v56 = vpack.c.bf16 %v7025_v54, %v7024_v53  ;;  %v161_v53 = vld [vmem:[%s9524_s8] sm:$0xff] }
 0xf18   :  { %1668 = vadd.xlane.f32.xlu0 %v1667_v59  ;;  %v2470_v59 = vld [vmem:[%s9521_s25] sm:$0xff] }
 0xf1d   :  { %v8281_v60 = vpop.eup %8280 }
 0xf1e   :  { %v1838_v61 = vsel %vm345_vm3, %v8281_v60, 0.0 }
 0xf1f   :  { %1839 = vadd.xlane.f32.xlu1 %v1838_v61 }
 0xf21   :  { %v8283_v62 = vpop.eup %8282 }
 0xf22   :  { %v2005_v63 = vsel %vm345_vm3, %v8283_v62, 0.0 }
 0xf23   :  { %2006 = vadd.xlane.f32.xlu0 %v2005_v63  ;;  %v7030_v63 = vld [vmem:[%s8571_s6 + $0x48] sm:$0xff] }
 0xf30   :  { %1843 = vrot.lane.b32.xlu1 %v8856_v18, %s8488_s0 }
 0xf34   :  { %2010 = vrot.lane.b32.xlu1 %v8856_v18, %s8492_s18 }
 0xf39   :  { %1672 = vrot.lane.b32.xlu0 %v8850_v17, %s8492_s18 }
 0xfa4   :  { %v1502_v0 = vpop.xlane.xlu1 %1501 }
 0xfa5   :  { %8284 = vrcp.f32 %v1502_v0  ;;  %v1669_v1 = vpop.xlane.xlu0 %1668  ;;  %v7031_v0 = vld [vmem:[%s8571_s6 + $0x50] sm:$0xff] }
 0xfa6   :  { %8286 = vrcp.f32 %v1669_v1 }
 0xfac   :  { %v1840_v2 = vpop.xlane.xlu1 %1839 }
 0xfad   :  { %8288 = vrcp.f32 %v1840_v2  ;;  %v7032_v2 = vld [vmem:[%s8571_s6 + $0x58] sm:$0xff] }
 0xfaf   :  { %v8285_v3 = vpop.eup %8284 }
 0xfb0   :  { %v2007_v4 = vpop.xlane.xlu0 %2006  ;;  %v1504_v6 = vmul.f32 %v8285_v3, %v8277_v55  ;;  %v8287_v9 = vpop.eup %8286  ;;  %v7026_v55 = vld [vmem:[%s8561_s24 + $0x30] sm:$0xff]  ;;  %v8034_v3 = vpack.c.bf16 %v7032_v2, %v7031_v0  ;;  %v162_v0 = vld [vmem:[%s9524_s8 + $0x8] sm:$0xff] }
 0xfb1   :  { %8290 = vrcp.f32 %v2007_v4  ;;  %v1844_v10 = vpop.permute.xlu1 %1843  ;;  %v1671_v15 = vmul.f32 %v8287_v9, %v8279_v57  ;;  %v7027_v57 = vld [vmem:[%s8561_s24 + $0x38] sm:$0xff]  ;;  %v7033_v4 = vld [vmem:[%s8571_s6 + $0x60] sm:$0xff]  ;;  %s9527_s24 = sld [smem:[#allocation17_spill]] }
 0xfb2   :  { %7552 = vmatmul.mubr.msk.f32.vlgmr.msra.gmra.mrb[18].mxu1 %vm345_vm3, %v1504_v6  ;;  %v8026_v58 = vpack.c.bf16 %v7027_v57, %v7026_v55  ;;  %v7034_v6 = vld [vmem:[%s8571_s6 + $0x68] sm:$0xff] }
 0xfb3   :  { %7561 = vmatprep.mubr.msk.f32.mxu1 %vm8487_vm1, %v8486_v8  ;;  %v8038_v9 = vpack.c.bf16 %v7034_v6, %v7033_v4 }
 0xfb4   :  { %v1673_v11 = vpop.permute.xlu0 %1672 }
 0xfb5   :  { %7560 = vmatpush3.msra.mxu1 %v1673_v11  ;;  %v2011_v17 = vpop.permute.xlu1 %2010 }
 0xfb6   :  { %7562 = vmatmul.mubr.msk.f32.vlgmr.msra.gmra.mrb[20].mxu1 %vm345_vm3, %v1671_v15  ;;  %7569 = vmatprep.subr.mxu1 %v8486_v8 }
 0xfb7   :  { %v8289_v13 = vpop.eup %8288  ;;  %7570 = vmatpush3.msra.mxu1 %v1844_v10  ;;  %7571 = vmatprep.mubr.msk.f32.mxu1 %vm8487_vm1, %v8486_v8 }
 0xfb8   :  { %7579 = vmatprep.subr.mxu1 %v8486_v8  ;;  %v1842_v16 = vmul.f32 %v8289_v13, %v8281_v60  ;;  %v2471_v60 = vld [vmem:[%s9521_s25 + $0x8] sm:$0xff] }
 0xfb9   :  { %v8046_v61 = vpack.c.bf16 %v2471_v60, %v2470_v59 }
 0xfba   :  { %7572 = vmatmul.mubr.msk.f32.vlgmr.msra.gmra.mrb[22].mxu1 %vm345_vm3, %v1842_v16 }
 0xfbb   :  { %v8291_v18 = vpop.eup %8290  ;;  %7580 = vmatpush3.msra.mxu1 %v2011_v17  ;;  %7581 = vmatprep.mubr.msk.f32.mxu1 %vm8487_vm1, %v8486_v8 }
 0xfbc   :  { %v2009_v19 = vmul.f32 %v8291_v18, %v8283_v62  ;;  %8023 = vmatprep.subr.bf16.mxu1 %v8022_v56  ;;  %v7029_v62 = vld [vmem:[%s8571_s6 + $0x40] sm:$0xff] }
 0xfbd   :  { %v8030_v1 = vpack.c.bf16 %v7030_v63, %v7029_v62 }
 0xfbe   :  { %7582 = vmatmul.mubr.msk.f32.vlgmr.msra.gmra.mrb[24].mxu1 %vm345_vm3, %v2009_v19  ;;  %v7022_v19 = vld [vmem:[%s8551_s14 + $0x1] ss:$0 sm:$0xff]  ;;  %s9525_s14 = sld [smem:[#allocation13_spill]] }
 0xfbf   :  { %8025 = vmatpush3.bf16.msra.mxu1 %v8022_v56  ;;  %8031 = vmatprep.subr.bf16.mxu0 %v8030_v1 }
 0xfc0   :  { %8027 = vmatprep.subr.bf16.mxu1 %v8026_v58 }
 0xfc3   :  { %8029 = vmatpush3.bf16.msra.mxu1 %v8026_v58 }
 0xfc4   :  { %8047 = vmatprep.subr.bf16.mxu1 %v8046_v61 }
0x1085   :  { %v1577_v27 = vpop.f32.mrb[18].mxu1 }
0x1086   :  { %v7553_v29 = vpop.f32.mrb[19].mxu1 }
0x1087   :  { %v2473_v29 = vld [vmem:[%s9521_s25 + $0x18] sm:$0xff] }
0x1089   :  { %v1744_v30 = vpop.f32.mrb[20].mxu1 }
0x108a   :  { %1749 = vrot.lane.b32.xlu0 %v1744_v30, %s8493_s13  ;;  %v7563_v31 = vpop.f32.mrb[21].mxu1 }
0x108d   :  { %v1915_v32 = vpop.f32.mrb[22].mxu1 }
0x108e   :  { %v7573_v33 = vpop.f32.mrb[23].mxu1 }
0x108f   :  { %v8958_v33 = vld [vmem:[%s9522_s29] sm:$0xff] }
0x1091   :  { %v2082_v34 = vpop.f32.mrb[24].mxu1 }
0x1092   :  { %2087 = vrot.lane.b32.xlu1 %v2082_v34, %s8493_s13  ;;  %v7583_v35 = vpop.f32.mrb[25].mxu1  ;;  %v8965_v34 = vld [vmem:[%s9522_s29 + $0x8] sm:$0xff] }
0x1093   :  { %v7035_v35 = vld [vmem:[%s8571_s6 + $0x70] sm:$0xff] }
0x10fc   :  { %v1750_v36 = vpop.permute.xlu0 %1749 }
0x10fd   :  { %v1752_v37 = vsel %vm268_vm2, %v1577_v27, %v1750_v36  ;;  %v2472_v27 = vld [vmem:[%s9521_s25 + $0x10] sm:$0xff]  ;;  %v7036_v36 = vld [vmem:[%s8571_s6 + $0x78] sm:$0xff]  ;;  %s9529_s6 = sld [smem:[#allocation15_spill]] }
0x10fe   :  { %7592 = vmatprep.mubr.msk.f32.mxu0 %vm183_vm0, %v1752_v37  ;;  %v8042_v37 = vpack.c.bf16 %v7036_v36, %v7035_v35 }
0x1104   :  { %v2088_v38 = vpop.permute.xlu1 %2087 }
0x1105   :  { %v2090_v39 = vsel %vm268_vm2, %v1915_v32, %v2088_v38  ;;  %v8050_v32 = vpack.c.bf16 %v2473_v29, %v2472_v27  ;;  %v7038_v38 = vld [vmem:[%s8566_s30 + $0x1] ss:$0 sm:$0xff]  ;;  %s9528_s30 = sld [smem:[#allocation18_spill]] }
0x1106   :  { %7593 = vmatmul.mubr.msk.f32.vlgmr.msra.gmra.mrb[16].mxu0 %vm183_vm0, %v2090_v39 }
0x1107   :  { %8033 = vmatpush3.bf16.msra.mxu0 %v8030_v1 }
0x1108   :  { %8035 = vmatprep.subr.bf16.mxu0 %v8034_v3 }
0x110b   :  { %8037 = vmatpush3.bf16.msra.mxu0 %v8034_v3 }
0x110c   :  { %8039 = vmatprep.subr.bf16.mxu0 %v8038_v9 }
0x110f   :  { %8041 = vmatpush3.bf16.msra.mxu0 %v8038_v9 }
0x1110   :  { %8043 = vmatprep.subr.bf16.mxu0 %v8042_v37 }
0x1113   :  { %8045 = vmatpush3.bf16.msra.mxu0 %v8042_v37 }
0x1114   :  { %7646 = vmatprep.subr.mxu0 %v8486_v8 }
0x11d9   :  { %v7594_v41 = vpop.f32.mrb[16].mxu0 }
0x11da   :  { %v2175_v42 = vadd.f32 %v7594_v41, %v7017_v40  ;;  %v2169_v43 = vpop.f32.mrb[17].mxu0 }
0x11db   :  { %v2170_v44 = vadd.f32 %v7017_v40, %v2169_v43 }
0x11dc   :  { %v2179_v45 = vadd.f32 %v2175_v42, %v8841_v14 }
0x11dd   :  { %v2178_v20 = vadd.f32 %v2170_v44, %v8839_v12 }
0x11de   :  { %v2187_v46 = vsel %vm183_vm0, %v2179_v45, 0.0 }
0x11df   :  { %2188 = vadd.xlane.f32.xlu1 %v2187_v46  ;;  %v2184_v47 = vsel %vm183_vm0, %v2178_v20, 0.0 }
0x11e0   :  { %2185 = vadd.xlane.f32.xlu0 %v2184_v47 }
0x126c   :  { %v2189_v48 = vpop.xlane.xlu1 %2188 }
0x126d   :  { %v2191_v49 = vmul.f32 0.03125, %v2189_v48  ;;  %v2186_v50 = vpop.xlane.xlu0 %2185 }
0x126e   :  { %v2190_v51 = vmul.f32 0.03125, %v2186_v50 }
0x126f   :  { %v2193_v52 = vsub.f32 %v2179_v45, %v2191_v49  ;;  %v7048_v45 = vld [vmem:[%s9523_s3] ss:$0 sm:$0xff] }
0x1270   :  { %v2192_v5 = vsub.f32 %v2178_v20, %v2190_v51 }
0x1271   :  { %v2195_v14 = vmul.f32 %v2193_v52, %v2193_v52 }
0x1272   :  { %v2194_v28 = vmul.f32 %v2192_v5, %v2192_v5 }
0x1273   :  { %v2199_v7 = vsel %vm183_vm0, %v2195_v14, 0.0 }
0x1274   :  { %v2196_v12 = vsel %vm183_vm0, %v2194_v28, 0.0 }
0x1275   :  { %2197 = vadd.xlane.f32.xlu0 %v2196_v12 }
0x1279   :  { %2200 = vadd.xlane.f32.xlu0 %v2199_v7 }
0x1302   :  { %v2198_v10 = vpop.xlane.xlu0 %2197 }
0x1303   :  { %v2202_v11 = vmul.f32 0.03125, %v2198_v10 }
0x1305   :  { %v2204_v15 = vadd.f32 1e-05, %v2202_v11 }
0x1306   :  { %v2201_v13 = vpop.xlane.xlu0 %2200 }
0x1307   :  { %8292 = vrsqrt.f32 %v2204_v15  ;;  %v2203_v16 = vmul.f32 0.03125, %v2201_v13 }
0x1309   :  { %v2205_v17 = vadd.f32 1e-05, %v2203_v16 }
0x130b   :  { %8294 = vrsqrt.f32 %v2205_v17 }
0x1311   :  { %v8293_v18 = vpop.eup %8292 }
0x1312   :  { %v2208_v21 = vmul.f32 %v8293_v18, %v2192_v5 }
0x1314   :  { %v2216_v23 = vmul.f32 %v7022_v19, %v2208_v21 }
0x1315   :  { %v8295_v24 = vpop.eup %8294 }
0x1316   :  { %v2209_v25 = vmul.f32 %v8295_v24, %v2193_v52  ;;  %v8949_v26 = vadd.f32 %v7023_v22, %v2216_v23 }
0x1318   :  { %v2217_v30 = vmul.f32 %v7022_v19, %v2209_v25  ;;  %7603 = vmatprep.mubr.msk.f32.mxu1 %vm183_vm0, %v8949_v26 }
0x131a   :  { %v8955_v31 = vadd.f32 %v7023_v22, %v2217_v30 }
0x131c   :  { %7604 = vmatmul.mubr.msk.f32.vlgmr.msra.gmra.mrb[26].mxu1 %vm183_vm0, %v8955_v31 }
0x131d   :  { %8049 = vmatpush3.bf16.msra.mxu1 %v8046_v61  ;;  %7633 = vmatprep.mubr.msk.f32.mxu1 %vm183_vm0, %v8958_v33 }
0x131e   :  { %8051 = vmatprep.subr.bf16.mxu1 %v8050_v32 }
0x1321   :  { %8053 = vmatpush3.bf16.msra.mxu1 %v8050_v32 }
0x1322   :  { %7636 = vmatprep.subr.mxu1 %v8486_v8 }
0x1324   :  { %7634 = vmatmul.mubr.msk.f32.vlgmr.msra.gmra.mrb[28].mxu1 %vm183_vm0, %v8965_v34 }
0x1325   :  { %7638 = vmatprep.mubr.msk.f32.mxu1 %vm8487_vm1, %v8486_v8 }
0x13ef   :  { %v7605_v39 = vpop.f32.mrb[26].mxu1 }
0x13f0   :  { %v2328_v40 = vadd.f32 %v7605_v39, %v7038_v38  ;;  %v2322_v41 = vpop.f32.mrb[27].mxu1 }
0x13f1   :  { %v2323_v42 = vadd.f32 %v7038_v38, %v2322_v41 }
0x13f2   :  { %v2332_v44 = vmax.f32 %v2328_v40, 0.0 }
0x13f3   :  { %v2331_v43 = vmax.f32 %v2323_v42, 0.0 }
0x13f5   :  { %7622 = vmatprep.mubr.msk.f32.mxu0 %vm1186_vm4, %v2331_v43 }
0x13f6   :  { %7623 = vmatmul.mubr.msk.f32.vlgmr.msra.gmra.mrb[18].mxu0 %vm1186_vm4, %v2332_v44 }
0x13f7   :  { %v7635_v20 = vpop.f32.mrb[28].mxu1  ;;  %7648 = vmatprep.mubr.msk.f32.mxu0 %vm8487_vm1, %v8486_v8 }
0x13f8   :  { %v2558_v46 = vpop.f32.mrb[29].mxu1  ;;  %v8987_v48 = vadd.f32 %v7635_v20, %v7048_v45 }
0x13f9   :  { %v8981_v47 = vadd.f32 %v7048_v45, %v2558_v46 }
0x13fb   :  { %2735 = vrot.lane.b32.xlu0 %v8981_v47, %s8490_s15  ;;  %2568 = vrot.lane.b32.xlu1 %v8981_v47, %s8489_s5 }
0x13ff   :  { %3073 = vrot.lane.b32.xlu0 %v8987_v48, %s8490_s15  ;;  %2733 = vrot.lane.b32.xlu1 %v8981_v47, %s8491_s16 }
0x1403   :  { %2906 = vrot.lane.b32.xlu1 %v8987_v48, %s8489_s5 }
0x1407   :  { %3071 = vrot.lane.b32.xlu1 %v8987_v48, %s8491_s16 }
0x146d   :  { %v2736_v49 = vpop.permute.xlu0 %2735  ;;  %v2569_v50 = vpop.permute.xlu1 %2568 }
0x146e   :  { %7637 = vmatpush3.xpose.msk.msra.mxu1 %vm268_vm2, %v2569_v50  ;;  %7647 = vmatpush3.xpose.msk.msra.mxu0 %vm268_vm2, %v2736_v49 }
0x146f   :  { %7656 = vmatprep.subr.mxu0 %v8486_v8  ;;  %7641 = vmatprep.subr.mxu1 %v8486_v8 }
0x1471   :  { %7639 = vmatmul.mubr.msk.f32.vlgmr.msra.gmra.mrb[30].mxu1 %vm268_vm2, %v8981_v47  ;;  %v2734_v51 = vpop.permute.xlu1 %2733  ;;  %v3074_v5 = vpop.permute.xlu0 %3073 }
0x1472   :  { %7649 = vmatmul.mubr.msk.f32.vlgmr.msra.gmra.mrb[20].mxu0 %vm268_vm2, %v2734_v51  ;;  %7643 = vmatprep.mubr.msk.f32.mxu1 %vm8487_vm1, %v8486_v8 }
0x1473   :  { %7658 = vmatprep.mubr.msk.f32.mxu0 %vm8487_vm1, %v8486_v8 }
0x1475   :  { %v2907_v52 = vpop.permute.xlu1 %2906 }
0x1476   :  { %7657 = vmatpush3.xpose.msk.msra.mxu0 %vm268_vm2, %v2907_v52 }
0x1477   :  { %7666 = vmatprep.subr.mxu0 %v8486_v8 }
0x1479   :  { %7659 = vmatmul.mubr.msk.f32.vlgmr.msra.gmra.mrb[22].mxu0 %vm268_vm2, %v8987_v48  ;;  %v3072_v28 = vpop.permute.xlu1 %3071 }
0x147a   :  { %7667 = vmatpush3.xpose.msk.msra.mxu0 %vm268_vm2, %v3074_v5  ;;  %7668 = vmatprep.mubr.msk.f32.mxu0 %vm8487_vm1, %v8486_v8 }
0x147d   :  { %7669 = vmatmul.mubr.msk.f32.vlgmr.msra.gmra.mrb[24].mxu0 %vm268_vm2, %v3072_v28 }
0x14c9   :  { %v9016_v12 = vpop.f32.mrb[18].mxu0 }
0x14ca   :  { %v9018_v14 = vpop.f32.mrb[19].mxu0 }
0x1544   :  { %v2640_v7 = vpop.f32.mrb[30].mxu1 }
0x1545   :  { %v2644_v54 = vmul.f32 0.25, %v2640_v7  ;;  %v7640_v55 = vpop.f32.mrb[31].mxu1  ;;  %v2807_v56 = vpop.f32.mrb[20].mxu0 }
0x1546   :  { %v2811_v57 = vmul.f32 0.25, %v2807_v56  ;;  %v7650_v58 = vpop.f32.mrb[21].mxu0  ;;  %v2477_v56 = vld [vmem:[%s9525_s14 + $0x10] sm:$0xff] }
0x1547   :  { %v2645_v59 = vadd.f32 %v2644_v54, %v161_v53  ;;  %v2476_v54 = vld [vmem:[%s9525_s14 + $0x8] sm:$0xff] }
0x1548   :  { %v2812_v60 = vadd.f32 %v2811_v57, %v161_v53  ;;  %v2475_v53 = vld [vmem:[%s9525_s14] sm:$0xff]  ;;  %v2478_v57 = vld [vmem:[%s9525_s14 + $0x18] sm:$0xff] }
0x1549   :  { %v2646_v61 = vsel %vm345_vm3, %v2645_v59, -inf  ;;  %v8054_v55 = vpack.c.bf16 %v2476_v54, %v2475_v53  ;;  %v8058_v58 = vpack.c.bf16 %v2478_v57, %v2477_v56  ;;  %v3376_v53 = vld [vmem:[%s9527_s24] sm:$0xff]  ;;  %v3377_v54 = vld [vmem:[%s9527_s24 + $0x8] sm:$0xff]  ;;  %v3378_v56 = vld [vmem:[%s9527_s24 + $0x10] sm:$0xff] }
0x154a   :  { %2647 = vmax.xlane.f32.xlu0 %v2646_v61  ;;  %v2813_v62 = vsel %vm345_vm3, %v2812_v60, -inf  ;;  %v3379_v57 = vld [vmem:[%s9527_s24 + $0x18] sm:$0xff] }
0x154b   :  { %2814 = vmax.xlane.f32.xlu1 %v2813_v62  ;;  %8055 = vmatprep.subr.bf16.mxu0 %v8054_v55 }
0x154c   :  { %v2978_v63 = vpop.f32.mrb[22].mxu0  ;;  %8057 = vmatpush3.bf16.msra.mxu0 %v8054_v55  ;;  %v8232_v55 = vpack.i.bf16 %v3377_v54, %v3376_v53 }
0x154d   :  { %v2982_v1 = vmul.f32 0.25, %v2978_v63  ;;  %v7660_v2 = vpop.f32.mrb[23].mxu0  ;;  %8059 = vmatprep.subr.bf16.mxu0 %v8058_v58 }
0x154f   :  { %v2983_v3 = vadd.f32 %v2982_v1, %v162_v0 }
0x1550   :  { %v3145_v4 = vpop.f32.mrb[24].mxu0  ;;  %8061 = vmatpush3.bf16.msra.mxu0 %v8058_v58  ;;  %v8237_v58 = vpack.i.bf16 %v3379_v57, %v3378_v56 }
0x1551   :  { %v3149_v6 = vmul.f32 0.25, %v3145_v4  ;;  %v7670_v9 = vpop.f32.mrb[25].mxu0  ;;  %v2984_v10 = vsel %vm345_vm3, %v2983_v3, -inf }
0x1552   :  { %2985 = vmax.xlane.f32.xlu0 %v2984_v10 }
0x1553   :  { %v3150_v11 = vadd.f32 %v3149_v6, %v162_v0 }
0x1555   :  { %v3151_v15 = vsel %vm345_vm3, %v3150_v11, -inf }
0x1556   :  { %3152 = vmax.xlane.f32.xlu0 %v3151_v15 }
0x155c   :  { %2657 = vrot.lane.b32.xlu1 %v8981_v47, %s8488_s0 }
0x15d7   :  { %v2648_v13 = vpop.xlane.xlu0 %2647 }
0x15d8   :  { %v2649_v16 = vsub.f32 %v2645_v59, %v2648_v13  ;;  %v2815_v17 = vpop.xlane.xlu1 %2814 }
0x15d9   :  { %v2816_v18 = vsub.f32 %v2812_v60, %v2815_v17 }
0x15da   :  { %v2650_v19 = vmul.f32 1.442695, %v2649_v16 }
0x15db   :  { %v2817_v21 = vmul.f32 1.442695, %v2816_v18 }
0x15dc   :  { %8296 = vpow2.f32 %v2650_v19  ;;  %v2658_v22 = vpop.permute.xlu1 %2657 }
0x15dd   :  { %8298 = vpow2.f32 %v2817_v21  ;;  %7642 = vmatpush3.msra.mxu1 %v2658_v22 }
0x15de   :  { %7651 = vmatprep.subr.mxu1 %v8486_v8 }
0x15df   :  { %v2986_v23 = vpop.xlane.xlu0 %2985 }
0x15e0   :  { %v2987_v24 = vsub.f32 %v2983_v3, %v2986_v23  ;;  %v7041_v3 = vld [vmem:[%s8576_s12 + $0x1] ss:$0 sm:$0xff]  ;;  %s9530_s12 = sld [smem:[#allocation16_spill]] }
0x15e1   :  { %v2412_v4 = vadd.f32 %v7041_v3, %v9018_v14  ;;  %v2417_v10 = vadd.f32 %v9016_v12, %v7041_v3 }
0x15e2   :  { %v2988_v25 = vmul.f32 1.442695, %v2987_v24 }
0x15e3   :  { %v3153_v27 = vpop.xlane.xlu0 %3152  ;;  %v2420_v6 = vadd.f32 %v2412_v4, %v8949_v26 }
0x15e4   :  { %8300 = vpow2.f32 %v2988_v25  ;;  %v3154_v29 = vsub.f32 %v3150_v11, %v3153_v27  ;;  %v2421_v11 = vadd.f32 %v2417_v10, %v8955_v31  ;;  %v7063_v25 = vld [vmem:[%s9526_s19] ss:$0 sm:$0xff] }
0x15e5   :  { %v2426_v9 = vsel %vm183_vm0, %v2420_v6, 0.0 }
0x15e6   :  { %v8297_v30 = vpop.eup %8296  ;;  %v3155_v32 = vmul.f32 1.442695, %v3154_v29  ;;  %v2429_v15 = vsel %vm183_vm0, %v2421_v11, 0.0 }
0x15e7   :  { %v8299_v35 = vpop.eup %8298  ;;  %v2652_v36 = vsel %vm345_vm3, %v8297_v30, 0.0 }
0x15e8   :  { %8302 = vpow2.f32 %v3155_v32  ;;  %2653 = vadd.xlane.f32.xlu1 %v2652_v36  ;;  %v2819_v37 = vsel %vm345_vm3, %v8299_v35, 0.0  ;;  %v9071_v32 = vld [vmem:[%s8581_s20 + $0x1] ss:$0 sm:$0xff]  ;;  %s9531_s20 = sld [smem:[#allocation10_spill]] }
0x15e9   :  { %2820 = vadd.xlane.f32.xlu0 %v2819_v37 }
0x15ee   :  { %v8301_v38 = vpop.eup %8300 }
0x15ef   :  { %v2990_v39 = vsel %vm345_vm3, %v8301_v38, 0.0 }
0x15f0   :  { %2991 = vadd.xlane.f32.xlu1 %v2990_v39  ;;  %v9074_v39 = vld [vmem:[%s8586_s27 + $0x1] ss:$0 sm:$0xff]  ;;  %s9532_s27 = sld [smem:[#allocation19_spill]] }
0x15f2   :  { %v8303_v40 = vpop.eup %8302 }
0x15f3   :  { %v3157_v41 = vsel %vm345_vm3, %v8303_v40, 0.0 }
0x15f4   :  { %3158 = vadd.xlane.f32.xlu0 %v3157_v41 }
0x1601   :  { %2995 = vrot.lane.b32.xlu1 %v8987_v48, %s8488_s0 }
0x1605   :  { %3162 = vrot.lane.b32.xlu1 %v8987_v48, %s8492_s18 }
0x160a   :  { %2824 = vrot.lane.b32.xlu0 %v8981_v47, %s8492_s18 }
0x1675   :  { %v2654_v42 = vpop.xlane.xlu1 %2653 }
0x1676   :  { %8304 = vrcp.f32 %v2654_v42  ;;  %v2821_v43 = vpop.xlane.xlu0 %2820 }
0x1677   :  { %8306 = vrcp.f32 %v2821_v43 }
0x167d   :  { %v2992_v44 = vpop.xlane.xlu1 %2991 }
0x167e   :  { %8308 = vrcp.f32 %v2992_v44 }
0x1680   :  { %v8305_v45 = vpop.eup %8304 }
0x1681   :  { %v3159_v20 = vpop.xlane.xlu0 %3158  ;;  %v2656_v46 = vmul.f32 %v8305_v45, %v8297_v30  ;;  %v8307_v49 = vpop.eup %8306 }
0x1682   :  { %8310 = vrcp.f32 %v3159_v20  ;;  %v2996_v48 = vpop.permute.xlu1 %2995  ;;  %v2823_v51 = vmul.f32 %v8307_v49, %v8299_v35 }
0x1683   :  { %7644 = vmatmul.mubr.msk.f32.vlgmr.msra.gmra.mrb[32].mxu1 %vm345_vm3, %v2656_v46 }
0x1684   :  { %7653 = vmatprep.mubr.msk.f32.mxu1 %vm8487_vm1, %v8486_v8 }
0x1685   :  { %v2825_v50 = vpop.permute.xlu0 %2824 }
0x1686   :  { %7652 = vmatpush3.msra.mxu1 %v2825_v50  ;;  %v3163_v5 = vpop.permute.xlu1 %3162 }
0x1687   :  { %7654 = vmatmul.mubr.msk.f32.vlgmr.msra.gmra.mrb[34].mxu1 %vm345_vm3, %v2823_v51  ;;  %7661 = vmatprep.subr.mxu1 %v8486_v8 }
0x1688   :  { %v8309_v47 = vpop.eup %8308  ;;  %7662 = vmatpush3.msra.mxu1 %v2996_v48  ;;  %7663 = vmatprep.mubr.msk.f32.mxu1 %vm8487_vm1, %v8486_v8 }
0x1689   :  { %7671 = vmatprep.subr.mxu1 %v8486_v8  ;;  %v2994_v52 = vmul.f32 %v8309_v47, %v8301_v38 }
0x168b   :  { %7664 = vmatmul.mubr.msk.f32.vlgmr.msra.gmra.mrb[36].mxu1 %vm345_vm3, %v2994_v52 }
0x168c   :  { %v8311_v28 = vpop.eup %8310  ;;  %7672 = vmatpush3.msra.mxu1 %v3163_v5  ;;  %7673 = vmatprep.mubr.msk.f32.mxu1 %vm8487_vm1, %v8486_v8 }
0x168d   :  { %v3161_v7 = vmul.f32 %v8311_v28, %v8303_v40 }
0x168f   :  { %7674 = vmatmul.mubr.msk.f32.vlgmr.msra.gmra.mrb[38].mxu1 %vm345_vm3, %v3161_v7 }
0x1756   :  { %v2729_v59 = vpop.f32.mrb[32].mxu1 }
0x1757   :  { %v7645_v60 = vpop.f32.mrb[33].mxu1 }
0x1758   :  { %v8066_v60 = vpack.c.bf16 %v3379_v57, %v3378_v56 }
0x175a   :  { %v2896_v61 = vpop.f32.mrb[34].mxu1 }
0x175b   :  { %2901 = vrot.lane.b32.xlu0 %v2896_v61, %s8493_s13  ;;  %v7655_v62 = vpop.f32.mrb[35].mxu1  ;;  %v7068_v61 = vld [vmem:[%s9528_s30] ss:$0 sm:$0xff] }
0x175e   :  { %v3067_v63 = vpop.f32.mrb[36].mxu1 }
0x175f   :  { %v7665_v0 = vpop.f32.mrb[37].mxu1 }
0x1762   :  { %v3234_v1 = vpop.f32.mrb[38].mxu1 }
0x1763   :  { %3239 = vrot.lane.b32.xlu1 %v3234_v1, %s8493_s13  ;;  %v7675_v2 = vpop.f32.mrb[39].mxu1 }
0x177a   :  { %2427 = vadd.xlane.f32.xlu0 %v2426_v9 }
0x1787   :  { %2430 = vadd.xlane.f32.xlu1 %v2429_v15 }
0x17cd   :  { %v2902_v13 = vpop.permute.xlu0 %2901 }
0x17ce   :  { %v2904_v16 = vsel %vm268_vm2, %v2729_v59, %v2902_v13  ;;  %v8062_v59 = vpack.c.bf16 %v3377_v54, %v3376_v53 }
0x17cf   :  { %7684 = vmatprep.mubr.msk.f32.mxu0 %vm183_vm0, %v2904_v16 }
0x17d0   :  { %8063 = vmatprep.subr.bf16.mxu1 %v8062_v59 }
0x17d1   :  { %8065 = vmatpush3.bf16.msra.mxu1 %v8062_v59 }
0x17d2   :  { %8067 = vmatprep.subr.bf16.mxu1 %v8066_v60 }
0x17d5   :  { %v3240_v17 = vpop.permute.xlu1 %3239  ;;  %8069 = vmatpush3.bf16.msra.mxu1 %v8066_v60 }
0x17d6   :  { %v3242_v14 = vsel %vm268_vm2, %v3067_v63, %v3240_v17  ;;  %7709 = vmatprep.subr.mxu1 %v8486_v8 }
0x17d7   :  { %7685 = vmatmul.mubr.msk.f32.vlgmr.msra.gmra.mrb[26].mxu0 %vm183_vm0, %v3242_v14 }
0x1807   :  { %v2428_v26 = vpop.xlane.xlu0 %2427 }
0x1808   :  { %v2432_v18 = vmul.f32 0.03125, %v2428_v26 }
0x180a   :  { %v2434_v12 = vsub.f32 %v2420_v6, %v2432_v18 }
0x180c   :  { %v2436_v19 = vmul.f32 %v2434_v12, %v2434_v12 }
0x180e   :  { %v2438_v31 = vsel %vm183_vm0, %v2436_v19, 0.0 }
0x180f   :  { %2439 = vadd.xlane.f32.xlu1 %v2438_v31 }
0x1814   :  { %v2431_v21 = vpop.xlane.xlu1 %2430 }
0x1815   :  { %v2433_v35 = vmul.f32 0.03125, %v2431_v21 }
0x1817   :  { %v2435_v42 = vsub.f32 %v2421_v11, %v2433_v35 }
0x1819   :  { %v2437_v46 = vmul.f32 %v2435_v42, %v2435_v42 }
0x189c   :  { %v2440_v22 = vpop.xlane.xlu1 %2439 }
0x189d   :  { %v2444_v23 = vmul.f32 0.03125, %v2440_v22  ;;  %v7066_v22 = vld [vmem:[%s9529_s6] ss:$0 sm:$0xff] }
0x189f   :  { %v2446_v24 = vadd.f32 1e-05, %v2444_v23 }
0x18a1   :  { %8312 = vrsqrt.f32 %v2446_v24  ;;  %v7067_v24 = vld [vmem:[%s9530_s12] ss:$0 sm:$0xff] }
0x18aa   :  { %v7686_v27 = vpop.f32.mrb[26].mxu0 }
0x18ab   :  { %v8313_v29 = vpop.eup %8312  ;;  %v3321_v30 = vpop.f32.mrb[27].mxu0  ;;  %v3327_v36 = vadd.f32 %v7686_v27, %v7063_v25 }
0x18ac   :  { %v3322_v37 = vadd.f32 %v7063_v25, %v3321_v30  ;;  %v2450_v38 = vmul.f32 %v8313_v29, %v2434_v12 }
0x18ad   :  { %v3331_v45 = vadd.f32 %v3327_v36, %v8965_v34 }
0x18ae   :  { %v3330_v40 = vadd.f32 %v3322_v37, %v8958_v33  ;;  %v2458_v41 = vmul.f32 %v9071_v32, %v2450_v38  ;;  %v2441_v33 = vsel %vm183_vm0, %v2437_v46, 0.0 }
0x18af   :  { %v3337_v20 = vsel %vm183_vm0, %v3331_v45, 0.0 }
0x18b0   :  { %v3334_v43 = vsel %vm183_vm0, %v3330_v40, 0.0  ;;  %v9080_v44 = vadd.f32 %v9074_v39, %v2458_v41 }
0x18b1   :  { %3335 = vadd.xlane.f32.xlu0 %v3334_v43 }
0x18b2   :  { %7706 = vmatprep.mubr.msk.f32.mxu0 %vm183_vm0, %v9080_v44 }
0x18b5   :  { %3338 = vadd.xlane.f32.xlu0 %v3337_v20 }
0x18b9   :  { %2442 = vadd.xlane.f32.xlu0 %v2441_v33 }
0x193e   :  { %v3336_v49 = vpop.xlane.xlu0 %3335 }
0x193f   :  { %v3340_v48 = vmul.f32 0.03125, %v3336_v49 }
0x1941   :  { %v3342_v50 = vsub.f32 %v3330_v40, %v3340_v48 }
0x1942   :  { %v3339_v51 = vpop.xlane.xlu0 %3338 }
0x1943   :  { %v3341_v34 = vmul.f32 0.03125, %v3339_v51  ;;  %v3344_v47 = vmul.f32 %v3342_v50, %v3342_v50 }
0x1945   :  { %v3343_v52 = vsub.f32 %v3331_v45, %v3341_v34  ;;  %v3346_v5 = vsel %vm183_vm0, %v3344_v47, 0.0 }
0x1946   :  { %3347 = vadd.xlane.f32.xlu1 %v3346_v5  ;;  %v2443_v62 = vpop.xlane.xlu0 %2442 }
0x1947   :  { %v3345_v28 = vmul.f32 %v3343_v52, %v3343_v52  ;;  %v2445_v63 = vmul.f32 0.03125, %v2443_v62 }
0x1949   :  { %v3349_v7 = vsel %vm183_vm0, %v3345_v28, 0.0  ;;  %v2447_v0 = vadd.f32 1e-05, %v2445_v63 }
0x194a   :  { %3350 = vadd.xlane.f32.xlu0 %v3349_v7 }
0x194b   :  { %8314 = vrsqrt.f32 %v2447_v0 }
0x1955   :  { %v8315_v4 = vpop.eup %8314 }
0x1956   :  { %v2451_v13 = vmul.f32 %v8315_v4, %v2435_v42 }
0x1957   :  { %8233 = vrot.lane.b32.xlu1 %v8232_v55, %s8489_s5  ;;  %v164_v55 = vld [vmem:[%s9531_s20 + $0x8] sm:$0xff] }
0x1958   :  { %v2459_v19 = vmul.f32 %v9071_v32, %v2451_v13 }
0x195a   :  { %v9100_v21 = vadd.f32 %v9074_v39, %v2459_v19 }
0x195b   :  { %3489 = vrot.lane.b32.xlu1 %v7068_v61, %s8489_s5 }
0x1960   :  { %8238 = vrot.lane.b32.xlu0 %v8237_v58, %s8489_s5 }
0x19d3   :  { %v3348_v1 = vpop.xlane.xlu1 %3347 }
0x19d4   :  { %v3352_v2 = vmul.f32 0.03125, %v3348_v1 }
0x19d6   :  { %v3354_v3 = vadd.f32 1e-05, %v3352_v2 }
0x19d7   :  { %v8234_v6 = vpop.permute.xlu1 %8233  ;;  %v3351_v9 = vpop.xlane.xlu0 %3350 }
0x19d8   :  { %8316 = vrsqrt.f32 %v3354_v3  ;;  %v8236_v10 = vunpack.i.h.bf16 %v8234_v6  ;;  %v8235_v11 = vunpack.i.l.bf16 %v8234_v6  ;;  %v3353_v15 = vmul.f32 0.03125, %v3351_v9 }
0x19da   :  { %v8070_v16 = vpack.c.bf16 %v8236_v10, %v8235_v11  ;;  %v3355_v17 = vadd.f32 1e-05, %v3353_v15 }
0x19db   :  { %v8239_v14 = vpop.permute.xlu0 %8238  ;;  %v3490_v36 = vpop.permute.xlu1 %3489 }
0x19dc   :  { %8318 = vrsqrt.f32 %v3355_v17  ;;  %v8241_v26 = vunpack.i.h.bf16 %v8239_v14  ;;  %v8240_v18 = vunpack.i.l.bf16 %v8239_v14  ;;  %8071 = vmatprep.subr.bf16.mxu0 %v8070_v16 }
0x19dd   :  { %8073 = vmatpush3.bf16.msra.mxu0 %v8070_v16 }
0x19de   :  { %v8074_v12 = vpack.c.bf16 %v8241_v26, %v8240_v18 }
0x19e0   :  { %8075 = vmatprep.subr.bf16.mxu0 %v8074_v12 }
0x19e1   :  { %8077 = vmatpush3.bf16.msra.mxu0 %v8074_v12 }
0x19e2   :  { %v8317_v31 = vpop.eup %8316  ;;  %7719 = vmatprep.subr.mxu0 %v8486_v8 }
0x19e3   :  { %v3358_v23 = vmul.f32 %v8317_v31, %v3342_v50  ;;  %v163_v50 = vld [vmem:[%s9531_s20] sm:$0xff] }
0x19e4   :  { %7707 = vmatmul.mubr.msk.f32.vlgmr.msra.gmra.mrb[28].mxu0 %vm183_vm0, %v9100_v21 }
0x19e5   :  { %v3366_v25 = vmul.f32 %v7066_v22, %v3358_v23  ;;  %7721 = vmatprep.mubr.msk.f32.mxu0 %vm8487_vm1, %v8486_v8 }
0x19e6   :  { %v8319_v27 = vpop.eup %8318 }
0x19e7   :  { %v3359_v29 = vmul.f32 %v8319_v27, %v3343_v52  ;;  %v9109_v30 = vadd.f32 %v7067_v24, %v3366_v25 }
0x19e9   :  { %v3367_v32 = vmul.f32 %v7066_v22, %v3359_v29  ;;  %7695 = vmatprep.mubr.msk.f32.mxu1 %vm183_vm0, %v9109_v30 }
0x19eb   :  { %v9113_v35 = vadd.f32 %v7067_v24, %v3367_v32 }
0x19ed   :  { %7696 = vmatmul.mubr.msk.f32.vlgmr.msra.gmra.mrb[40].mxu1 %vm183_vm0, %v9113_v35 }
0x19ee   :  { %7711 = vmatprep.mubr.msk.f32.mxu1 %vm8487_vm1, %v8486_v8 }
0x1ab7   :  { %v7708_v37 = vpop.f32.mrb[28].mxu0 }
0x1ab8   :  { %v3564_v38 = vpop.f32.mrb[29].mxu0  ;;  %v9122_v40 = vadd.f32 %v7708_v37, %v3490_v36 }
0x1ab9   :  { %v3565_v39 = vadd.f32 %v3564_v38, %v3490_v36 }
0x1abb   :  { %3740 = vrot.lane.b32.xlu1 %v3565_v39, %s8491_s16  ;;  %7710 = vmatpush3.xpose.msk.msra.mxu1 %vm268_vm2, %v3565_v39 }
0x1abc   :  { %7714 = vmatprep.subr.mxu1 %v8486_v8 }
0x1abf   :  { %4077 = vrot.lane.b32.xlu1 %v9122_v40, %s8491_s16 }
0x1ac0   :  { %v7697_v41 = vpop.f32.mrb[40].mxu1 }
0x1ac1   :  { %v3464_v42 = vpop.f32.mrb[41].mxu1  ;;  %v3470_v45 = vadd.f32 %v7697_v41, %v7068_v61 }
0x1ac2   :  { %v3465_v43 = vadd.f32 %v7068_v61, %v3464_v42 }
0x1ac4   :  { %3738 = vrot.lane.b32.xlu0 %v3465_v43, %s8491_s16  ;;  %7712 = vmatmul.mubr.msk.f32.vlgmr.msra.gmra.mrb[42].mxu1 %vm268_vm2, %v3465_v43 }
0x1ac5   :  { %7716 = vmatprep.mubr.msk.f32.mxu1 %vm8487_vm1, %v8486_v8 }
0x1ac8   :  { %4075 = vrot.lane.b32.xlu0 %v3470_v45, %s8491_s16 }
0x1b2d   :  { %v3741_v20 = vpop.permute.xlu1 %3740 }
0x1b2e   :  { %7720 = vmatpush3.xpose.msk.msra.mxu0 %vm268_vm2, %v3741_v20 }
0x1b2f   :  { %7729 = vmatprep.subr.mxu0 %v8486_v8 }
0x1b31   :  { %v4078_v33 = vpop.permute.xlu1 %4077 }
0x1b36   :  { %v3739_v46 = vpop.permute.xlu0 %3738 }
0x1b37   :  { %7722 = vmatmul.mubr.msk.f32.vlgmr.msra.gmra.mrb[30].mxu0 %vm268_vm2, %v3739_v46 }
0x1b38   :  { %7730 = vmatpush3.xpose.msk.msra.mxu0 %vm268_vm2, %v9122_v40  ;;  %7731 = vmatprep.mubr.msk.f32.mxu0 %vm8487_vm1, %v8486_v8 }
0x1b39   :  { %7739 = vmatprep.subr.mxu0 %v8486_v8 }
0x1b3a   :  { %v4076_v49 = vpop.permute.xlu0 %4075 }
0x1b3b   :  { %7732 = vmatmul.mubr.msk.f32.vlgmr.msra.gmra.mrb[32].mxu0 %vm268_vm2, %v3470_v45 }
0x1b3c   :  { %7740 = vmatpush3.xpose.msk.msra.mxu0 %vm268_vm2, %v4078_v33  ;;  %7741 = vmatprep.mubr.msk.f32.mxu0 %vm8487_vm1, %v8486_v8 }
0x1b3f   :  { %7742 = vmatmul.mubr.msk.f32.vlgmr.msra.gmra.mrb[34].mxu0 %vm268_vm2, %v4076_v49 }
0x1b97   :  { %v3645_v48 = vpop.f32.mrb[42].mxu1 }
0x1b98   :  { %v3649_v51 = vmul.f32 0.25, %v3645_v48  ;;  %v7713_v34 = vpop.f32.mrb[43].mxu1 }
0x1b9a   :  { %v3650_v47 = vadd.f32 %v3649_v51, %v163_v50  ;;  %v3382_v51 = vld [vmem:[%s9532_s27 + $0x8] sm:$0xff] }
0x1b9c   :  { %v3651_v52 = vsel %vm345_vm3, %v3650_v47, -inf }
0x1b9d   :  { %3652 = vmax.xlane.f32.xlu1 %v3651_v52  ;;  %v3384_v52 = vld [vmem:[%s9532_s27 + $0x18] sm:$0xff] }
0x1c0a   :  { %v3812_v5 = vpop.f32.mrb[30].mxu0 }
0x1c0b   :  { %v3816_v28 = vmul.f32 0.25, %v3812_v5  ;;  %v7723_v7 = vpop.f32.mrb[31].mxu0 }
0x1c0d   :  { %v3817_v53 = vadd.f32 %v3816_v28, %v163_v50  ;;  %v3381_v50 = vld [vmem:[%s9532_s27] sm:$0xff] }
0x1c0e   :  { %v3982_v54 = vpop.f32.mrb[32].mxu0  ;;  %v8078_v34 = vpack.c.bf16 %v3382_v51, %v3381_v50  ;;  %v7089_v50 = vld [vmem:[%s9537_s1] ss:$0 sm:$0xff] }
0x1c0f   :  { %v3986_v56 = vmul.f32 0.25, %v3982_v54  ;;  %v7733_v57 = vpop.f32.mrb[33].mxu0  ;;  %v3818_v58 = vsel %vm345_vm3, %v3817_v53, -inf }
0x1c10   :  { %3819 = vmax.xlane.f32.xlu0 %v3818_v58  ;;  %8079 = vmatprep.subr.bf16.mxu0 %v8078_v34 }
0x1c11   :  { %v3987_v59 = vadd.f32 %v3986_v56, %v164_v55  ;;  %8081 = vmatpush3.bf16.msra.mxu0 %v8078_v34 }
0x1c12   :  { %v4149_v60 = vpop.f32.mrb[34].mxu0 }
0x1c13   :  { %v4153_v61 = vmul.f32 0.25, %v4149_v60  ;;  %v7743_v62 = vpop.f32.mrb[35].mxu0  ;;  %v3988_v63 = vsel %vm345_vm3, %v3987_v59, -inf }
0x1c14   :  { %3989 = vmax.xlane.f32.xlu0 %v3988_v63 }
0x1c15   :  { %v4154_v0 = vadd.f32 %v4153_v61, %v164_v55  ;;  %v7085_v61 = vld [vmem:[%s9533_s22] ss:$0 sm:$0xff] }
0x1c17   :  { %v4155_v1 = vsel %vm345_vm3, %v4154_v0, -inf }
0x1c18   :  { %4156 = vmax.xlane.f32.xlu1 %v4155_v1 }
0x1c29   :  { %3829 = vrot.lane.b32.xlu1 %v3565_v39, %s8490_s15 }
0x1c2a   :  { %v3653_v2 = vpop.xlane.xlu1 %3652 }
0x1c2b   :  { %v3654_v3 = vsub.f32 %v3650_v47, %v3653_v2  ;;  %v3383_v47 = vld [vmem:[%s9532_s27 + $0x10] sm:$0xff] }
0x1c2c   :  { %v8082_v5 = vpack.c.bf16 %v3384_v52, %v3383_v47 }
0x1c2d   :  { %v3655_v4 = vmul.f32 1.442695, %v3654_v3 }
0x1c2e   :  { %8083 = vmatprep.subr.bf16.mxu0 %v8082_v5 }
0x1c2f   :  { %8320 = vpow2.f32 %v3655_v4  ;;  %8085 = vmatpush3.bf16.msra.mxu0 %v8082_v5  ;;  %v4391_v5 = vld [vmem:[%s9535_s26 + $0x30] sm:$0xff] }
0x1c39   :  { %v8321_v6 = vpop.eup %8320 }
0x1c3a   :  { %v3657_v9 = vsel %vm345_vm3, %v8321_v6, 0.0 }
0x1c3b   :  { %3658 = vadd.xlane.f32.xlu0 %v3657_v9 }
0x1c51   :  { %3662 = vrot.lane.b32.xlu0 %v3565_v39, %s8489_s5 }
0x1c9d   :  { %v3820_v10 = vpop.xlane.xlu0 %3819 }
0x1c9e   :  { %v3821_v11 = vsub.f32 %v3817_v53, %v3820_v10 }
0x1ca0   :  { %v3822_v15 = vmul.f32 1.442695, %v3821_v11 }
0x1ca1   :  { %v3990_v13 = vpop.xlane.xlu0 %3989 }
0x1ca2   :  { %8322 = vpow2.f32 %v3822_v15  ;;  %v3991_v16 = vsub.f32 %v3987_v59, %v3990_v13 }
0x1ca4   :  { %v3992_v17 = vmul.f32 1.442695, %v3991_v16 }
0x1ca5   :  { %v4157_v14 = vpop.xlane.xlu1 %4156 }
0x1ca6   :  { %8324 = vpow2.f32 %v3992_v17  ;;  %v4158_v26 = vsub.f32 %v4154_v0, %v4157_v14 }
0x1ca8   :  { %v4159_v18 = vmul.f32 1.442695, %v4158_v26  ;;  %v4380_v26 = vld [vmem:[%s9534_s23] sm:$0xff] }
0x1ca9   :  { %v3830_v36 = vpop.permute.xlu1 %3829 }
0x1caa   :  { %8326 = vpow2.f32 %v4159_v18  ;;  %v4381_v18 = vld [vmem:[%s9534_s23 + $0x8] sm:$0xff] }
0x1cac   :  { %v8323_v12 = vpop.eup %8322 }
0x1cad   :  { %v3824_v19 = vsel %vm345_vm3, %v8323_v12, 0.0 }
0x1cae   :  { %3825 = vadd.xlane.f32.xlu1 %v3824_v19  ;;  %v4382_v19 = vld [vmem:[%s9534_s23 + $0x10] sm:$0xff] }
0x1cb0   :  { %v8325_v31 = vpop.eup %8324 }
0x1cb1   :  { %v3994_v22 = vsel %vm345_vm3, %v8325_v31, 0.0 }
0x1cb2   :  { %3995 = vadd.xlane.f32.xlu0 %v3994_v22 }
0x1cb4   :  { %v8327_v23 = vpop.eup %8326 }
0x1cb5   :  { %v4161_v24 = vsel %vm345_vm3, %v8327_v23, 0.0 }
0x1cb6   :  { %4162 = vadd.xlane.f32.xlu1 %v4161_v24  ;;  %v4386_v24 = vld [vmem:[%s9535_s26 + $0x8] sm:$0xff] }
0x1cc7   :  { %3999 = vrot.lane.b32.xlu1 %v9122_v40, %s8489_s5 }
0x1cc8   :  { %4166 = vrot.lane.b32.xlu0 %v9122_v40, %s8490_s15  ;;  %v3659_v25 = vpop.xlane.xlu0 %3658 }
0x1cc9   :  { %8328 = vrcp.f32 %v3659_v25  ;;  %v4387_v25 = vld [vmem:[%s9535_s26 + $0x10] sm:$0xff] }
0x1ccc   :  { %v3663_v27 = vpop.permute.xlu0 %3662 }
0x1ccd   :  { %7715 = vmatpush3.msra.mxu1 %v3663_v27 }
0x1cce   :  { %7724 = vmatprep.subr.mxu1 %v8486_v8 }
0x1cd3   :  { %v8329_v29 = vpop.eup %8328 }
0x1cd4   :  { %v3661_v32 = vmul.f32 %v8329_v29, %v8321_v6  ;;  %v4388_v29 = vld [vmem:[%s9535_s26 + $0x18] sm:$0xff] }
0x1cd6   :  { %7717 = vmatmul.mubr.msk.f32.vlgmr.msra.gmra.mrb[44].mxu1 %vm345_vm3, %v3661_v32  ;;  %v8098_v32 = vpack.c.bf16 %v4388_v29, %v4387_v25 }
0x1cd7   :  { %7725 = vmatpush3.msra.mxu1 %v3830_v36  ;;  %7726 = vmatprep.mubr.msk.f32.mxu1 %vm8487_vm1, %v8486_v8  ;;  %v4389_v36 = vld [vmem:[%s9535_s26 + $0x20] sm:$0xff] }
0x1cd8   :  { %7734 = vmatprep.subr.mxu1 %v8486_v8 }
0x1d3b   :  { %v3826_v37 = vpop.xlane.xlu1 %3825 }
0x1d3c   :  { %8330 = vrcp.f32 %v3826_v37  ;;  %v4390_v37 = vld [vmem:[%s9535_s26 + $0x28] sm:$0xff] }
0x1d3f   :  { %v3996_v38 = vpop.xlane.xlu0 %3995 }
0x1d40   :  { %8332 = vrcp.f32 %v3996_v38  ;;  %v8102_v38 = vpack.c.bf16 %v4390_v37, %v4389_v36  ;;  %v7096_v36 = vld [vmem:[%s9540_s10] ss:$0 sm:$0xff] }
0x1d43   :  { %v4163_v39 = vpop.xlane.xlu1 %4162  ;;  %v4167_v20 = vpop.permute.xlu0 %4166 }
0x1d44   :  { %8334 = vrcp.f32 %v4163_v39 }
0x1d46   :  { %v8331_v40 = vpop.eup %8330 }
0x1d47   :  { %v3828_v41 = vmul.f32 %v8331_v40, %v8323_v12  ;;  %v4000_v42 = vpop.permute.xlu1 %3999  ;;  %v8086_v12 = vpack.c.bf16 %v4381_v18, %v4380_v26  ;;  %v7099_v26 = vld [vmem:[%s9521_s25 + $0x28] sm:$0xff] }
0x1d49   :  { %7727 = vmatmul.mubr.msk.f32.vlgmr.msra.gmra.mrb[46].mxu1 %vm345_vm3, %v3828_v41 }
0x1d4a   :  { %v8333_v43 = vpop.eup %8332  ;;  %7735 = vmatpush3.msra.mxu1 %v4000_v42  ;;  %7736 = vmatprep.mubr.msk.f32.mxu1 %vm8487_vm1, %v8486_v8 }
0x1d4b   :  { %v3998_v45 = vmul.f32 %v8333_v43, %v8325_v31  ;;  %7744 = vmatprep.subr.mxu1 %v8486_v8  ;;  %v4383_v31 = vld [vmem:[%s9534_s23 + $0x18] sm:$0xff] }
0x1d4c   :  { %v8090_v22 = vpack.c.bf16 %v4383_v31, %v4382_v19  ;;  %v7101_v19 = vld [vmem:[%s9521_s25 + $0x38] sm:$0xff] }
0x1d4d   :  { %7737 = vmatmul.mubr.msk.f32.vlgmr.msra.gmra.mrb[48].mxu1 %vm345_vm3, %v3998_v45 }
0x1d4e   :  { %v8335_v46 = vpop.eup %8334  ;;  %7745 = vmatpush3.msra.mxu1 %v4167_v20  ;;  %7746 = vmatprep.mubr.msk.f32.mxu1 %vm8487_vm1, %v8486_v8 }
0x1d4f   :  { %v4165_v33 = vmul.f32 %v8335_v46, %v8327_v23  ;;  %8087 = vmatprep.subr.bf16.mxu1 %v8086_v12  ;;  %v4385_v23 = vld [vmem:[%s9535_s26] sm:$0xff] }
0x1d50   :  { %v8094_v27 = vpack.c.bf16 %v4386_v24, %v4385_v23  ;;  %v7088_v46 = vld [vmem:[%s9536_s28] ss:$0 sm:$0xff] }
0x1d51   :  { %7747 = vmatmul.mubr.msk.f32.vlgmr.msra.gmra.mrb[50].mxu1 %vm345_vm3, %v4165_v33 }
0x1d52   :  { %8089 = vmatpush3.bf16.msra.mxu1 %v8086_v12  ;;  %8095 = vmatprep.subr.bf16.mxu0 %v8094_v27  ;;  %v7100_v12 = vld [vmem:[%s9521_s25 + $0x30] sm:$0xff] }
0x1d53   :  { %8091 = vmatprep.subr.bf16.mxu1 %v8090_v22  ;;  %v8114_v31 = vpack.c.bf16 %v7101_v19, %v7100_v12 }
0x1d56   :  { %8093 = vmatpush3.bf16.msra.mxu1 %v8090_v22 }
0x1da9   :  { %v3734_v49 = vpop.f32.mrb[44].mxu1 }
0x1daa   :  { %v7718_v48 = vpop.f32.mrb[45].mxu1 }
0x1e1c   :  { %v3901_v28 = vpop.f32.mrb[46].mxu1 }
0x1e1d   :  { %3906 = vrot.lane.b32.xlu1 %v3901_v28, %s8493_s13  ;;  %v7728_v7 = vpop.f32.mrb[47].mxu1  ;;  %v4392_v28 = vld [vmem:[%s9535_s26 + $0x38] sm:$0xff] }
0x1e1e   :  { %v8106_v7 = vpack.c.bf16 %v4392_v28, %v4391_v5 }
0x1e20   :  { %v4071_v53 = vpop.f32.mrb[48].mxu1 }
0x1e21   :  { %v7738_v54 = vpop.f32.mrb[49].mxu1 }
0x1e24   :  { %v4238_v55 = vpop.f32.mrb[50].mxu1 }
0x1e25   :  { %4243 = vrot.lane.b32.xlu0 %v4238_v55, %s8493_s13  ;;  %v7748_v56 = vpop.f32.mrb[51].mxu1 }
0x1e8f   :  { %v3907_v57 = vpop.permute.xlu1 %3906 }
0x1e90   :  { %v3909_v58 = vsel %vm268_vm2, %v3734_v49, %v3907_v57 }
0x1e91   :  { %7757 = vmatprep.mubr.msk.f32.mxu0 %vm183_vm0, %v3909_v58 }
0x1e97   :  { %v4244_v59 = vpop.permute.xlu0 %4243 }
0x1e98   :  { %v4246_v60 = vsel %vm268_vm2, %v4071_v53, %v4244_v59  ;;  %v7090_v53 = vld [vmem:[%s9538_s2] ss:$0 sm:$0xff] }
0x1e99   :  { %7758 = vmatmul.mubr.msk.f32.vlgmr.msra.gmra.mrb[36].mxu0 %vm183_vm0, %v4246_v60  ;;  %v7093_v60 = vld [vmem:[%s9539_s7] ss:$0 sm:$0xff] }
0x1e9a   :  { %8097 = vmatpush3.bf16.msra.mxu0 %v8094_v27 }
0x1e9b   :  { %8099 = vmatprep.subr.bf16.mxu0 %v8098_v32 }
0x1e9e   :  { %8101 = vmatpush3.bf16.msra.mxu0 %v8098_v32 }
0x1e9f   :  { %8103 = vmatprep.subr.bf16.mxu0 %v8102_v38 }
0x1ea2   :  { %8105 = vmatpush3.bf16.msra.mxu0 %v8102_v38 }
0x1ea3   :  { %8107 = vmatprep.subr.bf16.mxu0 %v8106_v7 }
0x1ea6   :  { %8109 = vmatpush3.bf16.msra.mxu0 %v8106_v7 }
0x1ea7   :  { %7811 = vmatprep.subr.mxu0 %v8486_v8 }
0x1f6c   :  { %v7759_v62 = vpop.f32.mrb[36].mxu0 }
0x1f6d   :  { %v4331_v63 = vadd.f32 %v7759_v62, %v7085_v61  ;;  %v4325_v0 = vpop.f32.mrb[37].mxu0 }
0x1f6e   :  { %v4326_v1 = vadd.f32 %v7085_v61, %v4325_v0 }
0x1f6f   :  { %v4335_v2 = vadd.f32 %v4331_v63, %v9113_v35 }
0x1f70   :  { %v4334_v3 = vadd.f32 %v4326_v1, %v9109_v30 }
0x1f71   :  { %v4341_v4 = vsel %vm183_vm0, %v4335_v2, 0.0 }
0x1f72   :  { %4342 = vadd.xlane.f32.xlu0 %v4341_v4  ;;  %v4338_v6 = vsel %vm183_vm0, %v4334_v3, 0.0 }
0x1f73   :  { %4339 = vadd.xlane.f32.xlu1 %v4338_v6 }
0x1fff   :  { %v4343_v9 = vpop.xlane.xlu0 %4342 }
0x2000   :  { %v4345_v10 = vmul.f32 0.03125, %v4343_v9  ;;  %v4340_v11 = vpop.xlane.xlu1 %4339 }
0x2001   :  { %v4344_v15 = vmul.f32 0.03125, %v4340_v11 }
0x2002   :  { %v4347_v13 = vsub.f32 %v4335_v2, %v4345_v10 }
0x2003   :  { %v4346_v16 = vsub.f32 %v4334_v3, %v4344_v15 }
0x2004   :  { %v4349_v17 = vmul.f32 %v4347_v13, %v4347_v13 }
0x2005   :  { %v4348_v35 = vmul.f32 %v4346_v16, %v4346_v16 }
0x2006   :  { %v4353_v30 = vsel %vm183_vm0, %v4349_v17, 0.0 }
0x2007   :  { %4354 = vadd.xlane.f32.xlu1 %v4353_v30  ;;  %v4350_v14 = vsel %vm183_vm0, %v4348_v35, 0.0 }
0x2008   :  { %4351 = vadd.xlane.f32.xlu0 %v4350_v14  ;;  %v7098_v14 = vld [vmem:[%s9521_s25 + $0x20] sm:$0xff] }
0x2009   :  { %v8110_v18 = vpack.c.bf16 %v7099_v26, %v7098_v14 }
0x200b   :  { %8111 = vmatprep.subr.bf16.mxu1 %v8110_v18 }
0x2094   :  { %v4355_v39 = vpop.xlane.xlu1 %4354 }
0x2095   :  { %v4357_v40 = vmul.f32 0.03125, %v4355_v39  ;;  %v4352_v41 = vpop.xlane.xlu0 %4351 }
0x2096   :  { %v4356_v42 = vmul.f32 0.03125, %v4352_v41 }
0x2097   :  { %v4359_v43 = vadd.f32 1e-05, %v4357_v40  ;;  %v7097_v40 = vld [vmem:[%s9541_s11] ss:$0 sm:$0xff] }
0x2098   :  { %v4358_v45 = vadd.f32 1e-05, %v4356_v42 }
0x2099   :  { %8336 = vrsqrt.f32 %v4359_v43 }
0x209a   :  { %8338 = vrsqrt.f32 %v4358_v45 }
0x20a3   :  { %v8337_v20 = vpop.eup %8336 }
0x20a4   :  { %v8339_v33 = vpop.eup %8338  ;;  %v4363_v49 = vmul.f32 %v8337_v20, %v4347_v13  ;;  %v7108_v20 = vld [vmem:[%s9523_s3 + $0x1] ss:$0 sm:$0xff] }
0x20a5   :  { %v4362_v48 = vmul.f32 %v8339_v33, %v4346_v16 }
0x20a6   :  { %v4371_v51 = vmul.f32 %v7088_v46, %v4363_v49 }
0x20a7   :  { %v4370_v34 = vmul.f32 %v7088_v46, %v4362_v48 }
0x20a8   :  { %v4379_v52 = vadd.f32 %v7089_v50, %v4371_v51 }
0x20a9   :  { %v4378_v47 = vadd.f32 %v7089_v50, %v4370_v34 }
0x20ab   :  { %7768 = vmatprep.mubr.msk.f32.mxu1 %vm183_vm0, %v4378_v47 }
0x20ac   :  { %7769 = vmatmul.mubr.msk.f32.vlgmr.msra.gmra.mrb[52].mxu1 %vm183_vm0, %v4379_v52 }
0x20ad   :  { %8113 = vmatpush3.bf16.msra.mxu1 %v8110_v18 }
0x20ae   :  { %8115 = vmatprep.subr.bf16.mxu1 %v8114_v31 }
0x20b1   :  { %8117 = vmatpush3.bf16.msra.mxu1 %v8114_v31 }
0x20b2   :  { %7801 = vmatprep.subr.mxu1 %v8486_v8 }
0x217f   :  { %v7770_v54 = vpop.f32.mrb[52].mxu1 }
0x2180   :  { %v4478_v55 = vadd.f32 %v7770_v54, %v7090_v53  ;;  %v4472_v56 = vpop.f32.mrb[53].mxu1 }
0x2181   :  { %v4473_v57 = vadd.f32 %v7090_v53, %v4472_v56 }
0x2182   :  { %v4482_v59 = vmax.f32 %v4478_v55, 0.0 }
0x2183   :  { %v4481_v58 = vmax.f32 %v4473_v57, 0.0  ;;  %v8396_v57 = vld [vmem:[%s9524_s8] sm:$0xff] }
0x2185   :  { %7787 = vmatprep.mubr.msk.f32.mxu0 %vm1186_vm4, %v4481_v58 }
0x2186   :  { %7788 = vmatmul.mubr.msk.f32.vlgmr.msra.gmra.mrb[38].mxu0 %vm1186_vm4, %v4482_v59 }
0x2187   :  { %7813 = vmatprep.mubr.msk.f32.mxu0 %vm8487_vm1, %v8486_v8 }
0x2259   :  { %v7789_v61 = vpop.f32.mrb[38].mxu0 }
0x225a   :  { %v4567_v62 = vadd.f32 %v7789_v61, %v7093_v60  ;;  %v4561_v63 = vpop.f32.mrb[39].mxu0 }
0x225b   :  { %v4562_v0 = vadd.f32 %v7093_v60, %v4561_v63 }
0x225c   :  { %v4571_v1 = vadd.f32 %v4567_v62, %v4379_v52 }
0x225d   :  { %v4570_v2 = vadd.f32 %v4562_v0, %v4378_v47 }
0x225e   :  { %v4577_v3 = vsel %vm183_vm0, %v4571_v1, 0.0 }
0x225f   :  { %4578 = vadd.xlane.f32.xlu1 %v4577_v3  ;;  %v4574_v4 = vsel %vm183_vm0, %v4570_v2, 0.0 }
0x2260   :  { %4575 = vadd.xlane.f32.xlu0 %v4574_v4 }
0x22ec   :  { %v4579_v6 = vpop.xlane.xlu1 %4578 }
0x22ed   :  { %v4581_v9 = vmul.f32 0.03125, %v4579_v6  ;;  %v4576_v10 = vpop.xlane.xlu0 %4575 }
0x22ee   :  { %v4580_v11 = vmul.f32 0.03125, %v4576_v10 }
0x22ef   :  { %v4583_v15 = vsub.f32 %v4571_v1, %v4581_v9  ;;  %v8397_v1 = vld [vmem:[%s9524_s8 + $0x8] sm:$0xff] }
0x22f0   :  { %v4582_v13 = vsub.f32 %v4570_v2, %v4580_v11 }
0x22f1   :  { %v4585_v16 = vmul.f32 %v4583_v15, %v4583_v15 }
0x22f2   :  { %v4584_v17 = vmul.f32 %v4582_v13, %v4582_v13 }
0x22f3   :  { %v4589_v35 = vsel %vm183_vm0, %v4585_v16, 0.0 }
0x22f4   :  { %4590 = vadd.xlane.f32.xlu1 %v4589_v35  ;;  %v4586_v30 = vsel %vm183_vm0, %v4584_v17, 0.0 }
0x22f5   :  { %4587 = vadd.xlane.f32.xlu0 %v4586_v30 }
0x2381   :  { %v4591_v22 = vpop.xlane.xlu1 %4590 }
0x2382   :  { %v4593_v23 = vmul.f32 0.03125, %v4591_v22  ;;  %v4588_v24 = vpop.xlane.xlu0 %4587 }
0x2383   :  { %v4592_v25 = vmul.f32 0.03125, %v4588_v24 }
0x2384   :  { %v4595_v27 = vadd.f32 1e-05, %v4593_v23 }
0x2385   :  { %v4594_v29 = vadd.f32 1e-05, %v4592_v25 }
0x2386   :  { %8340 = vrsqrt.f32 %v4595_v27 }
0x2387   :  { %8342 = vrsqrt.f32 %v4594_v29 }
0x2390   :  { %v8341_v32 = vpop.eup %8340 }
0x2391   :  { %v8343_v37 = vpop.eup %8342  ;;  %v4599_v38 = vmul.f32 %v8341_v32, %v4583_v15 }
0x2392   :  { %v4598_v39 = vmul.f32 %v8343_v37, %v4582_v13 }
0x2393   :  { %v4607_v41 = vmul.f32 %v7096_v36, %v4599_v38 }
0x2394   :  { %v4606_v42 = vmul.f32 %v7096_v36, %v4598_v39 }
0x2395   :  { %v9226_v45 = vadd.f32 %v7097_v40, %v4607_v41 }
0x2396   :  { %v9224_v43 = vadd.f32 %v7097_v40, %v4606_v42 }
0x2398   :  { %7798 = vmatprep.mubr.msk.f32.mxu1 %vm183_vm0, %v9224_v43 }
0x2399   :  { %7799 = vmatmul.mubr.msk.f32.vlgmr.msra.gmra.mrb[54].mxu1 %vm183_vm0, %v9226_v45 }
0x239a   :  { %7803 = vmatprep.mubr.msk.f32.mxu1 %vm8487_vm1, %v8486_v8 }
0x246c   :  { %v7800_v46 = vpop.f32.mrb[54].mxu1 }
0x246d   :  { %v4708_v33 = vpop.f32.mrb[55].mxu1  ;;  %v9241_v48 = vadd.f32 %v7800_v46, %v7108_v20 }
0x246e   :  { %v9235_v49 = vadd.f32 %v7108_v20, %v4708_v33 }
0x2470   :  { %4885 = vrot.lane.b32.xlu1 %v9235_v49, %s8490_s15  ;;  %4718 = vrot.lane.b32.xlu0 %v9235_v49, %s8489_s5 }
0x2474   :  { %4883 = vrot.lane.b32.xlu1 %v9235_v49, %s8491_s16  ;;  %5056 = vrot.lane.b32.xlu0 %v9241_v48, %s8489_s5 }
0x2478   :  { %5223 = vrot.lane.b32.xlu1 %v9241_v48, %s8490_s15  ;;  %5221 = vrot.lane.b32.xlu0 %v9241_v48, %s8491_s16 }
0x24e2   :  { %v4886_v50 = vpop.permute.xlu1 %4885  ;;  %v4719_v51 = vpop.permute.xlu0 %4718 }
0x24e3   :  { %7802 = vmatpush3.xpose.msk.msra.mxu1 %vm268_vm2, %v4719_v51  ;;  %7812 = vmatpush3.xpose.msk.msra.mxu0 %vm268_vm2, %v4886_v50 }
0x24e4   :  { %7821 = vmatprep.subr.mxu0 %v8486_v8  ;;  %7806 = vmatprep.subr.mxu1 %v8486_v8 }
0x24e6   :  { %v4884_v34 = vpop.permute.xlu1 %4883  ;;  %7804 = vmatmul.mubr.msk.f32.vlgmr.msra.gmra.mrb[56].mxu1 %vm268_vm2, %v9235_v49  ;;  %v5057_v47 = vpop.permute.xlu0 %5056 }
0x24e7   :  { %7814 = vmatmul.mubr.msk.f32.vlgmr.msra.gmra.mrb[40].mxu0 %vm268_vm2, %v4884_v34  ;;  %7808 = vmatprep.mubr.msk.f32.mxu1 %vm8487_vm1, %v8486_v8 }
0x24e8   :  { %7822 = vmatpush3.xpose.msk.msra.mxu0 %vm268_vm2, %v5057_v47  ;;  %7823 = vmatprep.mubr.msk.f32.mxu0 %vm8487_vm1, %v8486_v8 }
0x24e9   :  { %7831 = vmatprep.subr.mxu0 %v8486_v8 }
0x24ea   :  { %v5224_v52 = vpop.permute.xlu1 %5223  ;;  %v5222_v5 = vpop.permute.xlu0 %5221 }
0x24eb   :  { %7824 = vmatmul.mubr.msk.f32.vlgmr.msra.gmra.mrb[42].mxu0 %vm268_vm2, %v9241_v48 }
0x24ec   :  { %7832 = vmatpush3.xpose.msk.msra.mxu0 %vm268_vm2, %v5224_v52  ;;  %7833 = vmatprep.mubr.msk.f32.mxu0 %vm8487_vm1, %v8486_v8 }
0x24ef   :  { %7834 = vmatmul.mubr.msk.f32.vlgmr.msra.gmra.mrb[44].mxu0 %vm268_vm2, %v5222_v5  ;;  %v7103_v5 = vld [vmem:[%s9525_s14 + $0x20] sm:$0xff] }
0x25b9   :  { %v4790_v28 = vpop.f32.mrb[56].mxu1 }
0x25ba   :  { %v4794_v7 = vmul.f32 0.25, %v4790_v28  ;;  %v7805_v53 = vpop.f32.mrb[57].mxu1  ;;  %v4957_v54 = vpop.f32.mrb[40].mxu0  ;;  %v7104_v28 = vld [vmem:[%s9525_s14 + $0x28] sm:$0xff] }
0x25bb   :  { %v4961_v55 = vmul.f32 0.25, %v4957_v54  ;;  %v7815_v56 = vpop.f32.mrb[41].mxu0  ;;  %v8118_v53 = vpack.c.bf16 %v7104_v28, %v7103_v5  ;;  %v7106_v54 = vld [vmem:[%s9525_s14 + $0x38] sm:$0xff] }
0x25bc   :  { %v4795_v58 = vadd.f32 %v8396_v57, %v4794_v7  ;;  %v7105_v7 = vld [vmem:[%s9525_s14 + $0x30] sm:$0xff] }
0x25bd   :  { %v4962_v59 = vadd.f32 %v8396_v57, %v4961_v55  ;;  %v8122_v55 = vpack.c.bf16 %v7106_v54, %v7105_v7  ;;  %8119 = vmatprep.subr.bf16.mxu0 %v8118_v53 }
0x25be   :  { %v5128_v60 = vpop.f32.mrb[42].mxu0  ;;  %v4796_v61 = vsel %vm345_vm3, %v4795_v58, -inf  ;;  %8121 = vmatpush3.bf16.msra.mxu0 %v8118_v53  ;;  %v7129_v53 = vld [vmem:[%s9530_s12 + $0x1] ss:$0 sm:$0xff] }
0x25bf   :  { %v5132_v62 = vmul.f32 0.25, %v5128_v60  ;;  %4797 = vmax.xlane.f32.xlu1 %v4796_v61  ;;  %v7825_v63 = vpop.f32.mrb[43].mxu0  ;;  %v4963_v0 = vsel %vm345_vm3, %v4962_v59, -inf  ;;  %8123 = vmatprep.subr.bf16.mxu0 %v8122_v55 }
0x25c0   :  { %4964 = vmax.xlane.f32.xlu0 %v4963_v0 }
0x25c1   :  { %v5133_v2 = vadd.f32 %v8397_v1, %v5132_v62 }
0x25c2   :  { %v5295_v3 = vpop.f32.mrb[44].mxu0  ;;  %8125 = vmatpush3.bf16.msra.mxu0 %v8122_v55 }
0x25c3   :  { %v5299_v4 = vmul.f32 0.25, %v5295_v3  ;;  %v7835_v6 = vpop.f32.mrb[45].mxu0  ;;  %v5134_v9 = vsel %vm345_vm3, %v5133_v2, -inf }
0x25c4   :  { %5135 = vmax.xlane.f32.xlu0 %v5134_v9 }
0x25c5   :  { %v5300_v10 = vadd.f32 %v8397_v1, %v5299_v4  ;;  %v7123_v4 = vld [vmem:[%s9526_s19 + $0x1] ss:$0 sm:$0xff] }
0x25c7   :  { %v5301_v11 = vsel %vm345_vm3, %v5300_v10, -inf }
0x25c8   :  { %5302 = vmax.xlane.f32.xlu1 %v5301_v11 }
0x25d9   :  { %4974 = vrot.lane.b32.xlu1 %v9235_v49, %s8492_s18 }
0x264c   :  { %v4798_v15 = vpop.xlane.xlu1 %4797 }
0x264d   :  { %v4799_v13 = vsub.f32 %v4795_v58, %v4798_v15  ;;  %v4965_v16 = vpop.xlane.xlu0 %4964 }
0x264e   :  { %v4966_v17 = vsub.f32 %v4962_v59, %v4965_v16 }
0x264f   :  { %v4800_v35 = vmul.f32 1.442695, %v4799_v13 }
0x2650   :  { %v4967_v30 = vmul.f32 1.442695, %v4966_v17 }
0x2651   :  { %8344 = vpow2.f32 %v4800_v35  ;;  %v5136_v25 = vpop.xlane.xlu0 %5135 }
0x2652   :  { %8346 = vpow2.f32 %v4967_v30  ;;  %v5137_v27 = vsub.f32 %v5133_v2, %v5136_v25  ;;  %v7131_v25 = vld [vmem:[%s9527_s24 + $0x28] sm:$0xff] }
0x2654   :  { %v5138_v29 = vmul.f32 1.442695, %v5137_v27 }
0x2655   :  { %v5303_v14 = vpop.xlane.xlu1 %5302 }
0x2656   :  { %v5304_v26 = vsub.f32 %v5300_v10, %v5303_v14 }
0x2658   :  { %v5305_v18 = vmul.f32 1.442695, %v5304_v26 }
0x2659   :  { %v4975_v37 = vpop.permute.xlu1 %4974 }
0x265a   :  { %8348 = vpow2.f32 %v5305_v18 }
0x265b   :  { %v8345_v12 = vpop.eup %8344  ;;  %8350 = vpow2.f32 %v5138_v29 }
0x265c   :  { %v8347_v19 = vpop.eup %8346  ;;  %v4802_v31 = vsel %vm345_vm3, %v8345_v12, 0.0 }
0x265d   :  { %4803 = vadd.xlane.f32.xlu0 %v4802_v31  ;;  %v4969_v22 = vsel %vm345_vm3, %v8347_v19, 0.0  ;;  %v7132_v31 = vld [vmem:[%s9527_s24 + $0x30] sm:$0xff] }
0x265e   :  { %4970 = vadd.xlane.f32.xlu1 %v4969_v22  ;;  %v7133_v22 = vld [vmem:[%s9527_s24 + $0x38] sm:$0xff] }
0x2664   :  { %v8349_v23 = vpop.eup %8348 }
0x2665   :  { %v5307_v24 = vsel %vm345_vm3, %v8349_v23, 0.0  ;;  %v8351_v32 = vpop.eup %8350 }
0x2666   :  { %5308 = vadd.xlane.f32.xlu1 %v5307_v24  ;;  %v5140_v36 = vsel %vm345_vm3, %v8351_v32, 0.0  ;;  %v7130_v24 = vld [vmem:[%s9527_s24 + $0x20] sm:$0xff] }
0x2667   :  { %v8242_v27 = vpack.i.bf16 %v7131_v25, %v7130_v24  ;;  %v8126_v29 = vpack.c.bf16 %v7131_v25, %v7130_v24 }
0x2673   :  { %4807 = vrot.lane.b32.xlu0 %v9235_v49, %s8488_s0 }
0x2677   :  { %5145 = vrot.lane.b32.xlu1 %v9241_v48, %s8488_s0 }
0x2692   :  { %5141 = vadd.xlane.f32.xlu0 %v5140_v36  ;;  %v7140_v36 = vld [vmem:[%s9528_s30 + $0x1] ss:$0 sm:$0xff] }
0x26a8   :  { %5312 = vrot.lane.b32.xlu0 %v9241_v48, %s8492_s18 }
0x26ea   :  { %v4804_v38 = vpop.xlane.xlu0 %4803 }
0x26eb   :  { %8352 = vrcp.f32 %v4804_v38  ;;  %v4971_v39 = vpop.xlane.xlu1 %4970 }
0x26ec   :  { %8354 = vrcp.f32 %v4971_v39 }
0x26ee   :  { %v4808_v40 = vpop.permute.xlu0 %4807 }
0x26ef   :  { %7807 = vmatpush3.msra.mxu1 %v4808_v40 }
0x26f0   :  { %7816 = vmatprep.subr.mxu1 %v8486_v8 }
0x26f3   :  { %v5309_v20 = vpop.xlane.xlu1 %5308 }
0x26f5   :  { %v8353_v41 = vpop.eup %8352 }
0x26f6   :  { %v4806_v42 = vmul.f32 %v8353_v41, %v8345_v12  ;;  %v8355_v46 = vpop.eup %8354 }
0x26f7   :  { %v4973_v33 = vmul.f32 %v8355_v46, %v8347_v19  ;;  %v5146_v49 = vpop.permute.xlu1 %5145 }
0x26f8   :  { %7809 = vmatmul.mubr.msk.f32.vlgmr.msra.gmra.mrb[58].mxu1 %vm345_vm3, %v4806_v42 }
0x26f9   :  { %7817 = vmatpush3.msra.mxu1 %v4975_v37  ;;  %7818 = vmatprep.mubr.msk.f32.mxu1 %vm8487_vm1, %v8486_v8 }
0x26fa   :  { %7826 = vmatprep.subr.mxu1 %v8486_v8 }
0x26fc   :  { %7819 = vmatmul.mubr.msk.f32.vlgmr.msra.gmra.mrb[60].mxu1 %vm345_vm3, %v4973_v33 }
0x26fd   :  { %7827 = vmatpush3.msra.mxu1 %v5146_v49  ;;  %7828 = vmatprep.mubr.msk.f32.mxu1 %vm8487_vm1, %v8486_v8 }
0x26fe   :  { %7836 = vmatprep.subr.mxu1 %v8486_v8 }
0x271f   :  { %v5142_v48 = vpop.xlane.xlu0 %5141 }
0x2720   :  { %8356 = vrcp.f32 %v5142_v48 }
0x2721   :  { %8358 = vrcp.f32 %v5309_v20 }
0x2723   :  { %v5313_v47 = vpop.permute.xlu0 %5312 }
0x272a   :  { %v8357_v50 = vpop.eup %8356 }
0x272b   :  { %v5144_v51 = vmul.f32 %v8357_v50, %v8351_v32  ;;  %v8359_v34 = vpop.eup %8358  ;;  %v8130_v32 = vpack.c.bf16 %v7133_v22, %v7132_v31 }
0x272c   :  { %v5311_v52 = vmul.f32 %v8359_v34, %v8349_v23  ;;  %v8247_v23 = vpack.i.bf16 %v7133_v22, %v7132_v31 }
0x272d   :  { %7829 = vmatmul.mubr.msk.f32.vlgmr.msra.gmra.mrb[62].mxu1 %vm345_vm3, %v5144_v51 }
0x272e   :  { %7837 = vmatpush3.msra.mxu1 %v5313_v47  ;;  %7838 = vmatprep.mubr.msk.f32.mxu1 %vm8487_vm1, %v8486_v8 }
0x272f   :  { %8127 = vmatprep.subr.bf16.mxu1 %v8126_v29 }
0x2731   :  { %7839 = vmatmul.mubr.msk.f32.vlgmr.msra.gmra.mrb[64].mxu1 %vm345_vm3, %v5311_v52  ;;  %v7128_v52 = vld [vmem:[%s9529_s6 + $0x1] ss:$0 sm:$0xff] }
0x2732   :  { %8129 = vmatpush3.bf16.msra.mxu1 %v8126_v29 }
0x2733   :  { %8131 = vmatprep.subr.bf16.mxu1 %v8130_v32 }
0x2736   :  { %8133 = vmatpush3.bf16.msra.mxu1 %v8130_v32 }
0x2737   :  { %7874 = vmatprep.subr.mxu1 %v8486_v8 }
0x27cb   :  { %v4879_v56 = vpop.f32.mrb[58].mxu1 }
0x27cc   :  { %v7810_v57 = vpop.f32.mrb[59].mxu1 }
0x27cf   :  { %v5046_v58 = vpop.f32.mrb[60].mxu1 }
0x27d0   :  { %5051 = vrot.lane.b32.xlu1 %v5046_v58, %s8493_s13  ;;  %v7820_v59 = vpop.f32.mrb[61].mxu1 }
0x2800   :  { %v5217_v60 = vpop.f32.mrb[62].mxu1 }
0x2801   :  { %v7830_v61 = vpop.f32.mrb[63].mxu1 }
0x2804   :  { %v5384_v62 = vpop.f32.mrb[64].mxu1 }
0x2805   :  { %5389 = vrot.lane.b32.xlu0 %v5384_v62, %s8493_s13  ;;  %v7840_v63 = vpop.f32.mrb[65].mxu1 }
0x2842   :  { %v5052_v0 = vpop.permute.xlu1 %5051 }
0x2843   :  { %v5054_v1 = vsel %vm268_vm2, %v4879_v56, %v5052_v0 }
0x2844   :  { %7849 = vmatprep.mubr.msk.f32.mxu0 %vm183_vm0, %v5054_v1 }
0x2877   :  { %v5390_v2 = vpop.permute.xlu0 %5389 }
0x2878   :  { %v5392_v3 = vsel %vm268_vm2, %v5217_v60, %v5390_v2 }
0x2879   :  { %7850 = vmatmul.mubr.msk.f32.vlgmr.msra.gmra.mrb[46].mxu0 %vm183_vm0, %v5392_v3 }
0x287a   :  { %7871 = vmatprep.mubr.msk.f32.mxu0 %vm183_vm0, %v9080_v44 }
0x294c   :  { %v7851_v6 = vpop.f32.mrb[46].mxu0 }
0x294d   :  { %v5477_v9 = vadd.f32 %v7851_v6, %v7123_v4  ;;  %v5471_v10 = vpop.f32.mrb[47].mxu0 }
0x294e   :  { %v5472_v11 = vadd.f32 %v7123_v4, %v5471_v10 }
0x294f   :  { %v5481_v15 = vadd.f32 %v5477_v9, %v9226_v45 }
0x2950   :  { %v5480_v13 = vadd.f32 %v5472_v11, %v9224_v43 }
0x2951   :  { %v5489_v16 = vsel %vm183_vm0, %v5481_v15, 0.0 }
0x2952   :  { %5490 = vadd.xlane.f32.xlu0 %v5489_v16  ;;  %v5486_v17 = vsel %vm183_vm0, %v5480_v13, 0.0 }
0x2953   :  { %5487 = vadd.xlane.f32.xlu1 %v5486_v17 }
0x29df   :  { %v5491_v35 = vpop.xlane.xlu0 %5490 }
0x29e0   :  { %v5493_v44 = vmul.f32 0.03125, %v5491_v35  ;;  %v5488_v30 = vpop.xlane.xlu1 %5487 }
0x29e1   :  { %v5492_v14 = vmul.f32 0.03125, %v5488_v30 }
0x29e2   :  { %v5495_v26 = vsub.f32 %v5481_v15, %v5493_v44  ;;  %v8398_v15 = vld [vmem:[%s9531_s20] sm:$0xff] }
0x29e3   :  { %v5494_v18 = vsub.f32 %v5480_v13, %v5492_v14 }
0x29e4   :  { %v5497_v12 = vmul.f32 %v5495_v26, %v5495_v26 }
0x29e5   :  { %v5496_v45 = vmul.f32 %v5494_v18, %v5494_v18 }
0x29e6   :  { %v5501_v43 = vsel %vm183_vm0, %v5497_v12, 0.0 }
0x29e7   :  { %5502 = vadd.xlane.f32.xlu1 %v5501_v43  ;;  %v5498_v19 = vsel %vm183_vm0, %v5496_v45, 0.0  ;;  %v8399_v45 = vld [vmem:[%s9531_s20 + $0x8] sm:$0xff] }
0x29e8   :  { %5499 = vadd.xlane.f32.xlu0 %v5498_v19 }
0x29f8   :  { %8248 = vrot.lane.b32.xlu1 %v8247_v23, %s8489_s5 }
0x29fc   :  { %5645 = vrot.lane.b32.xlu1 %v7140_v36, %s8489_s5 }
0x29fe   :  { %8243 = vrot.lane.b32.xlu0 %v8242_v27, %s8489_s5 }
0x2a74   :  { %v5503_v37 = vpop.xlane.xlu1 %5502 }
0x2a75   :  { %v5505_v38 = vmul.f32 0.03125, %v5503_v37  ;;  %v5500_v39 = vpop.xlane.xlu0 %5499 }
0x2a76   :  { %v5504_v40 = vmul.f32 0.03125, %v5500_v39 }
0x2a77   :  { %v5507_v41 = vadd.f32 1e-05, %v5505_v38 }
0x2a78   :  { %v5506_v42 = vadd.f32 1e-05, %v5504_v40  ;;  %v8249_v20 = vpop.permute.xlu1 %8248 }
0x2a79   :  { %8360 = vrsqrt.f32 %v5507_v41  ;;  %v8244_v46 = vpop.permute.xlu0 %8243  ;;  %v8251_v33 = vunpack.i.h.bf16 %v8249_v20  ;;  %v8250_v49 = vunpack.i.l.bf16 %v8249_v20 }
0x2a7a   :  { %8362 = vrsqrt.f32 %v5506_v42  ;;  %v8246_v48 = vunpack.i.h.bf16 %v8244_v46  ;;  %v8245_v50 = vunpack.i.l.bf16 %v8244_v46 }
0x2a7b   :  { %v8138_v34 = vpack.c.bf16 %v8251_v33, %v8250_v49 }
0x2a7c   :  { %v8134_v51 = vpack.c.bf16 %v8246_v48, %v8245_v50 }
0x2a7e   :  { %8135 = vmatprep.subr.bf16.mxu0 %v8134_v51 }
0x2a7f   :  { %8137 = vmatpush3.bf16.msra.mxu0 %v8134_v51 }
0x2a80   :  { %8139 = vmatprep.subr.bf16.mxu0 %v8138_v34 }
0x2a83   :  { %v8361_v47 = vpop.eup %8360  ;;  %8141 = vmatpush3.bf16.msra.mxu0 %v8138_v34 }
0x2a84   :  { %v8363_v5 = vpop.eup %8362  ;;  %v5511_v28 = vmul.f32 %v8361_v47, %v5495_v26  ;;  %7884 = vmatprep.subr.mxu0 %v8486_v8 }
0x2a85   :  { %v5510_v7 = vmul.f32 %v8363_v5, %v5494_v18 }
0x2a86   :  { %7872 = vmatmul.mubr.msk.f32.vlgmr.msra.gmra.mrb[48].mxu0 %vm183_vm0, %v9100_v21  ;;  %v5519_v54 = vmul.f32 %v7128_v52, %v5511_v28  ;;  %v5646_v21 = vpop.permute.xlu1 %5645 }
0x2a87   :  { %v5518_v55 = vmul.f32 %v7128_v52, %v5510_v7  ;;  %7886 = vmatprep.mubr.msk.f32.mxu0 %vm8487_vm1, %v8486_v8 }
0x2a88   :  { %v9338_v57 = vadd.f32 %v7129_v53, %v5519_v54 }
0x2a89   :  { %v9336_v56 = vadd.f32 %v7129_v53, %v5518_v55 }
0x2a8b   :  { %7860 = vmatprep.mubr.msk.f32.mxu1 %vm183_vm0, %v9336_v56 }
0x2a8c   :  { %7861 = vmatmul.mubr.msk.f32.vlgmr.msra.gmra.mrb[66].mxu1 %vm183_vm0, %v9338_v57 }
0x2a8d   :  { %7876 = vmatprep.mubr.msk.f32.mxu1 %vm8487_vm1, %v8486_v8 }
0x2b59   :  { %v7873_v58 = vpop.f32.mrb[48].mxu0 }
0x2b5a   :  { %v5714_v59 = vpop.f32.mrb[49].mxu0  ;;  %v9353_v61 = vadd.f32 %v7873_v58, %v5646_v21 }
0x2b5b   :  { %v9346_v60 = vadd.f32 %v5714_v59, %v5646_v21 }
0x2b5d   :  { %5890 = vrot.lane.b32.xlu0 %v9346_v60, %s8491_s16  ;;  %7875 = vmatpush3.xpose.msk.msra.mxu1 %vm268_vm2, %v9346_v60 }
0x2b5e   :  { %7879 = vmatprep.subr.mxu1 %v8486_v8 }
0x2b5f   :  { %v7862_v62 = vpop.f32.mrb[66].mxu1 }
0x2b60   :  { %v5620_v63 = vpop.f32.mrb[67].mxu1  ;;  %v5626_v1 = vadd.f32 %v7862_v62, %v7140_v36 }
0x2b61   :  { %v5621_v0 = vadd.f32 %v7140_v36, %v5620_v63  ;;  %6227 = vrot.lane.b32.xlu0 %v9353_v61, %s8491_s16 }
0x2b63   :  { %5888 = vrot.lane.b32.xlu1 %v5621_v0, %s8491_s16  ;;  %7877 = vmatmul.mubr.msk.f32.vlgmr.msra.gmra.mrb[68].mxu1 %vm268_vm2, %v5621_v0 }
0x2b64   :  { %7881 = vmatprep.mubr.msk.f32.mxu1 %vm8487_vm1, %v8486_v8 }
0x2b67   :  { %6225 = vrot.lane.b32.xlu1 %v5626_v1, %s8491_s16 }
0x2bcf   :  { %v5891_v2 = vpop.permute.xlu0 %5890 }
0x2bd0   :  { %7885 = vmatpush3.xpose.msk.msra.mxu0 %vm268_vm2, %v5891_v2 }
0x2bd1   :  { %7894 = vmatprep.subr.mxu0 %v8486_v8 }
0x2bd3   :  { %v6228_v4 = vpop.permute.xlu0 %6227 }
0x2bd5   :  { %v5889_v3 = vpop.permute.xlu1 %5888 }
0x2bd6   :  { %7887 = vmatmul.mubr.msk.f32.vlgmr.msra.gmra.mrb[50].mxu0 %vm268_vm2, %v5889_v3 }
0x2bd7   :  { %7895 = vmatpush3.xpose.msk.msra.mxu0 %vm268_vm2, %v9353_v61  ;;  %7896 = vmatprep.mubr.msk.f32.mxu0 %vm8487_vm1, %v8486_v8 }
0x2bd8   :  { %7904 = vmatprep.subr.mxu0 %v8486_v8 }
0x2bd9   :  { %v6226_v6 = vpop.permute.xlu1 %6225 }
0x2bda   :  { %7897 = vmatmul.mubr.msk.f32.vlgmr.msra.gmra.mrb[52].mxu0 %vm268_vm2, %v5626_v1 }
0x2bdb   :  { %7905 = vmatpush3.xpose.msk.msra.mxu0 %vm268_vm2, %v6228_v4  ;;  %7906 = vmatprep.mubr.msk.f32.mxu0 %vm8487_vm1, %v8486_v8 }
0x2bde   :  { %7907 = vmatmul.mubr.msk.f32.vlgmr.msra.gmra.mrb[54].mxu0 %vm268_vm2, %v6226_v6  ;;  %v7135_v6 = vld [vmem:[%s9532_s27 + $0x20] sm:$0xff] }
0x2c36   :  { %v5795_v9 = vpop.f32.mrb[68].mxu1 }
0x2c37   :  { %v5799_v10 = vmul.f32 0.25, %v5795_v9  ;;  %v7878_v11 = vpop.f32.mrb[69].mxu1  ;;  %v7136_v9 = vld [vmem:[%s9532_s27 + $0x28] sm:$0xff] }
0x2c38   :  { %v7137_v11 = vld [vmem:[%s9532_s27 + $0x30] sm:$0xff] }
0x2c39   :  { %v5800_v13 = vadd.f32 %v8398_v15, %v5799_v10  ;;  %v8142_v10 = vpack.c.bf16 %v7136_v9, %v7135_v6 }
0x2c3b   :  { %v5801_v16 = vsel %vm345_vm3, %v5800_v13, -inf  ;;  %8143 = vmatprep.subr.bf16.mxu0 %v8142_v10 }
0x2c3c   :  { %5802 = vmax.xlane.f32.xlu0 %v5801_v16  ;;  %8145 = vmatpush3.bf16.msra.mxu0 %v8142_v10  ;;  %v7175_v10 = vld [vmem:[%s9535_s26 + $0x70] sm:$0xff] }
0x2ca9   :  { %v5962_v17 = vpop.f32.mrb[50].mxu0 }
0x2caa   :  { %v5966_v35 = vmul.f32 0.25, %v5962_v17  ;;  %v7888_v44 = vpop.f32.mrb[51].mxu0 }
0x2cac   :  { %v5967_v30 = vadd.f32 %v8398_v15, %v5966_v35  ;;  %v7138_v15 = vld [vmem:[%s9532_s27 + $0x38] sm:$0xff] }
0x2cad   :  { %v6132_v14 = vpop.f32.mrb[52].mxu0 }
0x2cae   :  { %v6136_v26 = vmul.f32 0.25, %v6132_v14  ;;  %v7898_v18 = vpop.f32.mrb[53].mxu0  ;;  %v5968_v12 = vsel %vm345_vm3, %v5967_v30, -inf }
0x2caf   :  { %5969 = vmax.xlane.f32.xlu1 %v5968_v12 }
0x2cb0   :  { %v6137_v43 = vadd.f32 %v8399_v45, %v6136_v26 }
0x2cb1   :  { %v6299_v19 = vpop.f32.mrb[54].mxu0 }
0x2cb2   :  { %v6303_v31 = vmul.f32 0.25, %v6299_v19  ;;  %v7908_v22 = vpop.f32.mrb[55].mxu0  ;;  %v6138_v23 = vsel %vm345_vm3, %v6137_v43, -inf }
0x2cb3   :  { %6139 = vmax.xlane.f32.xlu0 %v6138_v23 }
0x2cb4   :  { %v6304_v24 = vadd.f32 %v8399_v45, %v6303_v31  ;;  %v7157_v45 = vld [vmem:[%s9533_s22 + $0x1] ss:$0 sm:$0xff] }
0x2cb6   :  { %v6305_v25 = vsel %vm345_vm3, %v6304_v24, -inf }
0x2cb7   :  { %6306 = vmax.xlane.f32.xlu0 %v6305_v25 }
0x2cc0   :  { %5812 = vrot.lane.b32.xlu1 %v9346_v60, %s8489_s5 }
0x2cc9   :  { %v5803_v27 = vpop.xlane.xlu0 %5802 }
0x2cca   :  { %v5804_v29 = vsub.f32 %v5800_v13, %v5803_v27  ;;  %v8146_v13 = vpack.c.bf16 %v7138_v15, %v7137_v11  ;;  %v7176_v11 = vld [vmem:[%s9535_s26 + $0x78] sm:$0xff] }
0x2ccb   :  { %v8170_v15 = vpack.c.bf16 %v7176_v11, %v7175_v10 }
0x2ccc   :  { %v5805_v32 = vmul.f32 1.442695, %v5804_v29  ;;  %8147 = vmatprep.subr.bf16.mxu0 %v8146_v13 }
0x2ccd   :  { %8149 = vmatpush3.bf16.msra.mxu0 %v8146_v13  ;;  %v7178_v13 = vld [vmem:[%s9538_s2 + $0x1] ss:$0 sm:$0xff] }
0x2cce   :  { %8364 = vpow2.f32 %v5805_v32 }
0x2cd8   :  { %v8365_v36 = vpop.eup %8364 }
0x2cd9   :  { %v5807_v37 = vsel %vm345_vm3, %v8365_v36, 0.0 }
0x2ce4   :  { %5808 = vadd.xlane.f32.xlu1 %v5807_v37 }
0x2d3c   :  { %v5970_v38 = vpop.xlane.xlu1 %5969 }
0x2d3d   :  { %v5971_v39 = vsub.f32 %v5967_v30, %v5970_v38 }
0x2d3f   :  { %v5972_v40 = vmul.f32 1.442695, %v5971_v39 }
0x2d40   :  { %v5813_v41 = vpop.permute.xlu1 %5812  ;;  %v6140_v42 = vpop.xlane.xlu0 %6139 }
0x2d41   :  { %8366 = vpow2.f32 %v5972_v40  ;;  %v6141_v20 = vsub.f32 %v6137_v43, %v6140_v42  ;;  %7880 = vmatpush3.msra.mxu1 %v5813_v41  ;;  %v7164_v42 = vld [vmem:[%s9534_s23 + $0x20] sm:$0xff] }
0x2d42   :  { %7889 = vmatprep.subr.mxu1 %v8486_v8 }
0x2d43   :  { %v6142_v46 = vmul.f32 1.442695, %v6141_v20  ;;  %v7165_v20 = vld [vmem:[%s9534_s23 + $0x28] sm:$0xff] }
0x2d44   :  { %v6307_v33 = vpop.xlane.xlu0 %6306 }
0x2d45   :  { %8368 = vpow2.f32 %v6142_v46  ;;  %v6308_v49 = vsub.f32 %v6304_v24, %v6307_v33  ;;  %v8150_v46 = vpack.c.bf16 %v7165_v20, %v7164_v42  ;;  %v7166_v33 = vld [vmem:[%s9534_s23 + $0x30] sm:$0xff]  ;;  %v6779_v42 = vld [vmem:[%s8681_s17 + $0x18] sm:$0xff] }
0x2d47   :  { %v6309_v48 = vmul.f32 1.442695, %v6308_v49  ;;  %v7167_v49 = vld [vmem:[%s9534_s23 + $0x38] sm:$0xff] }
0x2d49   :  { %8370 = vpow2.f32 %v6309_v48  ;;  %v8154_v48 = vpack.c.bf16 %v7167_v49, %v7166_v33 }
0x2d4b   :  { %v8367_v50 = vpop.eup %8366 }
0x2d4c   :  { %v5974_v51 = vsel %vm345_vm3, %v8367_v50, 0.0 }
0x2d4d   :  { %5975 = vadd.xlane.f32.xlu0 %v5974_v51  ;;  %v7170_v51 = vld [vmem:[%s9535_s26 + $0x48] sm:$0xff] }
0x2d4f   :  { %v8369_v34 = vpop.eup %8368 }
0x2d50   :  { %v6144_v47 = vsel %vm345_vm3, %v8369_v34, 0.0 }
0x2d51   :  { %6145 = vadd.xlane.f32.xlu1 %v6144_v47 }
0x2d53   :  { %v8371_v52 = vpop.eup %8370 }
0x2d54   :  { %v6311_v5 = vsel %vm345_vm3, %v8371_v52, 0.0 }
0x2d55   :  { %6312 = vadd.xlane.f32.xlu0 %v6311_v5 }
0x2d62   :  { %6149 = vrot.lane.b32.xlu1 %v9353_v61, %s8489_s5 }
0x2d66   :  { %6316 = vrot.lane.b32.xlu1 %v9353_v61, %s8490_s15 }
0x2d6b   :  { %5979 = vrot.lane.b32.xlu0 %v9346_v60, %s8490_s15 }
0x2d71   :  { %v5809_v28 = vpop.xlane.xlu1 %5808 }
0x2d72   :  { %8372 = vrcp.f32 %v5809_v28  ;;  %v7173_v28 = vld [vmem:[%s9535_s26 + $0x60] sm:$0xff] }
0x2d7c   :  { %v8373_v7 = vpop.eup %8372 }
0x2d7d   :  { %v5811_v53 = vmul.f32 %v8373_v7, %v8365_v36  ;;  %v7174_v7 = vld [vmem:[%s9535_s26 + $0x68] sm:$0xff] }
0x2d7f   :  { %7882 = vmatmul.mubr.msk.f32.vlgmr.msra.gmra.mrb[70].mxu1 %vm345_vm3, %v5811_v53  ;;  %v8166_v53 = vpack.c.bf16 %v7174_v7, %v7173_v28  ;;  %v7187_v28 = vld [vmem:[%s9541_s11 + $0x1] ss:$0 sm:$0xff] }
0x2d80   :  { %7891 = vmatprep.mubr.msk.f32.mxu1 %vm8487_vm1, %v8486_v8 }
0x2dda   :  { %v5976_v54 = vpop.xlane.xlu0 %5975 }
0x2ddb   :  { %8374 = vrcp.f32 %v5976_v54 }
0x2dde   :  { %v6146_v55 = vpop.xlane.xlu1 %6145 }
0x2ddf   :  { %8376 = vrcp.f32 %v6146_v55 }
0x2de2   :  { %v6313_v21 = vpop.xlane.xlu0 %6312  ;;  %v6150_v61 = vpop.permute.xlu1 %6149 }
0x2de3   :  { %8378 = vrcp.f32 %v6313_v21 }
0x2de5   :  { %v8375_v58 = vpop.eup %8374 }
0x2de6   :  { %v5978_v59 = vmul.f32 %v8375_v58, %v8367_v50  ;;  %v5980_v62 = vpop.permute.xlu0 %5979  ;;  %v6317_v0 = vpop.permute.xlu1 %6316  ;;  %v7169_v50 = vld [vmem:[%s9535_s26 + $0x40] sm:$0xff] }
0x2de7   :  { %7890 = vmatpush3.msra.mxu1 %v5980_v62  ;;  %v8158_v47 = vpack.c.bf16 %v7170_v51, %v7169_v50 }
0x2de8   :  { %7892 = vmatmul.mubr.msk.f32.vlgmr.msra.gmra.mrb[72].mxu1 %vm345_vm3, %v5978_v59  ;;  %7899 = vmatprep.subr.mxu1 %v8486_v8 }
0x2de9   :  { %v8377_v60 = vpop.eup %8376  ;;  %7900 = vmatpush3.msra.mxu1 %v6150_v61  ;;  %7901 = vmatprep.mubr.msk.f32.mxu1 %vm8487_vm1, %v8486_v8 }
0x2dea   :  { %v6148_v63 = vmul.f32 %v8377_v60, %v8369_v34  ;;  %7909 = vmatprep.subr.mxu1 %v8486_v8  ;;  %v7171_v34 = vld [vmem:[%s9535_s26 + $0x50] sm:$0xff]  ;;  %8159 = vmatprep.subr.bf16.mxu0 %v8158_v47  ;;  %v7162_v60 = vld [vmem:[%s9536_s28 + $0x1] ss:$0 sm:$0xff] }
0x2dec   :  { %7902 = vmatmul.mubr.msk.f32.vlgmr.msra.gmra.mrb[74].mxu1 %vm345_vm3, %v6148_v63 }
0x2ded   :  { %v8379_v1 = vpop.eup %8378  ;;  %7910 = vmatpush3.msra.mxu1 %v6317_v0  ;;  %7911 = vmatprep.mubr.msk.f32.mxu1 %vm8487_vm1, %v8486_v8  ;;  %v7163_v0 = vld [vmem:[%s9537_s1 + $0x1] ss:$0 sm:$0xff] }
0x2dee   :  { %v6315_v2 = vmul.f32 %v8379_v1, %v8371_v52  ;;  %8151 = vmatprep.subr.bf16.mxu1 %v8150_v46  ;;  %v7172_v52 = vld [vmem:[%s9535_s26 + $0x58] sm:$0xff] }
0x2def   :  { %v8162_v5 = vpack.c.bf16 %v7172_v52, %v7171_v34 }
0x2df0   :  { %7912 = vmatmul.mubr.msk.f32.vlgmr.msra.gmra.mrb[76].mxu1 %vm345_vm3, %v6315_v2 }
0x2df1   :  { %8153 = vmatpush3.bf16.msra.mxu1 %v8150_v46 }
0x2df2   :  { %8155 = vmatprep.subr.bf16.mxu1 %v8154_v48 }
0x2df5   :  { %8157 = vmatpush3.bf16.msra.mxu1 %v8154_v48 }
0x2e52   :  { %v5884_v3 = vpop.f32.mrb[70].mxu1 }
0x2e53   :  { %v7883_v4 = vpop.f32.mrb[71].mxu1 }
0x2ebb   :  { %v6051_v16 = vpop.f32.mrb[72].mxu1 }
0x2ebc   :  { %6056 = vrot.lane.b32.xlu0 %v6051_v16, %s8493_s13  ;;  %v7893_v8 = vpop.f32.mrb[73].mxu1 }
0x2ebf   :  { %v6221_v17 = vpop.f32.mrb[74].mxu1 }
0x2ec0   :  { %v7903_v35 = vpop.f32.mrb[75].mxu1 }
0x2ec3   :  { %v6388_v44 = vpop.f32.mrb[76].mxu1 }
0x2ec4   :  { %6393 = vrot.lane.b32.xlu1 %v6388_v44, %s8493_s13  ;;  %v7913_v30 = vpop.f32.mrb[77].mxu1 }
0x2f2e   :  { %v6057_v14 = vpop.permute.xlu0 %6056 }
0x2f2f   :  { %v6059_v26 = vsel %vm268_vm2, %v5884_v3, %v6057_v14  ;;  %v7181_v14 = vld [vmem:[%s9539_s7 + $0x1] ss:$0 sm:$0xff] }
0x2f30   :  { %7922 = vmatprep.mubr.msk.f32.mxu0 %vm183_vm0, %v6059_v26 }
0x2f36   :  { %v6394_v18 = vpop.permute.xlu1 %6393 }
0x2f37   :  { %v6396_v12 = vsel %vm268_vm2, %v6221_v17, %v6394_v18 }
0x2f38   :  { %7923 = vmatmul.mubr.msk.f32.vlgmr.msra.gmra.mrb[56].mxu0 %vm183_vm0, %v6396_v12 }
0x2f39   :  { %8161 = vmatpush3.bf16.msra.mxu0 %v8158_v47  ;;  %v7186_v47 = vld [vmem:[%s9540_s10 + $0x1] ss:$0 sm:$0xff] }
0x2f3a   :  { %8163 = vmatprep.subr.bf16.mxu0 %v8162_v5 }
0x2f3d   :  { %8165 = vmatpush3.bf16.msra.mxu0 %v8162_v5 }
0x2f3e   :  { %8167 = vmatprep.subr.bf16.mxu0 %v8166_v53 }
0x2f41   :  { %8169 = vmatpush3.bf16.msra.mxu0 %v8166_v53 }
0x2f42   :  { %8171 = vmatprep.subr.bf16.mxu0 %v8170_v15 }
0x2f45   :  { %8173 = vmatpush3.bf16.msra.mxu0 %v8170_v15 }
0x300b   :  { %v7924_v43 = vpop.f32.mrb[56].mxu0 }
0x300c   :  { %v6481_v19 = vadd.f32 %v7924_v43, %v7157_v45  ;;  %v6475_v31 = vpop.f32.mrb[57].mxu0 }
0x300d   :  { %v6476_v22 = vadd.f32 %v7157_v45, %v6475_v31 }
0x300e   :  { %v6485_v23 = vadd.f32 %v6481_v19, %v9338_v57 }
0x300f   :  { %v6484_v24 = vadd.f32 %v6476_v22, %v9336_v56 }
0x3010   :  { %v6493_v25 = vsel %vm183_vm0, %v6485_v23, 0.0 }
0x3011   :  { %6494 = vadd.xlane.f32.xlu1 %v6493_v25  ;;  %v6490_v27 = vsel %vm183_vm0, %v6484_v24, 0.0 }
0x3012   :  { %6491 = vadd.xlane.f32.xlu0 %v6490_v27 }
0x309e   :  { %v6495_v29 = vpop.xlane.xlu1 %6494 }
0x309f   :  { %v6497_v32 = vmul.f32 0.03125, %v6495_v29  ;;  %v6492_v36 = vpop.xlane.xlu0 %6491 }
0x30a0   :  { %v6496_v37 = vmul.f32 0.03125, %v6492_v36 }
0x30a1   :  { %v6499_v38 = vsub.f32 %v6485_v23, %v6497_v32 }
0x30a2   :  { %v6498_v39 = vsub.f32 %v6484_v24, %v6496_v37 }
0x30a3   :  { %v6501_v57 = vmul.f32 %v6499_v38, %v6499_v38 }
0x30a4   :  { %v6500_v40 = vmul.f32 %v6498_v39, %v6498_v39 }
0x30a5   :  { %v6505_v41 = vsel %vm183_vm0, %v6501_v57, 0.0 }
0x30a6   :  { %v6502_v56 = vsel %vm183_vm0, %v6500_v40, 0.0  ;;  %v6776_v40 = vld [vmem:[%s8681_s17] sm:$0xff] }
0x30a7   :  { %6503 = vadd.xlane.f32.xlu0 %v6502_v56  ;;  %v6777_v56 = vld [vmem:[%s8681_s17 + $0x8] sm:$0xff] }
0x30a8   :  { %v8174_v57 = vpack.c.bf16 %v6777_v56, %v6776_v40 }
0x30aa   :  { %8175 = vmatprep.subr.bf16.mxu1 %v8174_v57 }
0x30ab   :  { %6506 = vadd.xlane.f32.xlu0 %v6505_v41  ;;  %v6778_v41 = vld [vmem:[%s8681_s17 + $0x10] sm:$0xff] }
0x30ac   :  { %v8178_v20 = vpack.c.bf16 %v6779_v42, %v6778_v41 }
0x3134   :  { %v6504_v54 = vpop.xlane.xlu0 %6503 }
0x3135   :  { %v6508_v55 = vmul.f32 0.03125, %v6504_v54 }
0x3137   :  { %v6510_v21 = vadd.f32 1e-05, %v6508_v55 }
0x3138   :  { %v6507_v58 = vpop.xlane.xlu0 %6506 }
0x3139   :  { %8380 = vrsqrt.f32 %v6510_v21  ;;  %v6509_v59 = vmul.f32 0.03125, %v6507_v58  ;;  %v7188_v58 = vld [vmem:[%s8686_s9] ss:$0 sm:$0xff]  ;;  %s8494_s9 = smov [#allocation4]  }
0x313a   :  { %s6911_s17 = sshll.u32 %s8494_s9, 4  ;;  %s6912_s17 = int_to_ptr.vmem [resolvable:$true] %s6911_s17 }
0x313b   :  { %v6511_v61 = vadd.f32 1e-05, %v6509_v59  ;;  %s8400_s0 = scalar_lea.vmem %s6912_s17, 256  ;;  %p8405_p1 = scmp.lt.s32.totalorder %s6912_s17, %s6912_s17 }
0x313c   :  { %p8401_p0 = scmp.ne.s32.totalorder %s6912_s17, %s8400_s0  ;;  %p8406_p2 = scmp.lt.s32.totalorder %s8400_s0, %s8400_s0 }
0x313d   :  { %8382 = vrsqrt.f32 %v6511_v61 }
0x313e   :  { %p8407_p3 = por %p8406_p2, %p8405_p1 }
0x3140   :  { %p8408_p4 = pnand %p8407_p3, %p8401_p0 }
0x3143   :  { %v8381_v62 = vpop.eup %8380 }
0x3144   :  { %v6514_v63 = vmul.f32 %v8381_v62, %v6498_v39 }
0x3146   :  { %v6522_v1 = vmul.f32 %v7162_v60, %v6514_v63 }
0x3147   :  { %v8383_v2 = vpop.eup %8382 }
0x3148   :  { %v6515_v3 = vmul.f32 %v8383_v2, %v6499_v38  ;;  %v6530_v4 = vadd.f32 %v7163_v0, %v6522_v1 }
0x314a   :  { %v6523_v6 = vmul.f32 %v7162_v60, %v6515_v3  ;;  %7933 = vmatprep.mubr.msk.f32.mxu1 %vm183_vm0, %v6530_v4 }
0x314c   :  { %v6531_v9 = vadd.f32 %v7163_v0, %v6523_v6 }
0x314e   :  { %7934 = vmatmul.mubr.msk.f32.vlgmr.msra.gmra.mrb[78].mxu1 %vm183_vm0, %v6531_v9 }
0x314f   :  { %8177 = vmatpush3.bf16.msra.mxu1 %v8174_v57 }
0x3150   :  { %8179 = vmatprep.subr.bf16.mxu1 %v8178_v20 }
0x3153   :  { %8181 = vmatpush3.bf16.msra.mxu1 %v8178_v20 }
0x3221   :  { %v7935_v16 = vpop.f32.mrb[78].mxu1 }
0x3222   :  { %v6634_v8 = vadd.f32 %v7935_v16, %v7178_v13  ;;  %v6628_v17 = vpop.f32.mrb[79].mxu1 }
0x3223   :  { %v6629_v35 = vadd.f32 %v7178_v13, %v6628_v17 }
0x3224   :  { %v6638_v30 = vmax.f32 %v6634_v8, 0.0 }
0x3225   :  { %v6637_v44 = vmax.f32 %v6629_v35, 0.0 }
0x3227   :  { %7952 = vmatprep.mubr.msk.f32.mxu0 %vm1186_vm4, %v6637_v44 }
0x3228   :  { %7953 = vmatmul.mubr.msk.f32.vlgmr.msra.gmra.mrb[58].mxu0 %vm1186_vm4, %v6638_v30 }
0x32fb   :  { %v7954_v26 = vpop.f32.mrb[58].mxu0 }
0x32fc   :  { %v6723_v18 = vadd.f32 %v7954_v26, %v7181_v14  ;;  %v6717_v12 = vpop.f32.mrb[59].mxu0 }
0x32fd   :  { %v6718_v45 = vadd.f32 %v7181_v14, %v6717_v12 }
0x32fe   :  { %v6727_v43 = vadd.f32 %v6723_v18, %v6531_v9 }
0x32ff   :  { %v6726_v19 = vadd.f32 %v6718_v45, %v6530_v4 }
0x3300   :  { %v6735_v31 = vsel %vm183_vm0, %v6727_v43, 0.0 }
0x3301   :  { %6736 = vadd.xlane.f32.xlu0 %v6735_v31  ;;  %v6732_v22 = vsel %vm183_vm0, %v6726_v19, 0.0 }
0x3302   :  { %6733 = vadd.xlane.f32.xlu1 %v6732_v22 }
0x338e   :  { %v6737_v23 = vpop.xlane.xlu0 %6736 }
0x338f   :  { %v6739_v24 = vmul.f32 0.03125, %v6737_v23  ;;  %v6734_v25 = vpop.xlane.xlu1 %6733 }
0x3390   :  { %v6738_v27 = vmul.f32 0.03125, %v6734_v25 }
0x3391   :  { %v6741_v29 = vsub.f32 %v6727_v43, %v6739_v24 }
0x3392   :  { %v6740_v32 = vsub.f32 %v6726_v19, %v6738_v27 }
0x3393   :  { %v6743_v36 = vmul.f32 %v6741_v29, %v6741_v29 }
0x3394   :  { %v6742_v37 = vmul.f32 %v6740_v32, %v6740_v32 }
0x3395   :  { %v6747_v38 = vsel %vm183_vm0, %v6743_v36, 0.0 }
0x3396   :  { %6748 = vadd.xlane.f32.xlu0 %v6747_v38  ;;  %v6744_v39 = vsel %vm183_vm0, %v6742_v37, 0.0 }
0x3397   :  { %6745 = vadd.xlane.f32.xlu1 %v6744_v39 }
0x3423   :  { %v6749_v46 = vpop.xlane.xlu0 %6748 }
0x3424   :  { %v6751_v33 = vmul.f32 0.03125, %v6749_v46  ;;  %v6746_v49 = vpop.xlane.xlu1 %6745 }
0x3425   :  { %v6750_v48 = vmul.f32 0.03125, %v6746_v49 }
0x3426   :  { %v6753_v50 = vadd.f32 1e-05, %v6751_v33 }
0x3427   :  { %v6752_v51 = vadd.f32 1e-05, %v6750_v48 }
0x3428   :  { %8384 = vrsqrt.f32 %v6753_v50 }
0x3429   :  { %8386 = vrsqrt.f32 %v6752_v51 }
0x3432   :  { %v8385_v34 = vpop.eup %8384 }
0x3433   :  { %v8387_v52 = vpop.eup %8386  ;;  %v6757_v5 = vmul.f32 %v8385_v34, %v6741_v29 }
0x3434   :  { %v6756_v7 = vmul.f32 %v8387_v52, %v6740_v32 }
0x3435   :  { %v6765_v53 = vmul.f32 %v7186_v47, %v6757_v5 }
0x3436   :  { %v6764_v54 = vmul.f32 %v7186_v47, %v6756_v7 }
0x3437   :  { %v6773_v55 = vadd.f32 %v7187_v28, %v6765_v53 }
0x3438   :  { %v6772_v21 = vadd.f32 %v7187_v28, %v6764_v54 }
0x3439   :  { %6775 = vst.msk [vmem:[#allocation4 + $0x8] sm:$0xff] %vm183_vm0, %v6773_v55 }
0x343a   :  { %7963 = vmatprep.mubr.msk.f32.mxu1 %vm183_vm0, %v6772_v21  ;;  %6774 = vst.msk [vmem:[#allocation4] sm:$0xff] %vm183_vm0, %v6772_v21 }
0x343b   :  { %7964 = vmatmul.mubr.msk.f32.vlgmr.msra.gmra.mrb[80].mxu1 %vm183_vm0, %v6773_v55 }
0x350e   :  { %v7965_v59 = vpop.f32.mrb[80].mxu1 }
0x350f   :  { %v6865_v61 = vadd.f32 %v7965_v59, %v7188_v58  ;;  %v6859_v62 = vpop.f32.mrb[81].mxu1 }
0x3510   :  { %v6860_v60 = vadd.f32 %v7188_v58, %v6859_v62 }
0x3511   :  { %v6871_v63 = vsel %vm183_vm0, %v6865_v61, -inf }
0x3512   :  { %6872 = vmax.xlane.f32.xlu0 %v6871_v63  ;;  %v6868_v0 = vsel %vm183_vm0, %v6860_v60, -inf }
0x3513   :  { %6869 = vmax.xlane.f32.xlu1 %v6868_v0 }
0x359f   :  { %v6873_v1 = vpop.xlane.xlu0 %6872 }
0x35a0   :  { %v6875_v2 = vsub.f32 %v6865_v61, %v6873_v1  ;;  %v6870_v3 = vpop.xlane.xlu1 %6869 }
0x35a1   :  { %v6874_v4 = vsub.f32 %v6860_v60, %v6870_v3 }
0x35a2   :  { %v6878_v6 = vmul.f32 1.442695, %v6875_v2 }
0x35a3   :  { %v6876_v9 = vmul.f32 1.442695, %v6874_v4 }
0x35a4   :  { %8388 = vpow2.f32 %v6878_v6 }
0x35a5   :  { %8390 = vpow2.f32 %v6876_v9 }
0x35ae   :  { %v8389_v10 = vpop.eup %8388 }
0x35af   :  { %v8391_v11 = vpop.eup %8390  ;;  %v6883_v15 = vsel %vm183_vm0, %v8389_v10, 0.0 }
0x35b0   :  { %6884 = vadd.xlane.f32.xlu0 %v6883_v15  ;;  %v6880_v13 = vsel %vm183_vm0, %v8391_v11, 0.0 }
0x35b1   :  { %6881 = vadd.xlane.f32.xlu1 %v6880_v13 }
0x35b2   :  { %8411 = shalt.err (!%p8408_p4)
}
0x35b3   :  { %s8412_s5 = scalar_lea.hbm %s8696_s21, 256 }
0x35b4   :  { %p8413_p5 = scmp.ne.s32.totalorder %s8696_s21, %s8412_s5  ;;  %p8416_p6 = scmp.lt.u32.totalorder %s8412_s5, %s8696_s21 }
0x35b6   :  { %p8418_p7 = pnand %p8416_p6, %p8413_p5 }
0x35b8   :  { %8421 = shalt.err (!%p8418_p7)
}
0x35b9   :  { %s8495_s15 = smov 128   ;;  %s8496_s16 = smov 8  }
0x35ba   :  { %6917 = dma.vmem_to_hbm [thread:$0]  %s6912_s17, 256, %s8696_s21, [#allocation5], %s8495_s15, %s8495_s15, %s8496_s16  }
0x35bb   :  { %s8497_s18 = smov [#allocation2]  }
0x35bc   :  { %s6899_s13 = sshll.u32 %s8497_s18, 4  ;;  %s6900_s13 = int_to_ptr.vmem [resolvable:$true] %s6899_s13 }
0x35bd   :  { %s8422_s25 = scalar_lea.vmem %s6900_s13, 256  ;;  %p8427_p9 = scmp.lt.s32.totalorder %s6900_s13, %s6900_s13 }
0x35be   :  { %p8423_p8 = scmp.ne.s32.totalorder %s6900_s13, %s8422_s25  ;;  %p8428_p10 = scmp.lt.s32.totalorder %s8422_s25, %s8422_s25 }
0x35c0   :  { %p8429_p11 = por %p8428_p10, %p8427_p9 }
0x35c2   :  { %p8430_p12 = pnand %p8429_p11, %p8423_p8 }
0x363d   :  { %v6885_v16 = vpop.xlane.xlu0 %6884 }
0x363e   :  { %8392 = vlog2.f32 %v6885_v16  ;;  %v6882_v8 = vpop.xlane.xlu1 %6881 }
0x363f   :  { %8394 = vlog2.f32 %v6882_v8 }
0x3648   :  { %v8393_v17 = vpop.eup %8392 }
0x3649   :  { %v8395_v35 = vpop.eup %8394  ;;  %v6889_v44 = vmul.f32 0.6931472, %v8393_v17 }
0x364a   :  { %v6887_v30 = vmul.f32 0.6931472, %v8395_v35 }
0x364b   :  { %v6891_v14 = vsub.f32 %v6875_v2, %v6889_v44 }
0x364c   :  { %v6890_v26 = vsub.f32 %v6874_v4, %v6887_v30 }
0x364d   :  { %6893 = vst.msk [vmem:[#allocation2 + $0x8] sm:$0xff] %vm183_vm0, %v6891_v14 }
0x364e   :  { %6892 = vst.msk [vmem:[#allocation2] sm:$0xff] %vm183_vm0, %v6890_v26 }
0x364f   :  { %8433 = shalt.err (!%p8430_p12)
}
0x3650   :  { %s8434_s21 = scalar_lea.hbm %s8691_s4, 256 }
0x3651   :  { %p8435_p13 = scmp.ne.s32.totalorder %s8691_s4, %s8434_s21  ;;  %p8438_p0 = scmp.lt.u32.totalorder %s8434_s21, %s8691_s4 }
0x3653   :  { %p8440_p1 = pnand %p8438_p0, %p8435_p13 }
0x3655   :  { %8443 = shalt.err (!%p8440_p1)
}
0x3656   :  { %6905 = dma.vmem_to_hbm [thread:$0]  %s6900_s13, 256, %s8691_s4, [#allocation3], %s8495_s15, %s8495_s15, %s8496_s16  }
0x3657   :  { %8444 = dma.done.wait [#allocation3], 256  }
0x3658   :  { %8445 = vsyncadd [#allocation3], 4294967040 }
0x3659   :  { %8446 = dma.done.wait [#allocation5], 256  }
0x365a   :  { %8447 = vsyncadd [#allocation5], 4294967040 }
0x365b   :  { %6924 = vsyncpa [#allocation3], 1 }
0x365c   :  { %6925 = vsyncpa [#allocation5], 1 }

</bundles_post_ra>
